<compile_context>
chip_gen: v6e
topology: v6e:2x2x1
jax: 0.10.0
libtpu: 0.0.40
codegen_flags: <defaults>
</compile_context>

<pallas_src>
import functools

import jax
import jax.numpy as jnp
from jax import lax
from jax.experimental import pallas as pl
from jax.experimental.pallas import tpu as pltpu


def _silu(x):
    # exact sigmoid (no approx reciprocal - review correctness note)
    return x * pl.reciprocal(1.0 + jnp.exp(-x))


def _softplus(x):
    # clamp the exp argument so the untaken branch cannot overflow
    return jnp.where(x > 20.0, x, jnp.log(1.0 + jnp.exp(jnp.minimum(x, 20.0))))


# ---------------------------------------------------------------------------
# Fused encoder kernel.
# grid = (batch_blocks, depth); rows inside a block are TIME-MAJOR: row t*Bt + b.
# ---------------------------------------------------------------------------
def mamba_encoder_kernel(
        x_ref, pos_ref, cls_ref, w_emb_ref,
        ln_g_ref, ln_b_ref, w_in_ref, conv_w_ref, conv_b_ref,
        w_dbc_ref, dt_bias_ref, neg_a_ref, d_row_ref, w_out_ref,
        out_ref,
        act_ref, dA_ref, dbu_ref, c_ref, h_ref, y_ref,
        *, seq_len):
    L = seq_len
    M = x_ref.shape[1]                       # Bt * L rows (time-major)
    Bt = cls_ref.shape[1]
    E = w_emb_ref.shape[1]
    K = conv_w_ref.shape[1]
    d_state = neg_a_ref.shape[1]
    d_inner = neg_a_ref.shape[2]
    li = pl.program_id(1)

    # ---- layer 0 only: Linear embedding + position + class embedding ----
    @pl.when(li == 0)
    def _embed():
        emb = jnp.dot(x_ref[0], w_emb_ref[...], preferred_element_type=jnp.float32)
        cls_m = jnp.concatenate([cls_ref[0]] * L, axis=0)     # (M, E) class row per (t, b)
        act_ref[...] = emb + pos_ref[...] + cls_m

    act = act_ref[...]

    # ---- VSSBlock: LayerNorm (eps = 1e-6) ----
    mu = jnp.mean(act, axis=-1, keepdims=True)
    xc = act - mu
    var = jnp.mean(xc * xc, axis=-1, keepdims=True)
    xn = xc * lax.rsqrt(var + 1e-6) * ln_g_ref[0] + ln_b_ref[0]

    # ---- Mamba in_proj: fused x branch || z gate (one lane-dense matmul) ----
    proj = jnp.dot(xn, w_in_ref[0], preferred_element_type=jnp.float32)
    xi = proj[:, :d_inner]
    z = proj[:, d_inner:]

    # ---- causal depthwise conv1d: XLU rolls + iota mask (time-major: shift s == s*Bt rows)
    cw = conv_w_ref[0]                                        # (K, d_inner)
    row = lax.broadcasted_iota(jnp.int32, (M, d_inner), 0)
    conv = xi * cw[K - 1:K, :]
    for k in range(K - 1):
        s = K - 1 - k
        shifted = pltpu.roll(xi, shift=s * Bt, axis=0)
        conv = conv + jnp.where(row >= s * Bt, shifted, 0.0) * cw[k:k + 1, :]
    u = _silu(conv + conv_b_ref[0])

    # ---- fused delta / B / C projection: single MXU pass ----
    tmp = jnp.dot(u, w_dbc_ref[0], preferred_element_type=jnp.float32)
    delta = _softplus(tmp[:, :d_inner] + dt_bias_ref[0])      # (M, d_inner)
    bmat = tmp[:, d_inner:d_inner + d_state]                  # (M, d_state)
    cmat = tmp[:, d_inner + d_state:]                         # (M, d_state)

    # ---- scan precompute: whole-tensor broadcasts, fused exp (no per-row stores,
    #      no C broadcast buffer) ----
    neg_a = neg_a_ref[0]                                      # (d_state, d_inner)
    dA_ref[...] = jnp.exp(delta[:, None, :] * neg_a[None])            # (M, ds, di)
    dbu_ref[...] = bmat[:, :, None] * (delta * u)[:, None, :]         # (M, ds, di)
    c_ref[...] = cmat                                                  # (M, ds)

    # ---- selective scan, vectorized across the Bt sequences of this block ----
    h_ref[...] = jnp.zeros_like(h_ref)

    def scan_step(t, carry):
        r = t * Bt                                            # contiguous time-step slab
        h = dA_ref[pl.ds(r, Bt)] * h_ref[...] + dbu_ref[pl.ds(r, Bt)]
        h_ref[...] = h
        y_ref[pl.ds(r, Bt)] = jnp.sum(h * c_ref[pl.ds(r, Bt)][:, :, None], axis=1)
        return carry

    lax.fori_loop(0, L, scan_step, 0, unroll=True)

    # ---- D skip, SiLU gate, out_proj, residual (drop_path / dropout = identity) ----
    y = (y_ref[...] + u * d_row_ref[0]) * _silu(z)
    act_new = act + jnp.dot(y, w_out_ref[0], preferred_element_type=jnp.float32)
    act_ref[...] = act_new

    # ---- module output: last time step = last Bt contiguous rows (lane-dense block) ----
    @pl.when(li == pl.num_programs(1) - 1)
    def _out():
        out_ref[0] = act_new[M - Bt:, :]


# ---------------------------------------------------------------------------
# Wrapper
# ---------------------------------------------------------------------------
def _layer_spec(w):
    nd = w.ndim
    return pl.BlockSpec((1,) + tuple(w.shape[1:]),
                        lambda i, li, _n=nd: (li,) + (0,) * (_n - 1))


def _const_spec(w):
    nd = w.ndim
    return pl.BlockSpec(tuple(w.shape), lambda i, li, _n=nd: (0,) * _n)


def _pick_block_batch(batch, length, d_state, d_inner,
                      scratch_budget_bytes=10 * 1024 * 1024):
    """Sequences per grid step.  Keep the dA/dBu scan scratch under a conservative budget
    (v5e scoped-VMEM default 16 MiB, v7x physical 64 MiB) and keep >=2 batch grid blocks
    when the batch is large enough for the 'parallel' axis to be sharded across cores."""
    divisors = [bt for bt in range(1, batch + 1) if batch % bt == 0]
    fitting = [bt for bt in divisors
               if 2 * length * bt * d_state * d_inner * 4 <= scratch_budget_bytes]
    pool = fitting if fitting else divisors[:1]
    if batch >= 8:
        multi = [bt for bt in pool if batch // bt >= 2]
        pool = multi if multi else pool
    return max(pool)


def mamba_encoder_forward(params, inputs, class_label):
    B, L, in_dim = inputs.shape
    E = params["w_emb"].shape[1]
    depth, d_state, d_inner = params["neg_a"].shape
    # The reference adds a (B,1,class_size) embedding to (B,L,E): needs class_size == E.
    assert params["cls_table"].shape[1] == E

    Bt = _pick_block_batch(B, L, d_state, d_inner)
    M = Bt * L
    nblk = B // Bt

    # inputs re-laid out per batch block with TIME-MAJOR rows: block[i, t*Bt + b] = x[i*Bt+b, t]
    x_blocks = (inputs.reshape(nblk, Bt, L, in_dim)
                .transpose(0, 2, 1, 3)
                .reshape(nblk, M, in_dim))
    # position embedding + Linear bias, pre-repeated to one (M, E) tile (DMA'd once)
    pos_rows = jnp.repeat(params["pos"] + params["b_emb"], Bt, axis=0)
    # class-embedding gather (nn.Embedding lookup) done as wrapper glue
    cls_blocks = params["cls_table"][class_label].reshape(nblk, Bt, E)

    layer_weights = (params["ln_g"], params["ln_b"], params["w_in"],
                     params["conv_w"], params["conv_b"], params["w_dbc"],
                     params["dt_bias"], params["neg_a"], params["d_row"],
                     params["w_out"])

    out = pl.pallas_call(
        functools.partial(mamba_encoder_kernel, seq_len=L),
        out_shape=jax.ShapeDtypeStruct((nblk, Bt, E), jnp.float32),
        grid=(nblk, depth),
        in_specs=[pl.BlockSpec((1, M, in_dim), lambda i, li: (i, 0, 0)),
                  _const_spec(pos_rows),
                  pl.BlockSpec((1, Bt, E), lambda i, li: (i, 0, 0)),
                  _const_spec(params["w_emb"])]
                 + [_layer_spec(w) for w in layer_weights],
        out_specs=pl.BlockSpec((1, Bt, E), lambda i, li: (i, 0, 0)),
        scratch_shapes=[
            pltpu.VMEM((M, E), jnp.float32),                      # act (resident across layers)
            pltpu.VMEM((M, d_state, d_inner), jnp.float32),       # dA  = exp(delta * A)
            pltpu.VMEM((M, d_state, d_inner), jnp.float32),       # dB * u
            pltpu.VMEM((M, d_state), jnp.float32),                # C
            pltpu.VMEM((Bt, d_state, d_inner), jnp.float32),      # h state (Bt sequences)
            pltpu.VMEM((M, d_inner), jnp.float32),                # y
        ],
        compiler_params=pltpu.CompilerParams(
            dimension_semantics=("parallel", "arbitrary"),
            vmem_limit_bytes=48 * 1024 * 1024),
    )(x_blocks, pos_rows, cls_blocks, params["w_emb"], *layer_weights)
    return out.reshape(B, E)


# ---------------------------------------------------------------------------
# Deterministic synthetic parameters (shapes per module __init__), pre-fused /
# pre-concatenated for the kernel.
# ---------------------------------------------------------------------------
def init_params(key, input_size, num_classes, class_size, embedding_size,
                depth, length, d_state=64, d_conv=4, expand=2):
    d_inner = expand * embedding_size
    dt_rank = max(1, -(-embedding_size // 16))                  # ceil(E / 16)

    def rnd(k, shape, scale=0.1):
        return jax.random.normal(k, shape, jnp.float32) * scale

    keys = jax.random.split(key, 3 + depth)
    params = {
        "w_emb": rnd(keys[0], (input_size, embedding_size)),
        "b_emb": jnp.zeros((1, embedding_size), jnp.float32),
        "pos": rnd(keys[1], (length, embedding_size)),
        "cls_table": rnd(keys[2], (num_classes, class_size)),
    }

    # S4D-real A init: A[d, n] = n + 1  ->  A = -(n + 1), broadcast to (d_state, d_inner)
    neg_a = -(jnp.arange(1, d_state + 1, dtype=jnp.float32)[:, None]
              * jnp.ones((1, d_inner), jnp.float32))

    names = ("ln_g", "ln_b", "w_in", "conv_w", "conv_b", "w_dbc",
             "dt_bias", "neg_a", "d_row", "w_out")
    stacks = {k: [] for k in names}
    for i in range(depth):
        lk = jax.random.split(keys[3 + i], 9)
        w_in_x = rnd(lk[0], (embedding_size, d_inner))
        w_in_z = rnd(lk[1], (embedding_size, d_inner))
        w_x_dt = rnd(lk[2], (d_inner, dt_rank))
        w_dt = rnd(lk[3], (dt_rank, d_inner))
        w_x_b = rnd(lk[4], (d_inner, d_state))
        w_x_c = rnd(lk[5], (d_inner, d_state))

        stacks["ln_g"].append(jnp.ones((1, embedding_size), jnp.float32))
        stacks["ln_b"].append(jnp.zeros((1, embedding_size), jnp.float32))
        stacks["w_in"].append(jnp.concatenate([w_in_x, w_in_z], axis=1))
        stacks["conv_w"].append(rnd(lk[6], (d_conv, d_inner), 0.2))
        stacks["conv_b"].append(jnp.zeros((1, d_inner), jnp.float32))
        # fused projection: [x_proj_dt @ dt_proj | x_proj_B | x_proj_C] -> (di, di + 2*ds)
        stacks["w_dbc"].append(jnp.concatenate([w_x_dt @ w_dt, w_x_b, w_x_c], axis=1))
        stacks["dt_bias"].append(rnd(lk[7], (1, d_inner)))
        stacks["neg_a"].append(neg_a)
        stacks["d_row"].append(jnp.ones((1, d_inner), jnp.float32))
        stacks["w_out"].append(rnd(lk[8], (d_inner, embedding_size)))
    params.update({k: jnp.stack(v, axis=0) for k, v in stacks.items()})
    return params


if __name__ == "__main__":
    B, L = 2, 8
    input_size, num_classes, class_size, embedding_size, depth = 16, 10, 64, 64, 2

    key = jax.random.PRNGKey(0)
    kp, kx, kc = jax.random.split(key, 3)
    params = init_params(kp, input_size, num_classes, class_size,
                         embedding_size, depth, L, d_state=64)
    inputs = jax.random.normal(kx, (B, L, input_size), jnp.float32)
    class_label = jax.random.randint(kc, (B,), 0, num_classes)

    out = mamba_encoder_forward(params, inputs, class_label)
    out = jax.block_until_ready(out)
    assert out.shape == (B, embedding_size) and out.dtype == jnp.float32
    assert bool(jnp.all(jnp.isfinite(out)))
    print("KERNEL_OK")
</pallas_src>

<mosaic_0001>
module attributes {stable_mosaic.version = 11 : i64} {
  func.func @mamba_encoder_kernel(%arg0: i32, %arg1: i32, %arg2: memref<1x16x16xf32, #tpu.memory_space<vmem>>, %arg3: memref<16x64xf32, #tpu.memory_space<vmem>>, %arg4: memref<1x2x64xf32, #tpu.memory_space<vmem>>, %arg5: memref<16x64xf32, #tpu.memory_space<vmem>>, %arg6: memref<1x1x64xf32, #tpu.memory_space<vmem>>, %arg7: memref<1x1x64xf32, #tpu.memory_space<vmem>>, %arg8: memref<1x64x256xf32, #tpu.memory_space<vmem>>, %arg9: memref<1x4x128xf32, #tpu.memory_space<vmem>>, %arg10: memref<1x1x128xf32, #tpu.memory_space<vmem>>, %arg11: memref<1x128x256xf32, #tpu.memory_space<vmem>>, %arg12: memref<1x1x128xf32, #tpu.memory_space<vmem>>, %arg13: memref<1x64x128xf32, #tpu.memory_space<vmem>>, %arg14: memref<1x1x128xf32, #tpu.memory_space<vmem>>, %arg15: memref<1x128x64xf32, #tpu.memory_space<vmem>>, %arg16: memref<1x2x64xf32, #tpu.memory_space<vmem>>, %arg17: memref<16x64xf32, #tpu.memory_space<vmem>>, %arg18: memref<16x64x128xf32, #tpu.memory_space<vmem>>, %arg19: memref<16x64x128xf32, #tpu.memory_space<vmem>>, %arg20: memref<16x64xf32, #tpu.memory_space<vmem>>, %arg21: memref<2x64x128xf32, #tpu.memory_space<vmem>>, %arg22: memref<16x128xf32, #tpu.memory_space<vmem>>) attributes {dimension_semantics = [#tpu.dimension_semantics<parallel>, #tpu.dimension_semantics<arbitrary>], iteration_bounds = array<i64: 1, 2>, scalar_prefetch = 0 : i64, scratch_operands = 6 : i64, tpu.core_type = #tpu.core_type<tc>, window_params = [{transform_indices = @transform_0, window_bounds = array<i64: 1, 16, 16>}, {pipeline_mode = #tpu.pipeline_mode<synchronous>, transform_indices = @transform_1, window_bounds = array<i64: 16, 64>}, {transform_indices = @transform_2, window_bounds = array<i64: 1, 2, 64>}, {pipeline_mode = #tpu.pipeline_mode<synchronous>, transform_indices = @transform_3, window_bounds = array<i64: 16, 64>}, {transform_indices = @transform_4, window_bounds = array<i64: 1, 1, 64>}, {transform_indices = @transform_5, window_bounds = array<i64: 1, 1, 64>}, {transform_indices = @transform_6, window_bounds = array<i64: 1, 64, 256>}, {transform_indices = @transform_7, window_bounds = array<i64: 1, 4, 128>}, {transform_indices = @transform_8, window_bounds = array<i64: 1, 1, 128>}, {transform_indices = @transform_9, window_bounds = array<i64: 1, 128, 256>}, {transform_indices = @transform_10, window_bounds = array<i64: 1, 1, 128>}, {transform_indices = @transform_11, window_bounds = array<i64: 1, 64, 128>}, {transform_indices = @transform_12, window_bounds = array<i64: 1, 1, 128>}, {transform_indices = @transform_13, window_bounds = array<i64: 1, 128, 64>}, {transform_indices = @transform_14, window_bounds = array<i64: 1, 2, 64>}]} {
    %c0_i32 = arith.constant 0 : i32
    %0 = arith.cmpi eq, %arg1, %c0_i32 : i32
    %1 = arith.extui %0 : i1 to i32
    %c0_i32_0 = arith.constant 0 : i32
    %2 = arith.cmpi ne, %1, %c0_i32_0 : i32
    scf.if %2 {
      %c0_186 = arith.constant 0 : index
      %c0_187 = arith.constant 0 : index
      %c0_188 = arith.constant 0 : index
      %273 = vector.load %arg2[%c0_186, %c0_187, %c0_188] : memref<1x16x16xf32, #tpu.memory_space<vmem>>, vector<1x16x16xf32>
      %274 = vector.shape_cast %273 : vector<1x16x16xf32> to vector<16x16xf32>
      %c0_189 = arith.constant 0 : index
      %c0_190 = arith.constant 0 : index
      %275 = vector.load %arg5[%c0_189, %c0_190] : memref<16x64xf32, #tpu.memory_space<vmem>>, vector<16x64xf32>
      %cst_191 = arith.constant dense<0.000000e+00> : vector<16x64xf32>
      %276 = tpu.matmul %274, %275, %cst_191 {dimension_numbers = #tpu.dot_dimension_numbers<[1], [0], [0], [1], [0, 0, 1, 1], [], []>} : vector<16x16xf32>, vector<16x64xf32>, vector<16x64xf32> -> vector<16x64xf32>
      %c0_192 = arith.constant 0 : index
      %c0_193 = arith.constant 0 : index
      %c0_194 = arith.constant 0 : index
      %277 = vector.load %arg4[%c0_192, %c0_193, %c0_194] : memref<1x2x64xf32, #tpu.memory_space<vmem>>, vector<1x2x64xf32>
      %278 = vector.shape_cast %277 : vector<1x2x64xf32> to vector<2x64xf32>
      %279 = tpu.concatenate %278, %278, %278, %278, %278, %278, %278, %278 in 0 : vector<2x64xf32>, vector<2x64xf32>, vector<2x64xf32>, vector<2x64xf32>, vector<2x64xf32>, vector<2x64xf32>, vector<2x64xf32>, vector<2x64xf32> -> vector<16x64xf32>
      %c0_195 = arith.constant 0 : index
      %c0_196 = arith.constant 0 : index
      %280 = vector.load %arg3[%c0_195, %c0_196] : memref<16x64xf32, #tpu.memory_space<vmem>>, vector<16x64xf32>
      %281 = arith.addf %276, %280 : vector<16x64xf32>
      %282 = arith.addf %281, %279 : vector<16x64xf32>
      %c0_197 = arith.constant 0 : index
      %c0_198 = arith.constant 0 : index
      %283 = vector.load %arg17[%c0_197, %c0_198] : memref<16x64xf32, #tpu.memory_space<vmem>>, vector<16x64xf32>
      tpu.vector_store %arg17[%c0_197, %c0_198], %282 {strides = array<i32>} : memref<16x64xf32, #tpu.memory_space<vmem>>, vector<16x64xf32>,
    } else {
    }
    %c0 = arith.constant 0 : index
    %c0_1 = arith.constant 0 : index
    %3 = vector.load %arg17[%c0, %c0_1] : memref<16x64xf32, #tpu.memory_space<vmem>>, vector<16x64xf32>
    %cst = arith.constant dense<0.000000e+00> : vector<16xf32>
    %4 = vector.multi_reduction <add>, %3, %cst [1] : vector<16x64xf32> to vector<16xf32>
    %5 = vector.shape_cast %4 : vector<16xf32> to vector<16x1xf32>
    %cst_2 = arith.constant 6.400000e+01 : f32
    %6 = vector.broadcast %cst_2 : f32 to vector<16x1xf32>
    %7 = arith.divf %5, %6 : vector<16x1xf32>
    %8 = vector.broadcast %7 : vector<16x1xf32> to vector<16x64xf32>
    %9 = arith.subf %3, %8 : vector<16x64xf32>
    %10 = arith.mulf %9, %9 : vector<16x64xf32>
    %cst_3 = arith.constant dense<0.000000e+00> : vector<16xf32>
    %11 = vector.multi_reduction <add>, %10, %cst_3 [1] : vector<16x64xf32> to vector<16xf32>
    %12 = vector.shape_cast %11 : vector<16xf32> to vector<16x1xf32>
    %cst_4 = arith.constant 6.400000e+01 : f32
    %13 = vector.broadcast %cst_4 : f32 to vector<16x1xf32>
    %14 = arith.divf %12, %13 : vector<16x1xf32>
    %cst_5 = arith.constant 9.99999997E-7 : f32
    %15 = vector.broadcast %cst_5 : f32 to vector<16x1xf32>
    %16 = arith.addf %14, %15 : vector<16x1xf32>
    %17 = math.rsqrt %16 : vector<16x1xf32>
    %18 = vector.broadcast %17 : vector<16x1xf32> to vector<16x64xf32>
    %19 = arith.mulf %9, %18 : vector<16x64xf32>
    %c0_6 = arith.constant 0 : index
    %c0_7 = arith.constant 0 : index
    %c0_8 = arith.constant 0 : index
    %20 = vector.load %arg6[%c0_6, %c0_7, %c0_8] : memref<1x1x64xf32, #tpu.memory_space<vmem>>, vector<1x1x64xf32>
    %21 = vector.shape_cast %20 : vector<1x1x64xf32> to vector<1x64xf32>
    %22 = vector.broadcast %21 : vector<1x64xf32> to vector<16x64xf32>
    %23 = arith.mulf %19, %22 : vector<16x64xf32>
    %c0_9 = arith.constant 0 : index
    %c0_10 = arith.constant 0 : index
    %c0_11 = arith.constant 0 : index
    %24 = vector.load %arg7[%c0_9, %c0_10, %c0_11] : memref<1x1x64xf32, #tpu.memory_space<vmem>>, vector<1x1x64xf32>
    %25 = vector.shape_cast %24 : vector<1x1x64xf32> to vector<1x64xf32>
    %26 = vector.broadcast %25 : vector<1x64xf32> to vector<16x64xf32>
    %27 = arith.addf %23, %26 : vector<16x64xf32>
    %c0_12 = arith.constant 0 : index
    %c0_13 = arith.constant 0 : index
    %c0_14 = arith.constant 0 : index
    %28 = vector.load %arg8[%c0_12, %c0_13, %c0_14] : memref<1x64x256xf32, #tpu.memory_space<vmem>>, vector<1x64x256xf32>
    %29 = vector.shape_cast %28 : vector<1x64x256xf32> to vector<64x256xf32>
    %cst_15 = arith.constant dense<0.000000e+00> : vector<16x256xf32>
    %30 = tpu.matmul %27, %29, %cst_15 {dimension_numbers = #tpu.dot_dimension_numbers<[1], [0], [0], [1], [0, 0, 1, 1], [], []>} : vector<16x64xf32>, vector<64x256xf32>, vector<16x256xf32> -> vector<16x256xf32>
    %31 = vector.extract_strided_slice %30 {offsets = [0, 0], sizes = [16, 128], strides = [1, 1]} : vector<16x256xf32> to vector<16x128xf32>
    %32 = vector.extract_strided_slice %30 {offsets = [0, 128], sizes = [16, 128], strides = [1, 1]} : vector<16x256xf32> to vector<16x128xf32>
    %c0_16 = arith.constant 0 : index
    %c0_17 = arith.constant 0 : index
    %c0_18 = arith.constant 0 : index
    %33 = vector.load %arg9[%c0_16, %c0_17, %c0_18] : memref<1x4x128xf32, #tpu.memory_space<vmem>>, vector<1x4x128xf32>
    %34 = vector.shape_cast %33 : vector<1x4x128xf32> to vector<4x128xf32>
    %35 = tpu.iota {dimensions = array<i32: 0>} : vector<16x128xi32>
    %36 = vector.extract_strided_slice %34 {offsets = [3, 0], sizes = [1, 128], strides = [1, 1]} : vector<4x128xf32> to vector<1x128xf32>
    %37 = vector.broadcast %36 : vector<1x128xf32> to vector<16x128xf32>
    %38 = arith.mulf %31, %37 : vector<16x128xf32>
    %c6_i32 = arith.constant 6 : i32
    %39 = tpu.dynamic_rotate %31 by %c6_i32 dim 0 : vector<16x128xf32>, i32 -> vector<16x128xf32>
    %c6_i32_19 = arith.constant 6 : i32
    %40 = vector.broadcast %c6_i32_19 : i32 to vector<16x128xi32>
    %41 = arith.cmpi sge, %35, %40 : vector<16x128xi32>
    %cst_20 = arith.constant 0.000000e+00 : f32
    %42 = vector.broadcast %cst_20 : f32 to vector<16x128xf32>
    %43 = arith.select %41, %39, %42 : vector<16x128xi1>, vector<16x128xf32>
    %44 = vector.extract_strided_slice %34 {offsets = [0, 0], sizes = [1, 128], strides = [1, 1]} : vector<4x128xf32> to vector<1x128xf32>
    %45 = vector.broadcast %44 : vector<1x128xf32> to vector<16x128xf32>
    %46 = arith.mulf %43, %45 : vector<16x128xf32>
    %47 = arith.addf %38, %46 : vector<16x128xf32>
    %c4_i32 = arith.constant 4 : i32
    %48 = tpu.dynamic_rotate %31 by %c4_i32 dim 0 : vector<16x128xf32>, i32 -> vector<16x128xf32>
    %c4_i32_21 = arith.constant 4 : i32
    %49 = vector.broadcast %c4_i32_21 : i32 to vector<16x128xi32>
    %50 = arith.cmpi sge, %35, %49 : vector<16x128xi32>
    %cst_22 = arith.constant 0.000000e+00 : f32
    %51 = vector.broadcast %cst_22 : f32 to vector<16x128xf32>
    %52 = arith.select %50, %48, %51 : vector<16x128xi1>, vector<16x128xf32>
    %53 = vector.extract_strided_slice %34 {offsets = [1, 0], sizes = [1, 128], strides = [1, 1]} : vector<4x128xf32> to vector<1x128xf32>
    %54 = vector.broadcast %53 : vector<1x128xf32> to vector<16x128xf32>
    %55 = arith.mulf %52, %54 : vector<16x128xf32>
    %56 = arith.addf %47, %55 : vector<16x128xf32>
    %c2_i32 = arith.constant 2 : i32
    %57 = tpu.dynamic_rotate %31 by %c2_i32 dim 0 : vector<16x128xf32>, i32 -> vector<16x128xf32>
    %c2_i32_23 = arith.constant 2 : i32
    %58 = vector.broadcast %c2_i32_23 : i32 to vector<16x128xi32>
    %59 = arith.cmpi sge, %35, %58 : vector<16x128xi32>
    %cst_24 = arith.constant 0.000000e+00 : f32
    %60 = vector.broadcast %cst_24 : f32 to vector<16x128xf32>
    %61 = arith.select %59, %57, %60 : vector<16x128xi1>, vector<16x128xf32>
    %62 = vector.extract_strided_slice %34 {offsets = [2, 0], sizes = [1, 128], strides = [1, 1]} : vector<4x128xf32> to vector<1x128xf32>
    %63 = vector.broadcast %62 : vector<1x128xf32> to vector<16x128xf32>
    %64 = arith.mulf %61, %63 : vector<16x128xf32>
    %65 = arith.addf %56, %64 : vector<16x128xf32>
    %c0_25 = arith.constant 0 : index
    %c0_26 = arith.constant 0 : index
    %c0_27 = arith.constant 0 : index
    %66 = vector.load %arg10[%c0_25, %c0_26, %c0_27] : memref<1x1x128xf32, #tpu.memory_space<vmem>>, vector<1x1x128xf32>
    %67 = vector.shape_cast %66 : vector<1x1x128xf32> to vector<1x128xf32>
    %68 = vector.broadcast %67 : vector<1x128xf32> to vector<16x128xf32>
    %69 = arith.addf %65, %68 : vector<16x128xf32>
    %cst_28 = arith.constant 0.000000e+00 : f32
    %70 = vector.broadcast %cst_28 : f32 to vector<16x128xf32>
    %71 = arith.subf %70, %69 : vector<16x128xf32>
    %72 = math.exp %71 : vector<16x128xf32>
    %cst_29 = arith.constant 1.000000e+00 : f32
    %73 = vector.broadcast %cst_29 : f32 to vector<16x128xf32>
    %74 = arith.addf %73, %72 : vector<16x128xf32>
    %75 = tpu.reciprocal %74 : vector<16x128xf32> -> vector<16x128xf32>
    %76 = arith.mulf %69, %75 : vector<16x128xf32>
    %c0_30 = arith.constant 0 : index
    %c0_31 = arith.constant 0 : index
    %c0_32 = arith.constant 0 : index
    %77 = vector.load %arg11[%c0_30, %c0_31, %c0_32] : memref<1x128x256xf32, #tpu.memory_space<vmem>>, vector<1x128x256xf32>
    %78 = vector.shape_cast %77 : vector<1x128x256xf32> to vector<128x256xf32>
    %cst_33 = arith.constant dense<0.000000e+00> : vector<16x256xf32>
    %79 = tpu.matmul %76, %78, %cst_33 {dimension_numbers = #tpu.dot_dimension_numbers<[1], [0], [0], [1], [0, 0, 1, 1], [], []>} : vector<16x128xf32>, vector<128x256xf32>, vector<16x256xf32> -> vector<16x256xf32>
    %80 = vector.extract_strided_slice %79 {offsets = [0, 0], sizes = [16, 128], strides = [1, 1]} : vector<16x256xf32> to vector<16x128xf32>
    %c0_34 = arith.constant 0 : index
    %c0_35 = arith.constant 0 : index
    %c0_36 = arith.constant 0 : index
    %81 = vector.load %arg12[%c0_34, %c0_35, %c0_36] : memref<1x1x128xf32, #tpu.memory_space<vmem>>, vector<1x1x128xf32>
    %82 = vector.shape_cast %81 : vector<1x1x128xf32> to vector<1x128xf32>
    %83 = vector.broadcast %82 : vector<1x128xf32> to vector<16x128xf32>
    %84 = arith.addf %80, %83 : vector<16x128xf32>
    %cst_37 = arith.constant 2.000000e+01 : f32
    %85 = vector.broadcast %cst_37 : f32 to vector<16x128xf32>
    %86 = arith.cmpf ogt, %84, %85 : vector<16x128xf32>
    %cst_38 = arith.constant 2.000000e+01 : f32
    %87 = vector.broadcast %cst_38 : f32 to vector<16x128xf32>
    %88 = arith.minimumf %84, %87 : vector<16x128xf32>
    %89 = math.exp %88 : vector<16x128xf32>
    %cst_39 = arith.constant 1.000000e+00 : f32
    %90 = vector.broadcast %cst_39 : f32 to vector<16x128xf32>
    %91 = arith.addf %90, %89 : vector<16x128xf32>
    %92 = math.log %91 : vector<16x128xf32>
    %93 = arith.select %86, %84, %92 : vector<16x128xi1>, vector<16x128xf32>
    %94 = vector.extract_strided_slice %79 {offsets = [0, 128], sizes = [16, 64], strides = [1, 1]} : vector<16x256xf32> to vector<16x64xf32>
    %95 = vector.extract_strided_slice %79 {offsets = [0, 192], sizes = [16, 64], strides = [1, 1]} : vector<16x256xf32> to vector<16x64xf32>
    %c0_40 = arith.constant 0 : index
    %c0_41 = arith.constant 0 : index
    %c0_42 = arith.constant 0 : index
    %96 = vector.load %arg13[%c0_40, %c0_41, %c0_42] : memref<1x64x128xf32, #tpu.memory_space<vmem>>, vector<1x64x128xf32>
    %97 = vector.shape_cast %96 : vector<1x64x128xf32> to vector<64x128xf32>
    %98 = vector.shape_cast %93 : vector<16x128xf32> to vector<16x1x128xf32>
    %99 = vector.shape_cast %97 : vector<64x128xf32> to vector<1x64x128xf32>
    %100 = vector.broadcast %98 : vector<16x1x128xf32> to vector<16x64x128xf32>
    %101 = vector.broadcast %99 : vector<1x64x128xf32> to vector<16x64x128xf32>
    %102 = arith.mulf %100, %101 : vector<16x64x128xf32>
    %103 = math.exp %102 : vector<16x64x128xf32>
    %c0_43 = arith.constant 0 : index
    %c0_44 = arith.constant 0 : index
    %c0_45 = arith.constant 0 : index
    %104 = vector.load %arg18[%c0_43, %c0_44, %c0_45] : memref<16x64x128xf32, #tpu.memory_space<vmem>>, vector<16x64x128xf32>
    tpu.vector_store %arg18[%c0_43, %c0_44, %c0_45], %103 {strides = array<i32>} : memref<16x64x128xf32, #tpu.memory_space<vmem>>, vector<16x64x128xf32>,
    %105 = vector.shape_cast %94 : vector<16x64xf32> to vector<16x64x1xf32>
    %106 = arith.mulf %93, %76 : vector<16x128xf32>
    %107 = vector.shape_cast %106 : vector<16x128xf32> to vector<16x1x128xf32>
    %108 = vector.broadcast %105 : vector<16x64x1xf32> to vector<16x64x128xf32>
    %109 = vector.broadcast %107 : vector<16x1x128xf32> to vector<16x64x128xf32>
    %110 = arith.mulf %108, %109 : vector<16x64x128xf32>
    %c0_46 = arith.constant 0 : index
    %c0_47 = arith.constant 0 : index
    %c0_48 = arith.constant 0 : index
    %111 = vector.load %arg19[%c0_46, %c0_47, %c0_48] : memref<16x64x128xf32, #tpu.memory_space<vmem>>, vector<16x64x128xf32>
    tpu.vector_store %arg19[%c0_46, %c0_47, %c0_48], %110 {strides = array<i32>} : memref<16x64x128xf32, #tpu.memory_space<vmem>>, vector<16x64x128xf32>,
    %c0_49 = arith.constant 0 : index
    %c0_50 = arith.constant 0 : index
    %112 = vector.load %arg20[%c0_49, %c0_50] : memref<16x64xf32, #tpu.memory_space<vmem>>, vector<16x64xf32>
    tpu.vector_store %arg20[%c0_49, %c0_50], %95 {strides = array<i32>} : memref<16x64xf32, #tpu.memory_space<vmem>>, vector<16x64xf32>,
    %cst_51 = arith.constant 0.000000e+00 : f32
    %113 = vector.broadcast %cst_51 : f32 to vector<2x64x128xf32>
    %c0_52 = arith.constant 0 : index
    %c0_53 = arith.constant 0 : index
    %c0_54 = arith.constant 0 : index
    %114 = vector.load %arg21[%c0_52, %c0_53, %c0_54] : memref<2x64x128xf32, #tpu.memory_space<vmem>>, vector<2x64x128xf32>
    tpu.vector_store %arg21[%c0_52, %c0_53, %c0_54], %113 {strides = array<i32>} : memref<2x64x128xf32, #tpu.memory_space<vmem>>, vector<2x64x128xf32>,
    %c0_i32_55 = arith.constant 0 : i32
    %c2_i32_56 = arith.constant 2 : i32
    %115 = arith.muli %c0_i32_55, %c2_i32_56 : i32
    %116 = arith.index_cast %115 : i32 to index
    %c0_57 = arith.constant 0 : index
    %c0_58 = arith.constant 0 : index
    %117 = vector.load %arg18[%116, %c0_57, %c0_58] : memref<16x64x128xf32, #tpu.memory_space<vmem>>, vector<2x64x128xf32>
    %c0_59 = arith.constant 0 : index
    %c0_60 = arith.constant 0 : index
    %c0_61 = arith.constant 0 : index
    %118 = vector.load %arg21[%c0_59, %c0_60, %c0_61] : memref<2x64x128xf32, #tpu.memory_space<vmem>>, vector<2x64x128xf32>
    %119 = arith.mulf %117, %118 : vector<2x64x128xf32>
    %120 = arith.index_cast %115 : i32 to index
    %c0_62 = arith.constant 0 : index
    %c0_63 = arith.constant 0 : index
    %121 = vector.load %arg19[%120, %c0_62, %c0_63] : memref<16x64x128xf32, #tpu.memory_space<vmem>>, vector<2x64x128xf32>
    %122 = arith.addf %119, %121 : vector<2x64x128xf32>
    %c0_64 = arith.constant 0 : index
    %c0_65 = arith.constant 0 : index
    %c0_66 = arith.constant 0 : index
    %123 = vector.load %arg21[%c0_64, %c0_65, %c0_66] : memref<2x64x128xf32, #tpu.memory_space<vmem>>, vector<2x64x128xf32>
    tpu.vector_store %arg21[%c0_64, %c0_65, %c0_66], %122 {strides = array<i32>} : memref<2x64x128xf32, #tpu.memory_space<vmem>>, vector<2x64x128xf32>,
    %124 = arith.index_cast %115 : i32 to index
    %c0_67 = arith.constant 0 : index
    %125 = vector.load %arg20[%124, %c0_67] : memref<16x64xf32, #tpu.memory_space<vmem>>, vector<2x64xf32>
    %126 = vector.shape_cast %125 : vector<2x64xf32> to vector<2x64x1xf32>
    %127 = vector.broadcast %126 : vector<2x64x1xf32> to vector<2x64x128xf32>
    %128 = arith.mulf %122, %127 : vector<2x64x128xf32>
    %cst_68 = arith.constant dense<0.000000e+00> : vector<2x128xf32>
    %129 = vector.multi_reduction <add>, %128, %cst_68 [1] : vector<2x64x128xf32> to vector<2x128xf32>
    %130 = arith.index_cast %115 : i32 to index
    %c0_69 = arith.constant 0 : index
    %131 = vector.load %arg22[%130, %c0_69] : memref<16x128xf32, #tpu.memory_space<vmem>>, vector<2x128xf32>
    tpu.vector_store %arg22[%130, %c0_69], %129 {strides = array<i32>} : memref<16x128xf32, #tpu.memory_space<vmem>>, vector<2x128xf32>,
    %c1_i32 = arith.constant 1 : i32
    %c2_i32_70 = arith.constant 2 : i32
    %132 = arith.muli %c1_i32, %c2_i32_70 : i32
    %133 = arith.index_cast %132 : i32 to index
    %c0_71 = arith.constant 0 : index
    %c0_72 = arith.constant 0 : index
    %134 = vector.load %arg18[%133, %c0_71, %c0_72] : memref<16x64x128xf32, #tpu.memory_space<vmem>>, vector<2x64x128xf32>
    %c0_73 = arith.constant 0 : index
    %c0_74 = arith.constant 0 : index
    %c0_75 = arith.constant 0 : index
    %135 = vector.load %arg21[%c0_73, %c0_74, %c0_75] : memref<2x64x128xf32, #tpu.memory_space<vmem>>, vector<2x64x128xf32>
    %136 = arith.mulf %134, %135 : vector<2x64x128xf32>
    %137 = arith.index_cast %132 : i32 to index
    %c0_76 = arith.constant 0 : index
    %c0_77 = arith.constant 0 : index
    %138 = vector.load %arg19[%137, %c0_76, %c0_77] : memref<16x64x128xf32, #tpu.memory_space<vmem>>, vector<2x64x128xf32>
    %139 = arith.addf %136, %138 : vector<2x64x128xf32>
    %c0_78 = arith.constant 0 : index
    %c0_79 = arith.constant 0 : index
    %c0_80 = arith.constant 0 : index
    %140 = vector.load %arg21[%c0_78, %c0_79, %c0_80] : memref<2x64x128xf32, #tpu.memory_space<vmem>>, vector<2x64x128xf32>
    tpu.vector_store %arg21[%c0_78, %c0_79, %c0_80], %139 {strides = array<i32>} : memref<2x64x128xf32, #tpu.memory_space<vmem>>, vector<2x64x128xf32>,
    %141 = arith.index_cast %132 : i32 to index
    %c0_81 = arith.constant 0 : index
    %142 = vector.load %arg20[%141, %c0_81] : memref<16x64xf32, #tpu.memory_space<vmem>>, vector<2x64xf32>
    %143 = vector.shape_cast %142 : vector<2x64xf32> to vector<2x64x1xf32>
    %144 = vector.broadcast %143 : vector<2x64x1xf32> to vector<2x64x128xf32>
    %145 = arith.mulf %139, %144 : vector<2x64x128xf32>
    %cst_82 = arith.constant dense<0.000000e+00> : vector<2x128xf32>
    %146 = vector.multi_reduction <add>, %145, %cst_82 [1] : vector<2x64x128xf32> to vector<2x128xf32>
    %147 = arith.index_cast %132 : i32 to index
    %c0_83 = arith.constant 0 : index
    %148 = vector.load %arg22[%147, %c0_83] : memref<16x128xf32, #tpu.memory_space<vmem>>, vector<2x128xf32>
    tpu.vector_store %arg22[%147, %c0_83], %146 {strides = array<i32>} : memref<16x128xf32, #tpu.memory_space<vmem>>, vector<2x128xf32>,
    %c2_i32_84 = arith.constant 2 : i32
    %c2_i32_85 = arith.constant 2 : i32
    %149 = arith.muli %c2_i32_84, %c2_i32_85 : i32
    %150 = arith.index_cast %149 : i32 to index
    %c0_86 = arith.constant 0 : index
    %c0_87 = arith.constant 0 : index
    %151 = vector.load %arg18[%150, %c0_86, %c0_87] : memref<16x64x128xf32, #tpu.memory_space<vmem>>, vector<2x64x128xf32>
    %c0_88 = arith.constant 0 : index
    %c0_89 = arith.constant 0 : index
    %c0_90 = arith.constant 0 : index
    %152 = vector.load %arg21[%c0_88, %c0_89, %c0_90] : memref<2x64x128xf32, #tpu.memory_space<vmem>>, vector<2x64x128xf32>
    %153 = arith.mulf %151, %152 : vector<2x64x128xf32>
    %154 = arith.index_cast %149 : i32 to index
    %c0_91 = arith.constant 0 : index
    %c0_92 = arith.constant 0 : index
    %155 = vector.load %arg19[%154, %c0_91, %c0_92] : memref<16x64x128xf32, #tpu.memory_space<vmem>>, vector<2x64x128xf32>
    %156 = arith.addf %153, %155 : vector<2x64x128xf32>
    %c0_93 = arith.constant 0 : index
    %c0_94 = arith.constant 0 : index
    %c0_95 = arith.constant 0 : index
    %157 = vector.load %arg21[%c0_93, %c0_94, %c0_95] : memref<2x64x128xf32, #tpu.memory_space<vmem>>, vector<2x64x128xf32>
    tpu.vector_store %arg21[%c0_93, %c0_94, %c0_95], %156 {strides = array<i32>} : memref<2x64x128xf32, #tpu.memory_space<vmem>>, vector<2x64x128xf32>,
    %158 = arith.index_cast %149 : i32 to index
    %c0_96 = arith.constant 0 : index
    %159 = vector.load %arg20[%158, %c0_96] : memref<16x64xf32, #tpu.memory_space<vmem>>, vector<2x64xf32>
    %160 = vector.shape_cast %159 : vector<2x64xf32> to vector<2x64x1xf32>
    %161 = vector.broadcast %160 : vector<2x64x1xf32> to vector<2x64x128xf32>
    %162 = arith.mulf %156, %161 : vector<2x64x128xf32>
    %cst_97 = arith.constant dense<0.000000e+00> : vector<2x128xf32>
    %163 = vector.multi_reduction <add>, %162, %cst_97 [1] : vector<2x64x128xf32> to vector<2x128xf32>
    %164 = arith.index_cast %149 : i32 to index
    %c0_98 = arith.constant 0 : index
    %165 = vector.load %arg22[%164, %c0_98] : memref<16x128xf32, #tpu.memory_space<vmem>>, vector<2x128xf32>
    tpu.vector_store %arg22[%164, %c0_98], %163 {strides = array<i32>} : memref<16x128xf32, #tpu.memory_space<vmem>>, vector<2x128xf32>,
    %c3_i32 = arith.constant 3 : i32
    %c2_i32_99 = arith.constant 2 : i32
    %166 = arith.muli %c3_i32, %c2_i32_99 : i32
    %167 = arith.index_cast %166 : i32 to index
    %c0_100 = arith.constant 0 : index
    %c0_101 = arith.constant 0 : index
    %168 = vector.load %arg18[%167, %c0_100, %c0_101] : memref<16x64x128xf32, #tpu.memory_space<vmem>>, vector<2x64x128xf32>
    %c0_102 = arith.constant 0 : index
    %c0_103 = arith.constant 0 : index
    %c0_104 = arith.constant 0 : index
    %169 = vector.load %arg21[%c0_102, %c0_103, %c0_104] : memref<2x64x128xf32, #tpu.memory_space<vmem>>, vector<2x64x128xf32>
    %170 = arith.mulf %168, %169 : vector<2x64x128xf32>
    %171 = arith.index_cast %166 : i32 to index
    %c0_105 = arith.constant 0 : index
    %c0_106 = arith.constant 0 : index
    %172 = vector.load %arg19[%171, %c0_105, %c0_106] : memref<16x64x128xf32, #tpu.memory_space<vmem>>, vector<2x64x128xf32>
    %173 = arith.addf %170, %172 : vector<2x64x128xf32>
    %c0_107 = arith.constant 0 : index
    %c0_108 = arith.constant 0 : index
    %c0_109 = arith.constant 0 : index
    %174 = vector.load %arg21[%c0_107, %c0_108, %c0_109] : memref<2x64x128xf32, #tpu.memory_space<vmem>>, vector<2x64x128xf32>
    tpu.vector_store %arg21[%c0_107, %c0_108, %c0_109], %173 {strides = array<i32>} : memref<2x64x128xf32, #tpu.memory_space<vmem>>, vector<2x64x128xf32>,
    %175 = arith.index_cast %166 : i32 to index
    %c0_110 = arith.constant 0 : index
    %176 = vector.load %arg20[%175, %c0_110] : memref<16x64xf32, #tpu.memory_space<vmem>>, vector<2x64xf32>
    %177 = vector.shape_cast %176 : vector<2x64xf32> to vector<2x64x1xf32>
    %178 = vector.broadcast %177 : vector<2x64x1xf32> to vector<2x64x128xf32>
    %179 = arith.mulf %173, %178 : vector<2x64x128xf32>
    %cst_111 = arith.constant dense<0.000000e+00> : vector<2x128xf32>
    %180 = vector.multi_reduction <add>, %179, %cst_111 [1] : vector<2x64x128xf32> to vector<2x128xf32>
    %181 = arith.index_cast %166 : i32 to index
    %c0_112 = arith.constant 0 : index
    %182 = vector.load %arg22[%181, %c0_112] : memref<16x128xf32, #tpu.memory_space<vmem>>, vector<2x128xf32>
    tpu.vector_store %arg22[%181, %c0_112], %180 {strides = array<i32>} : memref<16x128xf32, #tpu.memory_space<vmem>>, vector<2x128xf32>,
    %c4_i32_113 = arith.constant 4 : i32
    %c2_i32_114 = arith.constant 2 : i32
    %183 = arith.muli %c4_i32_113, %c2_i32_114 : i32
    %184 = arith.index_cast %183 : i32 to index
    %c0_115 = arith.constant 0 : index
    %c0_116 = arith.constant 0 : index
    %185 = vector.load %arg18[%184, %c0_115, %c0_116] : memref<16x64x128xf32, #tpu.memory_space<vmem>>, vector<2x64x128xf32>
    %c0_117 = arith.constant 0 : index
    %c0_118 = arith.constant 0 : index
    %c0_119 = arith.constant 0 : index
    %186 = vector.load %arg21[%c0_117, %c0_118, %c0_119] : memref<2x64x128xf32, #tpu.memory_space<vmem>>, vector<2x64x128xf32>
    %187 = arith.mulf %185, %186 : vector<2x64x128xf32>
    %188 = arith.index_cast %183 : i32 to index
    %c0_120 = arith.constant 0 : index
    %c0_121 = arith.constant 0 : index
    %189 = vector.load %arg19[%188, %c0_120, %c0_121] : memref<16x64x128xf32, #tpu.memory_space<vmem>>, vector<2x64x128xf32>
    %190 = arith.addf %187, %189 : vector<2x64x128xf32>
    %c0_122 = arith.constant 0 : index
    %c0_123 = arith.constant 0 : index
    %c0_124 = arith.constant 0 : index
    %191 = vector.load %arg21[%c0_122, %c0_123, %c0_124] : memref<2x64x128xf32, #tpu.memory_space<vmem>>, vector<2x64x128xf32>
    tpu.vector_store %arg21[%c0_122, %c0_123, %c0_124], %190 {strides = array<i32>} : memref<2x64x128xf32, #tpu.memory_space<vmem>>, vector<2x64x128xf32>,
    %192 = arith.index_cast %183 : i32 to index
    %c0_125 = arith.constant 0 : index
    %193 = vector.load %arg20[%192, %c0_125] : memref<16x64xf32, #tpu.memory_space<vmem>>, vector<2x64xf32>
    %194 = vector.shape_cast %193 : vector<2x64xf32> to vector<2x64x1xf32>
    %195 = vector.broadcast %194 : vector<2x64x1xf32> to vector<2x64x128xf32>
    %196 = arith.mulf %190, %195 : vector<2x64x128xf32>
    %cst_126 = arith.constant dense<0.000000e+00> : vector<2x128xf32>
    %197 = vector.multi_reduction <add>, %196, %cst_126 [1] : vector<2x64x128xf32> to vector<2x128xf32>
    %198 = arith.index_cast %183 : i32 to index
    %c0_127 = arith.constant 0 : index
    %199 = vector.load %arg22[%198, %c0_127] : memref<16x128xf32, #tpu.memory_space<vmem>>, vector<2x128xf32>
    tpu.vector_store %arg22[%198, %c0_127], %197 {strides = array<i32>} : memref<16x128xf32, #tpu.memory_space<vmem>>, vector<2x128xf32>,
    %c5_i32 = arith.constant 5 : i32
    %c2_i32_128 = arith.constant 2 : i32
    %200 = arith.muli %c5_i32, %c2_i32_128 : i32
    %201 = arith.index_cast %200 : i32 to index
    %c0_129 = arith.constant 0 : index
    %c0_130 = arith.constant 0 : index
    %202 = vector.load %arg18[%201, %c0_129, %c0_130] : memref<16x64x128xf32, #tpu.memory_space<vmem>>, vector<2x64x128xf32>
    %c0_131 = arith.constant 0 : index
    %c0_132 = arith.constant 0 : index
    %c0_133 = arith.constant 0 : index
    %203 = vector.load %arg21[%c0_131, %c0_132, %c0_133] : memref<2x64x128xf32, #tpu.memory_space<vmem>>, vector<2x64x128xf32>
    %204 = arith.mulf %202, %203 : vector<2x64x128xf32>
    %205 = arith.index_cast %200 : i32 to index
    %c0_134 = arith.constant 0 : index
    %c0_135 = arith.constant 0 : index
    %206 = vector.load %arg19[%205, %c0_134, %c0_135] : memref<16x64x128xf32, #tpu.memory_space<vmem>>, vector<2x64x128xf32>
    %207 = arith.addf %204, %206 : vector<2x64x128xf32>
    %c0_136 = arith.constant 0 : index
    %c0_137 = arith.constant 0 : index
    %c0_138 = arith.constant 0 : index
    %208 = vector.load %arg21[%c0_136, %c0_137, %c0_138] : memref<2x64x128xf32, #tpu.memory_space<vmem>>, vector<2x64x128xf32>
    tpu.vector_store %arg21[%c0_136, %c0_137, %c0_138], %207 {strides = array<i32>} : memref<2x64x128xf32, #tpu.memory_space<vmem>>, vector<2x64x128xf32>,
    %209 = arith.index_cast %200 : i32 to index
    %c0_139 = arith.constant 0 : index
    %210 = vector.load %arg20[%209, %c0_139] : memref<16x64xf32, #tpu.memory_space<vmem>>, vector<2x64xf32>
    %211 = vector.shape_cast %210 : vector<2x64xf32> to vector<2x64x1xf32>
    %212 = vector.broadcast %211 : vector<2x64x1xf32> to vector<2x64x128xf32>
    %213 = arith.mulf %207, %212 : vector<2x64x128xf32>
    %cst_140 = arith.constant dense<0.000000e+00> : vector<2x128xf32>
    %214 = vector.multi_reduction <add>, %213, %cst_140 [1] : vector<2x64x128xf32> to vector<2x128xf32>
    %215 = arith.index_cast %200 : i32 to index
    %c0_141 = arith.constant 0 : index
    %216 = vector.load %arg22[%215, %c0_141] : memref<16x128xf32, #tpu.memory_space<vmem>>, vector<2x128xf32>
    tpu.vector_store %arg22[%215, %c0_141], %214 {strides = array<i32>} : memref<16x128xf32, #tpu.memory_space<vmem>>, vector<2x128xf32>,
    %c6_i32_142 = arith.constant 6 : i32
    %c2_i32_143 = arith.constant 2 : i32
    %217 = arith.muli %c6_i32_142, %c2_i32_143 : i32
    %218 = arith.index_cast %217 : i32 to index
    %c0_144 = arith.constant 0 : index
    %c0_145 = arith.constant 0 : index
    %219 = vector.load %arg18[%218, %c0_144, %c0_145] : memref<16x64x128xf32, #tpu.memory_space<vmem>>, vector<2x64x128xf32>
    %c0_146 = arith.constant 0 : index
    %c0_147 = arith.constant 0 : index
    %c0_148 = arith.constant 0 : index
    %220 = vector.load %arg21[%c0_146, %c0_147, %c0_148] : memref<2x64x128xf32, #tpu.memory_space<vmem>>, vector<2x64x128xf32>
    %221 = arith.mulf %219, %220 : vector<2x64x128xf32>
    %222 = arith.index_cast %217 : i32 to index
    %c0_149 = arith.constant 0 : index
    %c0_150 = arith.constant 0 : index
    %223 = vector.load %arg19[%222, %c0_149, %c0_150] : memref<16x64x128xf32, #tpu.memory_space<vmem>>, vector<2x64x128xf32>
    %224 = arith.addf %221, %223 : vector<2x64x128xf32>
    %c0_151 = arith.constant 0 : index
    %c0_152 = arith.constant 0 : index
    %c0_153 = arith.constant 0 : index
    %225 = vector.load %arg21[%c0_151, %c0_152, %c0_153] : memref<2x64x128xf32, #tpu.memory_space<vmem>>, vector<2x64x128xf32>
    tpu.vector_store %arg21[%c0_151, %c0_152, %c0_153], %224 {strides = array<i32>} : memref<2x64x128xf32, #tpu.memory_space<vmem>>, vector<2x64x128xf32>,
    %226 = arith.index_cast %217 : i32 to index
    %c0_154 = arith.constant 0 : index
    %227 = vector.load %arg20[%226, %c0_154] : memref<16x64xf32, #tpu.memory_space<vmem>>, vector<2x64xf32>
    %228 = vector.shape_cast %227 : vector<2x64xf32> to vector<2x64x1xf32>
    %229 = vector.broadcast %228 : vector<2x64x1xf32> to vector<2x64x128xf32>
    %230 = arith.mulf %224, %229 : vector<2x64x128xf32>
    %cst_155 = arith.constant dense<0.000000e+00> : vector<2x128xf32>
    %231 = vector.multi_reduction <add>, %230, %cst_155 [1] : vector<2x64x128xf32> to vector<2x128xf32>
    %232 = arith.index_cast %217 : i32 to index
    %c0_156 = arith.constant 0 : index
    %233 = vector.load %arg22[%232, %c0_156] : memref<16x128xf32, #tpu.memory_space<vmem>>, vector<2x128xf32>
    tpu.vector_store %arg22[%232, %c0_156], %231 {strides = array<i32>} : memref<16x128xf32, #tpu.memory_space<vmem>>, vector<2x128xf32>,
    %c7_i32 = arith.constant 7 : i32
    %c2_i32_157 = arith.constant 2 : i32
    %234 = arith.muli %c7_i32, %c2_i32_157 : i32
    %235 = arith.index_cast %234 : i32 to index
    %c0_158 = arith.constant 0 : index
    %c0_159 = arith.constant 0 : index
    %236 = vector.load %arg18[%235, %c0_158, %c0_159] : memref<16x64x128xf32, #tpu.memory_space<vmem>>, vector<2x64x128xf32>
    %c0_160 = arith.constant 0 : index
    %c0_161 = arith.constant 0 : index
    %c0_162 = arith.constant 0 : index
    %237 = vector.load %arg21[%c0_160, %c0_161, %c0_162] : memref<2x64x128xf32, #tpu.memory_space<vmem>>, vector<2x64x128xf32>
    %238 = arith.mulf %236, %237 : vector<2x64x128xf32>
    %239 = arith.index_cast %234 : i32 to index
    %c0_163 = arith.constant 0 : index
    %c0_164 = arith.constant 0 : index
    %240 = vector.load %arg19[%239, %c0_163, %c0_164] : memref<16x64x128xf32, #tpu.memory_space<vmem>>, vector<2x64x128xf32>
    %241 = arith.addf %238, %240 : vector<2x64x128xf32>
    %c0_165 = arith.constant 0 : index
    %c0_166 = arith.constant 0 : index
    %c0_167 = arith.constant 0 : index
    %242 = vector.load %arg21[%c0_165, %c0_166, %c0_167] : memref<2x64x128xf32, #tpu.memory_space<vmem>>, vector<2x64x128xf32>
    tpu.vector_store %arg21[%c0_165, %c0_166, %c0_167], %241 {strides = array<i32>} : memref<2x64x128xf32, #tpu.memory_space<vmem>>, vector<2x64x128xf32>,
    %243 = arith.index_cast %234 : i32 to index
    %c0_168 = arith.constant 0 : index
    %244 = vector.load %arg20[%243, %c0_168] : memref<16x64xf32, #tpu.memory_space<vmem>>, vector<2x64xf32>
    %245 = vector.shape_cast %244 : vector<2x64xf32> to vector<2x64x1xf32>
    %246 = vector.broadcast %245 : vector<2x64x1xf32> to vector<2x64x128xf32>
    %247 = arith.mulf %241, %246 : vector<2x64x128xf32>
    %cst_169 = arith.constant dense<0.000000e+00> : vector<2x128xf32>
    %248 = vector.multi_reduction <add>, %247, %cst_169 [1] : vector<2x64x128xf32> to vector<2x128xf32>
    %249 = arith.index_cast %234 : i32 to index
    %c0_170 = arith.constant 0 : index
    %250 = vector.load %arg22[%249, %c0_170] : memref<16x128xf32, #tpu.memory_space<vmem>>, vector<2x128xf32>
    tpu.vector_store %arg22[%249, %c0_170], %248 {strides = array<i32>} : memref<16x128xf32, #tpu.memory_space<vmem>>, vector<2x128xf32>,
    %c8_i32 = arith.constant 8 : i32
    %c0_171 = arith.constant 0 : index
    %c0_172 = arith.constant 0 : index
    %251 = vector.load %arg22[%c0_171, %c0_172] : memref<16x128xf32, #tpu.memory_space<vmem>>, vector<16x128xf32>
    %c0_173 = arith.constant 0 : index
    %c0_174 = arith.constant 0 : index
    %c0_175 = arith.constant 0 : index
    %252 = vector.load %arg14[%c0_173, %c0_174, %c0_175] : memref<1x1x128xf32, #tpu.memory_space<vmem>>, vector<1x1x128xf32>
    %253 = vector.shape_cast %252 : vector<1x1x128xf32> to vector<1x128xf32>
    %254 = vector.broadcast %253 : vector<1x128xf32> to vector<16x128xf32>
    %255 = arith.mulf %76, %254 : vector<16x128xf32>
    %256 = arith.addf %251, %255 : vector<16x128xf32>
    %cst_176 = arith.constant 0.000000e+00 : f32
    %257 = vector.broadcast %cst_176 : f32 to vector<16x128xf32>
    %258 = arith.subf %257, %32 : vector<16x128xf32>
    %259 = math.exp %258 : vector<16x128xf32>
    %cst_177 = arith.constant 1.000000e+00 : f32
    %260 = vector.broadcast %cst_177 : f32 to vector<16x128xf32>
    %261 = arith.addf %260, %259 : vector<16x128xf32>
    %262 = tpu.reciprocal %261 : vector<16x128xf32> -> vector<16x128xf32>
    %263 = arith.mulf %32, %262 : vector<16x128xf32>
    %264 = arith.mulf %256, %263 : vector<16x128xf32>
    %c0_178 = arith.constant 0 : index
    %c0_179 = arith.constant 0 : index
    %c0_180 = arith.constant 0 : index
    %265 = vector.load %arg15[%c0_178, %c0_179, %c0_180] : memref<1x128x64xf32, #tpu.memory_space<vmem>>, vector<1x128x64xf32>
    %266 = vector.shape_cast %265 : vector<1x128x64xf32> to vector<128x64xf32>
    %cst_181 = arith.constant dense<0.000000e+00> : vector<16x64xf32>
    %267 = tpu.matmul %264, %266, %cst_181 {dimension_numbers = #tpu.dot_dimension_numbers<[1], [0], [0], [1], [0, 0, 1, 1], [], []>} : vector<16x128xf32>, vector<128x64xf32>, vector<16x64xf32> -> vector<16x64xf32>
    %268 = arith.addf %3, %267 : vector<16x64xf32>
    %c0_182 = arith.constant 0 : index
    %c0_183 = arith.constant 0 : index
    %269 = vector.load %arg17[%c0_182, %c0_183] : memref<16x64xf32, #tpu.memory_space<vmem>>, vector<16x64xf32>
    tpu.vector_store %arg17[%c0_182, %c0_183], %268 {strides = array<i32>} : memref<16x64xf32, #tpu.memory_space<vmem>>, vector<16x64xf32>,
    %c1_i32_184 = arith.constant 1 : i32
    %270 = arith.cmpi eq, %arg1, %c1_i32_184 : i32
    %271 = arith.extui %270 : i1 to i32
    %c0_i32_185 = arith.constant 0 : i32
    %272 = arith.cmpi ne, %271, %c0_i32_185 : i32
    scf.if %272 {
      %273 = vector.extract_strided_slice %268 {offsets = [14, 0], sizes = [2, 64], strides = [1, 1]} : vector<16x64xf32> to vector<2x64xf32>
      %c0_186 = arith.constant 0 : index
      %c0_187 = arith.constant 0 : index
      %c0_188 = arith.constant 0 : index
      %274 = vector.load %arg16[%c0_186, %c0_187, %c0_188] : memref<1x2x64xf32, #tpu.memory_space<vmem>>, vector<1x2x64xf32>
      %275 = vector.shape_cast %274 : vector<1x2x64xf32> to vector<2x64xf32>
      %276 = vector.shape_cast %273 : vector<2x64xf32> to vector<1x2x64xf32>
      tpu.vector_store %arg16[%c0_186, %c0_187, %c0_188], %276 {strides = array<i32>} : memref<1x2x64xf32, #tpu.memory_space<vmem>>, vector<1x2x64xf32>,
    } else {
    }
    return
  }
  func.func @transform_0(%arg0: i32, %arg1: i32) -> (i32, i32, i32) {
    %c0_i32 = arith.constant 0 : i32
    %c0_i32_0 = arith.constant 0 : i32
    %c0_i32_1 = arith.constant 0 : i32
    return %arg0, %c0_i32, %c0_i32_0 : i32, i32, i32
  }
  func.func @transform_1(%arg0: i32, %arg1: i32) -> (i32, i32) {
    %c0_i32 = arith.constant 0 : i32
    %c0_i32_0 = arith.constant 0 : i32
    %c0_i32_1 = arith.constant 0 : i32
    return %c0_i32, %c0_i32_0 : i32, i32
  }
  func.func @transform_2(%arg0: i32, %arg1: i32) -> (i32, i32, i32) {
    %c0_i32 = arith.constant 0 : i32
    %c0_i32_0 = arith.constant 0 : i32
    %c0_i32_1 = arith.constant 0 : i32
    return %arg0, %c0_i32, %c0_i32_0 : i32, i32, i32
  }
  func.func @transform_3(%arg0: i32, %arg1: i32) -> (i32, i32) {
    %c0_i32 = arith.constant 0 : i32
    %c0_i32_0 = arith.constant 0 : i32
    %c0_i32_1 = arith.constant 0 : i32
    return %c0_i32, %c0_i32_0 : i32, i32
  }
  func.func @transform_4(%arg0: i32, %arg1: i32) -> (i32, i32, i32) {
    %c0_i32 = arith.constant 0 : i32
    %c0_i32_0 = arith.constant 0 : i32
    %c0_i32_1 = arith.constant 0 : i32
    return %arg1, %c0_i32, %c0_i32_0 : i32, i32, i32
  }
  func.func @transform_5(%arg0: i32, %arg1: i32) -> (i32, i32, i32) {
    %c0_i32 = arith.constant 0 : i32
    %c0_i32_0 = arith.constant 0 : i32
    %c0_i32_1 = arith.constant 0 : i32
    return %arg1, %c0_i32, %c0_i32_0 : i32, i32, i32
  }
  func.func @transform_6(%arg0: i32, %arg1: i32) -> (i32, i32, i32) {
    %c0_i32 = arith.constant 0 : i32
    %c0_i32_0 = arith.constant 0 : i32
    %c0_i32_1 = arith.constant 0 : i32
    return %arg1, %c0_i32, %c0_i32_0 : i32, i32, i32
  }
  func.func @transform_7(%arg0: i32, %arg1: i32) -> (i32, i32, i32) {
    %c0_i32 = arith.constant 0 : i32
    %c0_i32_0 = arith.constant 0 : i32
    %c0_i32_1 = arith.constant 0 : i32
    return %arg1, %c0_i32, %c0_i32_0 : i32, i32, i32
  }
  func.func @transform_8(%arg0: i32, %arg1: i32) -> (i32, i32, i32) {
    %c0_i32 = arith.constant 0 : i32
    %c0_i32_0 = arith.constant 0 : i32
    %c0_i32_1 = arith.constant 0 : i32
    return %arg1, %c0_i32, %c0_i32_0 : i32, i32, i32
  }
  func.func @transform_9(%arg0: i32, %arg1: i32) -> (i32, i32, i32) {
    %c0_i32 = arith.constant 0 : i32
    %c0_i32_0 = arith.constant 0 : i32
    %c0_i32_1 = arith.constant 0 : i32
    return %arg1, %c0_i32, %c0_i32_0 : i32, i32, i32
  }
  func.func @transform_10(%arg0: i32, %arg1: i32) -> (i32, i32, i32) {
    %c0_i32 = arith.constant 0 : i32
    %c0_i32_0 = arith.constant 0 : i32
    %c0_i32_1 = arith.constant 0 : i32
    return %arg1, %c0_i32, %c0_i32_0 : i32, i32, i32
  }
  func.func @transform_11(%arg0: i32, %arg1: i32) -> (i32, i32, i32) {
    %c0_i32 = arith.constant 0 : i32
    %c0_i32_0 = arith.constant 0 : i32
    %c0_i32_1 = arith.constant 0 : i32
    return %arg1, %c0_i32, %c0_i32_0 : i32, i32, i32
  }
  func.func @transform_12(%arg0: i32, %arg1: i32) -> (i32, i32, i32) {
    %c0_i32 = arith.constant 0 : i32
    %c0_i32_0 = arith.constant 0 : i32
    %c0_i32_1 = arith.constant 0 : i32
    return %arg1, %c0_i32, %c0_i32_0 : i32, i32, i32
  }
  func.func @transform_13(%arg0: i32, %arg1: i32) -> (i32, i32, i32) {
    %c0_i32 = arith.constant 0 : i32
    %c0_i32_0 = arith.constant 0 : i32
    %c0_i32_1 = arith.constant 0 : i32
    return %arg1, %c0_i32, %c0_i32_0 : i32, i32, i32
  }
  func.func @transform_14(%arg0: i32, %arg1: i32) -> (i32, i32, i32) {
    %c0_i32 = arith.constant 0 : i32
    %c0_i32_0 = arith.constant 0 : i32
    %c0_i32_1 = arith.constant 0 : i32
    return %arg0, %c0_i32, %c0_i32_0 : i32, i32, i32
  }
}

</mosaic_0001>

<bundles_post_ra>
// kernel: tpu_custom_call.1
= control target key start
LH: loop header
LB: loop body
LE: loop exit
PB: predicated region body
PF: predicated region fallthrough
CT: control target
= control target key end

     0   :  { %s8785_s0 = inlined_call_operand.hbm [shape: f32[1,16,16], index: 0, kind: input, shape index: {}]   ;;  %s8786_s1 = inlined_call_operand.hbm [shape: f32[16,64], index: 1, kind: input, shape index: {}]   ;;  %s8787_s2 = inlined_call_operand.vmem [shape: f32[1,2,64], index: 2, kind: input, shape index: {}]   ;;  %s8788_s3 = inlined_call_operand.hbm [shape: f32[16,64], index: 3, kind: input, shape index: {}]   ;;  %s8789_s4 = inlined_call_operand.hbm [shape: f32[2,1,64], index: 4, kind: input, shape index: {}]   ;;  %s8790_s5 = inlined_call_operand.hbm [shape: f32[2,1,64], index: 5, kind: input, shape index: {}]   ;;  %s8791_s6 = inlined_call_operand.vmem [shape: f32[2,64,256], index: 6, kind: input, shape index: {}]   ;;  %s8792_s7 = inlined_call_operand.vmem [shape: f32[2,4,128], index: 7, kind: input, shape index: {}]   ;;  %s8793_s8 = inlined_call_operand.hbm [shape: f32[2,1,128], index: 8, kind: input, shape index: {}]   ;;  %s8794_s9 = inlined_call_operand.hbm [shape: f32[2,128,256], index: 9, kind: input, shape index: {}]   ;;  %s8795_s10 = inlined_call_operand.vmem [shape: f32[2,1,128], index: 10, kind: input, shape index: {}]   ;;  %s8796_s11 = inlined_call_operand.vmem [shape: f32[2,64,128], index: 11, kind: input, shape index: {}]   ;;  %s8797_s12 = inlined_call_operand.vmem [shape: f32[2,1,128], index: 12, kind: input, shape index: {}]   ;;  %s8798_s13 = inlined_call_operand.vmem [shape: f32[2,128,64], index: 13, kind: input, shape index: {}]   ;;  %s8799_s14 = inlined_call_operand.hbm [shape: f32[1,2,64], index: 14, kind: output, shape index: {}]  }
   0x1   :  { %8965 = sst [smem:[#allocation165_spill]] %s8785_s0 }
   0x2   :  { %8966 = sst [smem:[#allocation166_spill]] %s8786_s1 }
   0x3   :  { %8967 = sst [smem:[#allocation167_spill]] %s8787_s2 }
   0x4   :  { %8968 = sst [smem:[#allocation168_spill]] %s8788_s3 }
   0x5   :  { %8969 = sst [smem:[#allocation169_spill]] %s8789_s4 }
   0x6   :  { %8970 = sst [smem:[#allocation170_spill]] %s8790_s5 }
   0x7   :  { %8971 = sst [smem:[#allocation171_spill]] %s8791_s6 }
   0x8   :  { %8972 = sst [smem:[#allocation172_spill]] %s8793_s8 }
   0x9   :  { %8973 = sst [smem:[#allocation173_spill]] %s8794_s9 }
   0xa   :  { %8974 = sst [smem:[#allocation174_spill]] %s8795_s10 }
   0xb   :  { %8975 = sst [smem:[#allocation175_spill]] %s8796_s11 }
   0xc   :  { %8976 = sst [smem:[#allocation176_spill]] %s8797_s12 }
   0xd   :  { %8977 = sst [smem:[#allocation177_spill]] %s8798_s13 }
   0xe   :  { %8978 = sst [smem:[#allocation178_spill]] %s8799_s14 }
   0xf   :  { %19 = vsyncpa [#allocation9], 0 }
  0x10   :  { %20 = vsyncpa [#allocation12], 0 }
  0x11   :  { %21 = vsyncpa [#allocation15], 0 }
  0x12   :  { %23 = vsyncpa [#allocation15 + $0x1], 0 }
  0x13   :  { %24 = vsyncpa [#allocation18], 0 }
  0x14   :  { %26 = vsyncpa [#allocation18 + $0x1], 0 }
  0x15   :  { %27 = vsyncpa [#allocation10], 0  ;;  %s5939_s29 = smov 0   ;;  %s5941_s30 = smov 0  }
  0x16   :  { %s5943_s15 = smov 0   ;;  %s5945_s16 = smov 0  }
  0x17   :  { %s5947_s17 = smov 0   ;;  %s5949_s18 = smov 0  }
  0x18 LB: > { %8979 = sst [smem:[#allocation26_spill]] %s5835_s15  ;;  %s5968_s19 = sadd.s32 4294967295, %s5847_s18   ;;  %s5847_s18 = sphi %s5949_s18, %s33_s18   ;;  %s5843_s17 = sphi %s5947_s17, %s9572_s17   ;;  %s5839_s16 = sphi %s5945_s16, %s9571_s16   ;;  %s5835_s15 = sphi %s5943_s15, %s9567_s15   ;;  %s5831_s30 = sphi %s5941_s30, %s9570_s30   ;;  %s5827_s29 = sphi %s5939_s29, %s9569_s29  }
  0x19   : > { %p159_p0 = scmp.ne.s32.totalorder %s5831_s30, %s5827_s29  ;;  %p8807_p1 = scmp.eq.s32.totalorder %s5968_s19, 0 }
  0x1a   : > { %p5053_p2 = scmp.ge.s32.totalorder %s5847_s18, 1  ;;  %p430_p3 = scmp.lt.s32.totalorder %s5847_s18, 3 }
  0x1b   : > { %p5976_p4 = por %p8807_p1, %p159_p0  ;;  %s5849_s22 = smov [#allocation11]  }
  0x1c   : > { %p5980_p5 = pnand %p5053_p2, %p430_p3  ;;  %s458_s23 = sshll.u32 %s5849_s22, 4  ;;  %s459_s23 = int_to_ptr.vmem [resolvable:$true] %s458_s23 }
  0x1d   : > { %s42_s25 = sadd.s32 1, %s5843_s17  ;;  %s5578_s26 = scalar_lea.vmem %s459_s23, 256 }
  0x1e   : > { %p5184_p6 = pneg %p5980_p5  ;;  %p5579_p9 = scmp.ne.s32.totalorder %s459_s23, %s5578_s26 }
  0x1f   : > { %p5586_p12 = scmp.lt.s32.totalorder %s459_s23, %s459_s23  ;;  %p5587_p13 = scmp.lt.s32.totalorder %s5578_s26, %s5578_s26 }
  0x20   : > { %p5988_p7 = pnand %p5184_p6, %p8807_p1 }
  0x21   : > { %p5588_p0 = por %p5587_p13, %p5586_p12 }
  0x22   : > { %p5569_p8 = pneg %p5988_p7 }
  0x24   : > { %p5581_p10 = pnand %p5579_p9, %p5569_p8 }
  0x26   : > { %p5582_p11 = pneg %p5581_p10 }
  0x28   : > { %p5589_p2 = pnand %p5588_p0, %p5582_p11 }
  0x2a   : > { %5592 = shalt.err (!%p5589_p2)
}
  0x2b   : > { %s8800_s27 = smov 128   ;;  %s8802_s28 = smov 8  }
  0x2c   : > { %s8983_s1 = sld [smem:[#allocation166_spill]]  ;;  %p43_p3 = scmp.ge.s32.totalorder %s42_s25, 2 }
  0x2d   : > { %s146_s26 = sadd.s32 1, %s5835_s15  ;;  %p153_p6 = scmp.ne.s32.totalorder %s5835_s15, %s5831_s30 }
  0x2e   : > { %p154_p9 = scmp.eq.s32.totalorder %s5847_s18, 0  ;;  %s9574_s25 = smov (%p43_p3, %s42_s25), 0 }
  0x2f   : > { %8984 = sst [smem:[#allocation27_spill]] %s9574_s25  ;;  %p5210_p11 = scmp.lt.s32.totalorder %s5847_s18, 2 }
  0x30   : > { %p155_p10 = por %p154_p9, %p153_p6  ;;  %s143_s14 = ssub.s32 %s5843_s17, %s9574_s25 }
  0x31   : > { %s8805_s2 = sand.u32 1, %s5847_s18   ;;  %p144_p12 = scmp.eq.s32.totalorder %s143_s14, 0 }
  0x32   : > { %5190 = dma.hbm_to_vmem [thread:$0]  (!%p5988_p7), %s8983_s1, 256, %s459_s23, [#allocation12], %s8800_s27, %s8800_s27, %s8802_s28  }
  0x33   : > { %s6017_s13 = sand.u32 1, %s5835_s15   ;;  %s6020_s12 = sshll.u32 %s5843_s17, 4 }
  0x34   : > { %s6023_s23 = scalar_select %p144_p12, %s5835_s15, %s146_s26  }
  0x35   : > { %s8986_s4 = sld [smem:[#allocation169_spill]]  ;;  %s495_s28 = scalar_lea.vmem [#allocation14], %s6017_s13 }
  0x36   : > { %8985 = sst [smem:[#allocation28_spill]] %s6023_s23  ;;  %s502_s1 = sshll.u32 %s495_s28, 4  ;;  %s503_s1 = int_to_ptr.vmem [resolvable:$true] %s502_s1 }
  0x37   : > { %p6030_p13 = pnand %p5210_p11, %p155_p10  ;;  %s6037_s25 = scalar_lea.sflag [#allocation15], %s8805_s2 }
  0x38   : > { %s5606_s26 = scalar_lea.vmem %s503_s1, 16  ;;  %s5852_s28 = smov [#allocation14]  }
  0x39   : > { %p8808_p0 = pneg %p6030_p13  ;;  %p5607_p2 = scmp.ne.s32.totalorder %s503_s1, %s5606_s26 }
  0x3a   : > { %s5611_s29 = sshll.u32 %s5852_s28, 4  ;;  %s5612_s29 = int_to_ptr.vmem [resolvable:$false] %s5611_s29 }
  0x3b   : > { %s500_s27 = scalar_lea.hbm %s8986_s4, %s6020_s12  ;;  %p5609_p3 = pnand %p5607_p2, %p8808_p0 }
  0x3c   : > { %s5613_s22 = scalar_lea.vmem %s5612_s29, 32  ;;  %p5614_p9 = scmp.lt.s32.totalorder %s503_s1, %s5612_s29 }
  0x3d   : > { %p5610_p6 = pneg %p5609_p3  ;;  %p5615_p10 = scmp.lt.s32.totalorder %s5613_s22, %s5606_s26 }
  0x3f   : > { %p5616_p11 = por %p5615_p10, %p5614_p9 }
  0x41   : > { %p5617_p12 = pnand %p5616_p11, %p5610_p6 }
  0x43   : > { %5620 = shalt.err (!%p5617_p12)
}
  0x44   : > { %5197 = dma.hbm_to_vmem [thread:$0]  (!%p6030_p13), %s500_s27, 16, %s503_s1, %s6037_s25  }
  0x45   : > { %s8988_s8 = sld [smem:[#allocation172_spill]]  ;;  %s544_s28 = scalar_lea.vmem [#allocation17], %s6017_s13 }
  0x46   : > { %s551_s23 = sshll.u32 %s544_s28, 4  ;;  %s8989_s29 = sand.u32 1, %s5847_s18   ;;  %s552_s23 = int_to_ptr.vmem [resolvable:$true] %s551_s23 }
  0x47   : > { %s6054_s26 = scalar_lea.sflag [#allocation18], %s8989_s29  ;;  %s5634_s22 = scalar_lea.vmem %s552_s23, 16 }
  0x48   : > { %p5635_p2 = scmp.ne.s32.totalorder %s552_s23, %s5634_s22  ;;  %s5853_s15 = smov [#allocation17]  }
  0x49   : > { %s5639_s10 = sshll.u32 %s5853_s15, 4  ;;  %s5640_s10 = int_to_ptr.vmem [resolvable:$false] %s5639_s10 }
  0x4a   : > { %p5637_p3 = pnand %p5635_p2, %p8808_p0  ;;  %s5641_s1 = scalar_lea.vmem %s5640_s10, 32 }
  0x4b   : > { %s549_s4 = scalar_lea.hbm %s8988_s8, %s6020_s12  ;;  %p5642_p9 = scmp.lt.s32.totalorder %s552_s23, %s5640_s10 }
  0x4c   : > { %p5638_p6 = pneg %p5637_p3  ;;  %p5643_p10 = scmp.lt.s32.totalorder %s5641_s1, %s5634_s22 }
  0x4e   : > { %p5644_p11 = por %p5643_p10, %p5642_p9 }
  0x50   : > { %p5645_p12 = pnand %p5644_p11, %p5638_p6 }
  0x52   : > { %5648 = shalt.err (!%p5645_p12)
}
  0x53   : > { %5203 = dma.hbm_to_vmem [thread:$0]  (!%p6030_p13), %s549_s4, 16, %s552_s23, %s6054_s26  }
  0x54   : > { %s5854_s2 = smov [#allocation8]   ;;  %s5855_s14 = smov [#allocation13]  }
  0x55   : > { %s445_s27 = sshll.u32 %s5854_s2, 4  ;;  %s478_s28 = sshll.u32 %s5855_s14, 4  ;;  %s446_s27 = int_to_ptr.vmem [resolvable:$true] %s445_s27  ;;  %s479_s28 = int_to_ptr.vmem [resolvable:$true] %s478_s28 }
  0x56   : > { %s5660_s29 = scalar_lea.vmem %s446_s27, 256  ;;  %p5668_p9 = scmp.lt.s32.totalorder %s446_s27, %s446_s27 }
  0x57   : > { %p5661_p2 = scmp.ne.s32.totalorder %s446_s27, %s5660_s29  ;;  %p5669_p6 = scmp.lt.s32.totalorder %s5660_s29, %s5660_s29 }
  0x59   : > { %p5663_p3 = pnand %p5661_p2, %p5569_p8  ;;  %p5670_p10 = por %p5669_p6, %p5668_p9 }
  0x5b   : > { %p5664_p1 = pneg %p5663_p3 }
  0x5d   : > { %p5671_p11 = pnand %p5670_p10, %p5664_p1 }
  0x5f   : > { %5674 = shalt.err (!%p5671_p11)
}
  0x60   : > { %s8990_s4 = smov 8   ;;  %s8991_s10 = smov 128  }
  0x61   : > { %s8992_s0 = sld [smem:[#allocation165_spill]]  ;;  %s5686_s22 = scalar_lea.vmem %s479_s28, 256 }
  0x62   : > { %p5687_p12 = scmp.ne.s32.totalorder %s479_s28, %s5686_s22  ;;  %p5694_p0 = scmp.lt.s32.totalorder %s479_s28, %s479_s28 }
  0x63   : > { %p5695_p9 = scmp.lt.s32.totalorder %s5686_s22, %s5686_s22 }
  0x64   : > { %p5689_p2 = pnand %p5687_p12, %p5569_p8 }
  0x65   : > { %p5696_p1 = por %p5695_p9, %p5694_p0 }
  0x66   : > { %p5690_p3 = pneg %p5689_p2 }
  0x67   : > { %5187 = dma.hbm_to_vmem [thread:$0]  (!%p5988_p7), %s8992_s0, 256, %s446_s27, [#allocation9], %s8991_s10, %s8991_s10, %s8990_s4  }
  0x68   : > { %p5697_p6 = pnand %p5696_p1, %p5690_p3 }
  0x6a   : > { %5700 = shalt.err (!%p5697_p6)
}
  0x6b   : > { %s8993_s3 = sld [smem:[#allocation168_spill]]  ;;  %s512_s15 = scalar_lea.vmem [#allocation16], %s6017_s13 }
  0x6c   : > { %s8994_s5 = sld [smem:[#allocation170_spill]]  ;;  %s519_s23 = sshll.u32 %s512_s15, 4  ;;  %s520_s23 = int_to_ptr.vmem [resolvable:$true] %s519_s23 }
  0x6d   : > { %s5092_s22 = sshll.u32 %s5843_s17, 12  ;;  %s5714_s24 = scalar_lea.vmem %s520_s23, 16 }
  0x6e   : > { %p5715_p8 = scmp.ne.s32.totalorder %s520_s23, %s5714_s24  ;;  %p8995_p0 = pneg %p6030_p13 }
  0x6f   : > { %s5856_s1 = smov [#allocation16]  }
  0x70   : > { %p5717_p10 = pnand %p5715_p8, %p8995_p0  ;;  %s5719_s2 = sshll.u32 %s5856_s1, 4  ;;  %s5720_s2 = int_to_ptr.vmem [resolvable:$false] %s5719_s2 }
  0x71   : > { %5193 = dma.hbm_to_vmem [thread:$0]  (!%p5988_p7), %s8993_s3, 256, %s479_s28, [#allocation12], %s8991_s10, %s8991_s10, %s8990_s4  }
  0x72   : > { %s517_s29 = scalar_lea.hbm %s8994_s5, %s6020_s12  ;;  %p5718_p11 = pneg %p5717_p10 }
  0x73   : > { %s5721_s0 = scalar_lea.vmem %s5720_s2, 32  ;;  %p5722_p12 = scmp.lt.s32.totalorder %s520_s23, %s5720_s2 }
  0x74   : > { %p5723_p7 = scmp.lt.s32.totalorder %s5721_s0, %s5714_s24 }
  0x76   : > { %p5724_p2 = por %p5723_p7, %p5722_p12 }
  0x78   : > { %p5725_p3 = pnand %p5724_p2, %p5718_p11 }
  0x7a   : > { %5728 = shalt.err (!%p5725_p3)
}
  0x7b   : > { %5200 = dma.hbm_to_vmem [thread:$0]  (!%p6030_p13), %s517_s29, 16, %s520_s23, %s6037_s25  }
  0x7c   : > { %s8996_s9 = sld [smem:[#allocation173_spill]]  ;;  %s8997_s10 = sshll.u32 %s6017_s13, 8 }
  0x7d   : > { %s562_s27 = scalar_lea.vmem [#allocation19], %s8997_s10  ;;  %p8998_p1 = pmov %p8995_p0 }
  0x7e   : > { %s569_s14 = sshll.u32 %s562_s27, 4  ;;  %s5857_s0 = smov [#allocation19]   ;;  %s570_s14 = int_to_ptr.vmem [resolvable:$true] %s569_s14 }
  0x7f   : > { %s5742_s15 = scalar_lea.vmem %s570_s14, 4096  ;;  %s5747_s24 = sshll.u32 %s5857_s0, 4  ;;  %s5748_s24 = int_to_ptr.vmem [resolvable:$false] %s5747_s24 }
  0x80   : > { %p5743_p9 = scmp.ne.s32.totalorder %s570_s14, %s5742_s15  ;;  %s5749_s1 = scalar_lea.vmem %s5748_s24, 8192 }
  0x81   : > { %p5750_p0 = scmp.lt.s32.totalorder %s570_s14, %s5748_s24  ;;  %p5751_p10 = scmp.lt.s32.totalorder %s5749_s1, %s5742_s15 }
  0x82   : > { %s568_s4 = scalar_lea.hbm %s8996_s9, %s5092_s22  ;;  %p5745_p6 = pnand %p5743_p9, %p8998_p1 }
  0x83   : > { %p5752_p11 = por %p5751_p10, %p5750_p0 }
  0x84   : > { %p5746_p8 = pneg %p5745_p6 }
  0x86   : > { %p5753_p12 = pnand %p5752_p11, %p5746_p8 }
  0x88   : > { %5756 = shalt.err (!%p5753_p12)
}
  0x89   : > { %s5858_s25 = smov 256   ;;  %s5859_s13 = smov 16  }
  0x8a   : > { %5206 = dma.hbm_to_vmem [thread:$0]  (!%p6030_p13), %s568_s4, 4096, %s570_s14, %s6054_s26, %s5858_s25, %s5858_s25, %s5859_s13  }
  0x8b   : > { %609 = sbr.rel (%p5980_p5) target bundleno = 2019 (0x7e3), region = 76 }
  0x90   : > { %p8999_p7 = scmp.eq.s32.totalorder %s5968_s19, 0 }
  0x92   : > { %5806 = dma.done.wait (%p8999_p7), [#allocation9], 256   ;;  %p9000_p2 = pmov %p8999_p7 }
  0x94   : > { %5808 = vsyncadd (%p9000_p2), [#allocation9], 4294967040  ;;  %p9001_p3 = pmov %p9000_p2 }
  0x95   : > { %p9002_p9 = pmov %p9000_p2 }
  0x96   : > { %5810 = dma.done.wait (%p9001_p3), [#allocation12], 512  }
  0x97   : > { %5812 = vsyncadd (%p9002_p9), [#allocation12], 4294966784  ;;  %s623_s11 = sand.u32 1, %s5968_s19   ;;  %s6119_s26 = sand.u32 1, %s5831_s30  }
  0x98   : > { %s624_s21 = scalar_lea.sflag [#allocation15], %s623_s11 }
  0x99   : > { %5814 = dma.done.wait (%p5976_p4), %s624_s21, 32  }
  0x9a   : > { %5816 = vsyncadd (%p5976_p4), %s624_s21, 4294967264  ;;  %s640_s22 = scalar_lea.sflag [#allocation18], %s623_s11 }
  0x9b   : > { %5818 = dma.done.wait (%p5976_p4), %s640_s22, 4112  }
  0x9c   : > { %5820 = vsyncadd (%p5976_p4), %s640_s22, 4294963184  ;;  %s5069_s12 = sshll.u32 %s6119_s26, 8  ;;  %p736_p5 = scmp.lt.s32.totalorder %s5839_s16, 1 }
  0x9d   : > { %s9003_s6 = sld [smem:[#allocation171_spill]]  ;;  %p5077_p4 = scmp.ne.s32.totalorder %s5839_s16, 0 }
  0x9e   : > { %s6135_s28 = scalar_select %p736_p5, %s5839_s16, 1 }
  0x9f   : > { %s9004_s13 = sld [smem:[#allocation174_spill]] }
  0xa0   : > { %s5093_s4 = sshll.u32 %s6135_s28, 7  ;;  %s5072_s10 = sshll.u32 %s6135_s28, 2 }
  0xa1   : > { %s6147_s24 = scalar_lea.vmem %s8792_s7, %s5072_s10  ;;  %s5094_s21 = sshll.u32 %s6135_s28, 6 }
  0xa2   : > { %s9005_s23 = sld [smem:[#allocation175_spill]]  ;;  %s6168_s10 = scalar_lea.vmem [#allocation19], %s5069_s12 }
  0xa3   : > { %s6142_s15 = scalar_lea.vmem %s9003_s6, %s5093_s4  ;;  %s9006_s27 = sld [smem:[#allocation176_spill]] }
  0xa4   : > { %s9007_s9 = sld [smem:[#allocation177_spill]] }
  0xa5   : > { %s747_s11 = scalar_lea.vmem %s9004_s13, %s6135_s28  ;;  %s9008_s6 = sld [smem:[#allocation167_spill]] (!%p5077_p4) }
  0xa6   : > { %764 = sbr.rel (%p5077_p4) target bundleno = 376 (0x178), region = 108 }
  0xa8   : > { %s6157_s29 = scalar_lea.vmem %s9005_s23, %s5094_s21 }
  0xa9   : > { %s755_s14 = scalar_lea.vmem %s9006_s27, %s6135_s28 }
  0xaa   : > { %s6166_s20 = scalar_lea.vmem %s9007_s9, %s5093_s4 }
  0xab   : > { %v768_v0 = vld [vmem:[#allocation13 + $0x8] sm:$0xff]  ;;  %v767_v1 = vld [vmem:[#allocation13] sm:$0xff]  ;;  %vm785_vm0 = vcmask 130048   ;;  %v769_v4 = vld [vmem:[%s9008_s6] sm:$0x3]  ;;  %vm777_vm1 = vcmask 1041408  }
  0xac   : > { %v765_v2 = vld [vmem:[#allocation8] sm:$0xff]  ;;  %5118 = vmatprep.subr.mxu0 %v768_v0  ;;  %v766_v3 = vld [vmem:[#allocation8 + $0x8] sm:$0xff]  ;;  %v771_v5 = vrot.slane %v769_v4, 6  ;;  %v773_v6 = vrot.slane %v769_v4, 4  ;;  %vm779_vm2 = vcmask 1043456   ;;  %v775_v8 = vrot.slane %v769_v4, 2 }
  0xad   : > { %5122 = vmatprep.mubr.msk.f32.mxu0 %vm785_vm0, %v765_v2  ;;  %5119 = vmatpush3.msra.mxu0 %v768_v0  ;;  %vm781_vm3 = vcmask 1045504   ;;  %v784_v10 = vld [vmem:[#allocation11 + $0x8] sm:$0xff]  ;;  %v783_v13 = vld [vmem:[#allocation11] sm:$0xff]  ;;  %vm869_vm4 = vcmask 523264  }
  0xae   : > { %5120 = vmatprep.subr.mxu0 %v767_v1  ;;  %v778_v7 = vsel %vm777_vm1, %v769_v4, %v771_v5 }
  0xaf   : > { %5121 = vmatpush3.msra.mxu0 %v767_v1  ;;  %v780_v9 = vsel %vm779_vm2, %v778_v7, %v773_v6 }
  0xb0   : > { %5123 = vmatmul.mubr.msk.f32.vlgmr.msra.gmra.mxu0 %vm785_vm0, %v766_v3  ;;  %v782_v11 = vsel %vm781_vm3, %v780_v9, %v775_v8 }
 0x170   : > { %v5124_v12 = vpop.f32.mrf.mxu0 }
 0x171   : > { %v864_v14 = vadd.f32 %v5124_v12, %v784_v10 }
 0x172   : > { %v858_v15 = vpop.f32.mrf.mxu0 }
 0x173   : > { %v868_v16 = vadd.f32 %v864_v14, %v782_v11  ;;  %v859_v17 = vadd.f32 %v858_v15, %v783_v13 }
 0x175   : > { %871 = vst.msk [vmem:[#allocation2 + $0x8] sm:$0xff] %vm869_vm4, %v868_v16  ;;  %v867_v18 = vadd.f32 %v859_v17, %v782_v11 }
 0x177   : > { %870 = vst.msk [vmem:[#allocation2] sm:$0xff] %vm869_vm4, %v867_v18 }
 0x178 PF: > { %vm874_vm5 = vcmask 523264   ;;  %v935_v33 = vld [vmem:[%s6142_s15 + $0x78] sm:$0xff]  ;;  %v934_v34 = vld [vmem:[%s6142_s15 + $0x70] sm:$0xff]  ;;  %v933_v35 = vld [vmem:[%s6142_s15 + $0x68] sm:$0xff]  ;;  %v5860_v38 = vmov 0.0   ;;  %s9009_s8 = scalar_lea.vmem [#allocation14], %s6119_s26 }
 0x179   : > { %958 = vmatprep.subr.mxu0 %v935_v33  ;;  %v932_v36 = vld [vmem:[%s6142_s15 + $0x60] sm:$0xff]  ;;  %v931_v37 = vld [vmem:[%s6142_s15 + $0x58] sm:$0xff]  ;;  %1006 = vmatprep.mubr.f32.mxu0 %v5860_v38  ;;  %v930_v39 = vld [vmem:[%s6142_s15 + $0x50] sm:$0xff]  ;;  %s9010_s9 = scalar_lea.vmem [#allocation16], %s6119_s26  ;;  %s9014_s23 = scalar_lea.vmem [#allocation17], %s6119_s26  ;;  %vm3170_vm14 = vcmask 1041409  }
 0x17a   : > { %959 = vmatpush1.msra.mxu0 %v934_v34  ;;  %1197 = vmatprep.mubr.f32.mxu1 %v5860_v38  ;;  %v929_v40 = vld [vmem:[%s6142_s15 + $0x48] sm:$0xff]  ;;  %v928_v41 = vld [vmem:[%s6142_s15 + $0x40] sm:$0xff]  ;;  %v927_v42 = vld [vmem:[%s6142_s15 + $0x38] sm:$0xff]  ;;  %v1020_v34 = vlaneseq  ;;  %s5861_s26 = smov 64   ;;  %p5087_p13 = scmp.ne.s32.totalorder %s5839_s16, 1 }
 0x17b   : > { %960 = vmatprep.subr.mxu0 %v933_v35  ;;  %v926_v43 = vld [vmem:[%s6142_s15 + $0x30] sm:$0xff]  ;;  %v925_v44 = vld [vmem:[%s6142_s15 + $0x28] sm:$0xff]  ;;  %v924_v45 = vld [vmem:[%s6142_s15 + $0x20] sm:$0xff] }
 0x17c   : > { %v873_v20 = vld [vmem:[#allocation2 + $0x8] sm:$0xff]  ;;  %961 = vmatpush1.msra.mxu0 %v932_v36  ;;  %v923_v46 = vld [vmem:[%s6142_s15 + $0x18] sm:$0xff]  ;;  %v922_v47 = vld [vmem:[%s6142_s15 + $0x10] sm:$0xff]  ;;  %v6235_v35 = vshrl.u32 %v1020_v34, 7 }
 0x17d   : > { %v878_v22 = vsel %vm874_vm5, %v873_v20, 0.0  ;;  %962 = vmatprep.subr.mxu0 %v931_v37  ;;  %v921_v48 = vld [vmem:[%s6142_s15 + $0x8] sm:$0xff]  ;;  %v920_v49 = vld [vmem:[%s6142_s15] sm:$0xff]  ;;  %v1131_v3 = vld [vmem:[%s6168_s10 + $0xf0] sm:$0xff] }
 0x17e   : > { %v872_v19 = vld [vmem:[#allocation2] sm:$0xff]  ;;  %963 = vmatpush1.msra.mxu0 %v930_v39  ;;  %v1130_v4 = vld [vmem:[%s6168_s10 + $0xe8] sm:$0xff]  ;;  %v1127_v7 = vld [vmem:[%s6168_s10 + $0xd0] sm:$0xff]  ;;  %v6238_v36 = vsub.s32 3, %v6235_v35  ;;  %v6242_v39 = vsub.s32 0, %v6235_v35  ;;  %vm1031_vm6 = vcmp.lt.s32.totalorder %v6235_v35, 6 }
 0x17f   : > { %v875_v21 = vsel %vm874_vm5, %v872_v19, 0.0  ;;  %964 = vmatprep.subr.mxu0 %v929_v40  ;;  %v5080_v57 = vld [vmem:[%s9009_s8] ss:$0 sm:$0xff]  ;;  %v1129_v5 = vld [vmem:[%s6168_s10 + $0xe0] sm:$0xff]  ;;  %v1126_v8 = vld [vmem:[%s6168_s10 + $0xc8] sm:$0xff]  ;;  %vm1048_vm7 = vcmp.lt.s32.totalorder %v6235_v35, 4 }
 0x180   : > { %876 = vadd.xlane.f32.xlu0 %v875_v21  ;;  %965 = vmatpush1.msra.mxu0 %v928_v41  ;;  %v5081_v59 = vld [vmem:[%s9010_s9] ss:$0 sm:$0xff]  ;;  %v1125_v9 = vld [vmem:[%s6168_s10 + $0xc0] sm:$0xff]  ;;  %v1123_v11 = vld [vmem:[%s6168_s10 + $0xb0] sm:$0xff]  ;;  %9011 = vst [vmem:[#allocation29_spill] sm:$0xff] %v6242_v39  ;;  %v6245_v41 = vsub.s32 1, %v6235_v35 }
 0x181   : > { %966 = vmatprep.subr.mxu0 %v927_v42  ;;  %v1132_v2 = vld [vmem:[%s6168_s10 + $0xf8] sm:$0xff]  ;;  %v1122_v12 = vld [vmem:[%s6168_s10 + $0xa8] sm:$0xff]  ;;  %v1121_v13 = vld [vmem:[%s6168_s10 + $0xa0] sm:$0xff]  ;;  %vm1034_vm8 = vcmp.ge.s32.totalorder %v6235_v35, 6  ;;  %vm1051_vm9 = vcmp.ge.s32.totalorder %v6235_v35, 4  ;;  %vm1065_vm10 = vcmp.lt.s32.totalorder %v6235_v35, 2 }
 0x182   : > { %967 = vmatpush1.msra.mxu0 %v926_v43  ;;  %1133 = vmatprep.subr.mxu1 %v1132_v2  ;;  %v1128_v6 = vld [vmem:[%s6168_s10 + $0xd8] sm:$0xff]  ;;  %v1119_v15 = vld [vmem:[%s6168_s10 + $0x90] sm:$0xff]  ;;  %v1118_v16 = vld [vmem:[%s6168_s10 + $0x88] sm:$0xff]  ;;  %9012 = vst [vmem:[#allocation30_spill] sm:$0xff] %v6245_v41  ;;  %vm1068_vm11 = vcmp.ge.s32.totalorder %v6235_v35, 2 }
 0x183   : > { %968 = vmatprep.subr.mxu0 %v925_v44  ;;  %1134 = vmatpush1.msra.mxu1 %v1131_v3  ;;  %v1124_v10 = vld [vmem:[%s6168_s10 + $0xb8] sm:$0xff]  ;;  %v1117_v17 = vld [vmem:[%s6168_s10 + $0x80] sm:$0xff]  ;;  %v6251_v44 = vsub.s32 2, %v6235_v35 }
 0x184   : > { %879 = vadd.xlane.f32.xlu0 %v878_v22  ;;  %969 = vmatpush1.msra.mxu0 %v924_v45  ;;  %v1120_v14 = vld [vmem:[%s6168_s10 + $0x98] sm:$0xff]  ;;  %v1113_v21 = vld [vmem:[%s6168_s10 + $0x60] sm:$0xff] }
 0x185   : > { %970 = vmatprep.subr.mxu0 %v923_v46  ;;  %1135 = vmatprep.subr.mxu1 %v1130_v4  ;;  %v1116_v18 = vld [vmem:[%s6168_s10 + $0x78] sm:$0xff]  ;;  %v1101_v33 = vld [vmem:[%s6168_s10] sm:$0xff] }
 0x186   : > { %971 = vmatpush1.msra.mxu0 %v922_v47  ;;  %1136 = vmatpush1.msra.mxu1 %v1129_v5  ;;  %v1112_v22 = vld [vmem:[%s6168_s10 + $0x58] sm:$0xff] }
 0x187   : > { %972 = vmatprep.subr.mxu0 %v921_v48  ;;  %1137 = vmatprep.subr.mxu1 %v1128_v6  ;;  %v1019_v37 = vld [vmem:[%s6147_s24] sm:$0xf] }
 0x188   : > { %973 = vmatpush1.msra.mxu0 %v920_v49  ;;  %1138 = vmatpush1.msra.mxu1 %v1127_v7  ;;  %v1026_v42 = vrot.slane %v1019_v37, %v6238_v36  ;;  %v1041_v45 = vrot.slane %v1019_v37, %v6242_v39  ;;  %v1058_v47 = vrot.slane %v1019_v37, %v6245_v41 }
 0x189   : > { %1139 = vmatprep.subr.mxu1 %v1126_v8 }
 0x18a   : > { %1140 = vmatpush1.msra.mxu1 %v1125_v9 }
 0x18b   : > { %1141 = vmatprep.subr.mxu1 %v1124_v10 }
 0x18c   : > { %1142 = vmatpush1.msra.mxu1 %v1123_v11 }
 0x18d   : > { %1143 = vmatprep.subr.mxu1 %v1122_v12  ;;  %v5084_v12 = vld [vmem:[%s9014_s23] ss:$0 sm:$0xff] }
 0x18e   : > { %1144 = vmatpush1.msra.mxu1 %v1121_v13 }
 0x18f   : > { %1145 = vmatprep.subr.mxu1 %v1120_v14 }
 0x190   : > { %1146 = vmatpush1.msra.mxu1 %v1119_v15 }
 0x191   : > { %1147 = vmatprep.subr.mxu1 %v1118_v16 }
 0x192   : > { %1148 = vmatpush1.msra.mxu1 %v1117_v17 }
 0x193   : > { %1149 = vmatprep.subr.mxu1 %v1116_v18 }
 0x209   : > { %v877_v23 = vpop.xlane.xlu0 %876 }
 0x20a   : > { %v882_v24 = vmul.f32 0.015625, %v877_v23  ;;  %v1111_v23 = vld [vmem:[%s6168_s10 + $0x50] sm:$0xff] }
 0x20c   : > { %v884_v25 = vsub.f32 %v872_v19, %v882_v24  ;;  %v1115_v19 = vld [vmem:[%s6168_s10 + $0x70] sm:$0xff]  ;;  %v1110_v24 = vld [vmem:[%s6168_s10 + $0x48] sm:$0xff] }
 0x20d   : > { %v880_v26 = vpop.xlane.xlu0 %879  ;;  %1150 = vmatpush1.msra.mxu1 %v1115_v19 }
 0x20e   : > { %v883_v27 = vmul.f32 0.015625, %v880_v26  ;;  %v886_v28 = vmul.f32 %v884_v25, %v884_v25  ;;  %v1108_v26 = vld [vmem:[%s6168_s10 + $0x38] sm:$0xff] }
 0x210   : > { %v885_v29 = vsub.f32 %v873_v20, %v883_v27  ;;  %v888_v30 = vsel %vm874_vm5, %v886_v28, 0.0  ;;  %v1114_v20 = vld [vmem:[%s6168_s10 + $0x68] sm:$0xff]  ;;  %v1107_v27 = vld [vmem:[%s6168_s10 + $0x30] sm:$0xff] }
 0x211   : > { %889 = vadd.xlane.f32.xlu1 %v888_v30  ;;  %1151 = vmatprep.subr.mxu1 %v1114_v20  ;;  %v1106_v28 = vld [vmem:[%s6168_s10 + $0x28] sm:$0xff]  ;;  %v1104_v30 = vld [vmem:[%s6168_s10 + $0x18] sm:$0xff] }
 0x212   : > { %v887_v31 = vmul.f32 %v885_v29, %v885_v29  ;;  %1152 = vmatpush1.msra.mxu1 %v1113_v21 }
 0x213   : > { %1153 = vmatprep.subr.mxu1 %v1112_v22 }
 0x214   : > { %v891_v32 = vsel %vm874_vm5, %v887_v31, 0.0  ;;  %1154 = vmatpush1.msra.mxu1 %v1111_v23  ;;  %v1103_v31 = vld [vmem:[%s6168_s10 + $0x10] sm:$0xff] }
 0x215   : > { %892 = vadd.xlane.f32.xlu1 %v891_v32  ;;  %1155 = vmatprep.subr.mxu1 %v1110_v24  ;;  %v1102_v32 = vld [vmem:[%s6168_s10 + $0x8] sm:$0xff] }
 0x29a   : > { %v890_v50 = vpop.xlane.xlu1 %889 }
 0x29b   : > { %v894_v51 = vmul.f32 0.015625, %v890_v50 }
 0x29d   : > { %v896_v52 = vadd.f32 1e-06, %v894_v51 }
 0x29e   : > { %v893_v53 = vpop.xlane.xlu1 %892 }
 0x29f   : > { %5275 = vrsqrt.f32 %v896_v52  ;;  %v895_v54 = vmul.f32 0.015625, %v893_v53 }
 0x2a1   : > { %v897_v55 = vadd.f32 1e-06, %v895_v54  ;;  %v1075_v54 = vrot.slane %v1019_v37, %v6251_v44 }
 0x2a3   : > { %5277 = vrsqrt.f32 %v897_v55 }
 0x2ac   : > { %v5276_v56 = vpop.eup %5275 }
 0x2ad   : > { %v900_v58 = vmul.f32 %v5276_v56, %v884_v25  ;;  %v1109_v25 = vld [vmem:[%s6168_s10 + $0x40] sm:$0xff] }
 0x2ae   : > { %1156 = vmatpush1.msra.mxu1 %v1109_v25 }
 0x2af   : > { %v909_v60 = vmul.f32 %v5080_v57, %v900_v58  ;;  %1157 = vmatprep.subr.mxu1 %v1108_v26 }
 0x2b0   : > { %v5278_v61 = vpop.eup %5277  ;;  %1158 = vmatpush1.msra.mxu1 %v1107_v27 }
 0x2b1   : > { %v918_v62 = vadd.f32 %v5081_v59, %v909_v60  ;;  %v901_v63 = vmul.f32 %v5278_v61, %v885_v29  ;;  %v1105_v29 = vld [vmem:[%s6168_s10 + $0x20] sm:$0xff]  ;;  %1159 = vmatprep.subr.mxu1 %v1106_v28 }
 0x2b2   : > { %1160 = vmatpush1.msra.mxu1 %v1105_v29 }
 0x2b3   : > { %5082 = vmatmul.mubr.msk.f32.vlgmr.msra.gmra.mxu0 %vm874_vm5, %v918_v62  ;;  %v910_v0 = vmul.f32 %v5080_v57, %v901_v63  ;;  %1161 = vmatprep.subr.mxu1 %v1104_v30 }
 0x2b4   : > { %1012 = vmatprep.mubr.f32.mxu0 %v5860_v38  ;;  %1162 = vmatpush1.msra.mxu1 %v1103_v31 }
 0x2b5   : > { %v919_v1 = vadd.f32 %v5081_v59, %v910_v0  ;;  %1163 = vmatprep.subr.mxu1 %v1102_v32 }
 0x2b6   : > { %1164 = vmatpush1.msra.mxu1 %v1101_v33 }
 0x2b7   : > { %5083 = vmatmul.mubr.msk.f32.gmra.mxu0 %vm874_vm5, %v919_v1 }
 0x373   : > { %v1008_v40 = vpop.f32.mrf.mxu0 }
 0x374   : > { %v1029_v48 = vrot.slane %v1008_v40, 2  ;;  %v1046_v49 = vrot.slane %v1008_v40, 4  ;;  %v1027_v52 = vmul.f32 %v1026_v42, %v1008_v40  ;;  %v1063_v55 = vrot.slane %v1008_v40, 6 }
 0x375   : > { %v6248_v43 = vpop.f32.mrf.mxu0 }
 0x376   : > { %9013 = vst [vmem:[#allocation31_spill] sm:$0xff] %v6248_v43 }
 0x377   : > { %v1014_v46 = vpop.f32.mrf.mxu0 }
 0x378   : > { %v1030_v50 = vrot.slane %v1014_v46, 2  ;;  %v1047_v51 = vrot.slane %v1014_v46, 4  ;;  %v1064_v53 = vrot.slane %v1014_v46, 6  ;;  %v1028_v59 = vmul.f32 %v1026_v42, %v1014_v46 }
 0x37a   : > { %v1032_v56 = vsel %vm1031_vm6, %v1029_v48, %v1030_v50  ;;  %v1033_v57 = vsel %vm1031_vm6, %v1030_v50, %v1029_v48  ;;  %v1049_v58 = vsel %vm1048_vm7, %v1046_v49, %v1047_v51  ;;  %v1050_v62 = vsel %vm1048_vm7, %v1047_v51, %v1046_v49 }
 0x37b   : > { %v1036_v60 = vsel %vm1034_vm8, %v1033_v57, 0.0  ;;  %v1043_v61 = vmul.f32 %v1041_v45, %v1032_v56  ;;  %v1053_v0 = vsel %vm1051_vm9, %v1050_v62, 0.0  ;;  %v1066_v1 = vsel %vm1065_vm10, %v1063_v55, %v1064_v53 }
 0x37c   : > { %v1042_v63 = vmul.f32 %v1041_v45, %v1036_v60  ;;  %v1067_v2 = vsel %vm1065_vm10, %v1064_v53, %v1063_v55  ;;  %v1060_v4 = vmul.f32 %v1058_v47, %v1049_v58  ;;  %v1059_v7 = vmul.f32 %v1058_v47, %v1053_v0 }
 0x37d   : > { %v1045_v3 = vadd.f32 %v1043_v61, %v1028_v59  ;;  %v1070_v5 = vsel %vm1068_vm11, %v1067_v2, 0.0  ;;  %v1077_v9 = vmul.f32 %v1075_v54, %v1066_v1  ;;  %v5862_v48 = vmov 1966171168  }
 0x37e   : > { %v1044_v6 = vadd.f32 %v1042_v63, %v1027_v52  ;;  %v1076_v11 = vmul.f32 %v1075_v54, %v1070_v5  ;;  %v1247_v49 = vunpack.c.l.s4 %v5862_v48 }
 0x37f   : > { %v1062_v8 = vadd.f32 %v1060_v4, %v1045_v3 }
 0x380   : > { %v1061_v10 = vadd.f32 %v1059_v7, %v1044_v6  ;;  %v1248_v51 = vunpack.c.0.s8 %v1247_v49 }
 0x381   : > { %v1079_v13 = vadd.f32 %v1077_v9, %v1062_v8 }
 0x382   : > { %v1078_v14 = vadd.f32 %v1076_v11, %v1061_v10  ;;  %v6312_v54 = vsub.s32 %v1248_v51, %v6235_v35  ;;  %v8812_v10 = vsub.s32 4, %v6235_v35 }
 0x383   : > { %v1088_v15 = vadd.f32 %v5084_v12, %v1079_v13 }
 0x384   : > { %v1087_v16 = vadd.f32 %v5084_v12, %v1078_v14 }
 0x385   : > { %v1090_v17 = vsub.f32 0.0, %v1088_v15 }
 0x386   : > { %v1089_v18 = vsub.f32 0.0, %v1087_v16 }
 0x387   : > { %v1093_v19 = vmul.f32 1.442695, %v1090_v17 }
 0x388   : > { %v1091_v20 = vmul.f32 1.442695, %v1089_v18 }
 0x389   : > { %5279 = vpow2.f32 %v1093_v19  ;;  %v8810_v19 = vsub.s32 6, %v6235_v35 }
 0x38a   : > { %5281 = vpow2.f32 %v1091_v20 }
 0x396   : > { %v5280_v21 = vpop.eup %5279 }
 0x397   : > { %v5282_v22 = vpop.eup %5281  ;;  %v1096_v24 = vadd.f32 1.0, %v5280_v21 }
 0x398   : > { %v1095_v23 = vadd.f32 1.0, %v5282_v22 }
 0x39a   : > { %5283 = vrcp.f32 %v1095_v23 }
 0x39b   : > { %5285 = vrcp.f32 %v1096_v24 }
 0x3a7   : > { %v5284_v25 = vpop.eup %5283 }
 0x3a8   : > { %v6282_v26 = vmul.f32 %v5284_v25, %v1087_v16  ;;  %v5286_v27 = vpop.eup %5285  ;;  %v6363_v25 = vld [vmem:[%s6157_s29] sm:$0xff] }
 0x3a9   : > { %v6286_v28 = vmul.f32 %v5286_v27, %v1088_v15  ;;  %v8811_v15 = vsub.s32 5, %v6235_v35 }
 0x3aa   : > { %9015 = vst [vmem:[#allocation32_spill] sm:$0xff] %v6282_v26  ;;  %1198 = vmatmul.mubr.f32.vlgmr.msra.gmra.mxu1 %v6282_v26 }
 0x3ab   : > { %1203 = vmatprep.mubr.f32.mxu1 %v5860_v38  ;;  %9016 = vst [vmem:[#allocation33_spill] sm:$0xff] %v6286_v28  ;;  %v6302_v38 = vld [vmem:[%s747_s11] ss:$0 sm:$0xff] }
 0x3ae   : > { %1204 = vmatmul.mubr.f32.gmra.mxu1 %v6286_v28 }
 0x46a   : > { %v6289_v29 = vpop.f32.mrf.mxu1 }
 0x46b   : > { %v6342_v11 = vadd.f32 %v6302_v38, %v6289_v29 }
 0x46c   : > { %v6291_v30 = vpop.f32.mrf.mxu1 }
 0x46d   : > { %v1938_v31 = vrot.slane %v6291_v30, %v6242_v39  ;;  %2935 = vrot.lane.b32.xlu0 %v6291_v30, %s5861_s26  ;;  %v1973_v40 = vrot.slane %v6291_v30, %v6245_v41  ;;  %v2008_v46 = vrot.slane %v6291_v30, %v6251_v44  ;;  %v2043_v53 = vrot.slane %v6291_v30, %v6238_v36 }
 0x46e   : > { %v1205_v32 = vpop.f32.mrf.mxu1  ;;  %v2078_v12 = vrot.slane %v6291_v30, %v8812_v10  ;;  %v1221_v13 = vmin.f32 %v6342_v11, 20.0  ;;  %v2113_v16 = vrot.slane %v6291_v30, %v8811_v15  ;;  %v2148_v20 = vrot.slane %v6291_v30, %v8810_v19 }
 0x46f   : > { %v1218_v33 = vadd.f32 %v6302_v38, %v1205_v32  ;;  %1944 = vbcast.lane.b32.xlu1 %v1938_v31, 264  ;;  %vm1219_vm13 = vcmp.gt.f32.partialorder %v6342_v11, 20.0 }
 0x470   : > { %v1223_v14 = vmul.f32 1.442695, %v1221_v13 }
 0x471   : > { %v1222_v34 = vmin.f32 %v1218_v33, 20.0  ;;  %1940 = vbcast.lane.b32.xlu0 %v1938_v31, 256  ;;  %vm1220_vm12 = vcmp.gt.f32.partialorder %v1218_v33, 20.0 }
 0x473   : > { %v1225_v37 = vmul.f32 1.442695, %v1222_v34  ;;  %1948 = vbcast.lane.b32.xlu1 %v1938_v31, 272 }
 0x475   : > { %5287 = vpow2.f32 %v1225_v37  ;;  %1956 = vbcast.lane.b32.xlu0 %v1938_v31, 288 }
 0x477   : > { %1952 = vbcast.lane.b32.xlu1 %v1938_v31, 280 }
 0x479   : > { %1964 = vbcast.lane.b32.xlu0 %v1938_v31, 304 }
 0x47b   : > { %1960 = vbcast.lane.b32.xlu1 %v1938_v31, 296 }
 0x47d   : > { %1975 = vbcast.lane.b32.xlu0 %v1973_v40, 256 }
 0x47f   : > { %1968 = vbcast.lane.b32.xlu1 %v1938_v31, 312 }
 0x481   : > { %1983 = vbcast.lane.b32.xlu0 %v1973_v40, 272 }
 0x482   : > { %v5288_v42 = vpop.eup %5287 }
 0x483   : > { %v1228_v45 = vadd.f32 1.0, %v5288_v42  ;;  %1979 = vbcast.lane.b32.xlu1 %v1973_v40, 264  ;;  %v8809_v42 = vsub.s32 7, %v6235_v35 }
 0x485   : > { %5289 = vlog2.f32 %v1228_v45  ;;  %1991 = vbcast.lane.b32.xlu0 %v1973_v40, 288  ;;  %v2183_v51 = vrot.slane %v6291_v30, %v8809_v42 }
 0x486   : > { %5291 = vpow2.f32 %v1223_v14 }
 0x487   : > { %1987 = vbcast.lane.b32.xlu1 %v1973_v40, 280 }
 0x489   : > { %1999 = vbcast.lane.b32.xlu0 %v1973_v40, 304 }
 0x48b   : > { %1995 = vbcast.lane.b32.xlu1 %v1973_v40, 296 }
 0x48d   : > { %2010 = vbcast.lane.b32.xlu0 %v2008_v46, 256 }
 0x48f   : > { %2003 = vbcast.lane.b32.xlu1 %v1973_v40, 312 }
 0x491   : > { %2018 = vbcast.lane.b32.xlu0 %v2008_v46, 272 }
 0x492   : > { %v5290_v47 = vpop.eup %5289 }
 0x493   : > { %2014 = vbcast.lane.b32.xlu1 %v2008_v46, 264  ;;  %v1232_v50 = vmul.f32 0.6931472, %v5290_v47  ;;  %v5292_v17 = vpop.eup %5291 }
 0x494   : > { %v1227_v18 = vadd.f32 1.0, %v5292_v17  ;;  %v1207_v17 = vpop.f32.mrf.mxu1 }
 0x495   : > { %2026 = vbcast.lane.b32.xlu0 %v2008_v46, 288  ;;  %v1234_v52 = vsel %vm1220_vm12, %v1218_v33, %v1232_v50  ;;  %v6524_v43 = vrot.slane %v1207_v17, %v6238_v36 }
 0x496   : > { %v1294_v55 = vcombine.high %v1234_v52, %v1234_v52  ;;  %v1301_v56 = vrot.slane %v1234_v52, %v6312_v54  ;;  %v2496_v58 = vmul.f32 %v1234_v52, %v6286_v28  ;;  %5293 = vlog2.f32 %v1227_v18 }
 0x497   : > { %2022 = vbcast.lane.b32.xlu1 %v2008_v46, 280 }
 0x498   : > { %v1308_v57 = vrot.slane %v1294_v55, %v6312_v54  ;;  %v1309_v59 = vcombine.high %v1301_v56, %v1301_v56  ;;  %v1317_v61 = vrot.slane %v1301_v56, %v6312_v54  ;;  %v2548_v63 = vcombine.high %v2496_v58, %v2496_v58  ;;  %v6424_v56 = vld [vmem:[%s6157_s29 + $0x10] sm:$0xff] }
 0x499   : > { %2034 = vbcast.lane.b32.xlu0 %v2008_v46, 304  ;;  %v2555_v0 = vrot.slane %v2496_v58, %v6312_v54 }
 0x49a   : > { %v1310_v60 = vcombine.high %v1308_v57, %v1308_v57  ;;  %v6319_v62 = vrot.slane %v1308_v57, %v6312_v54  ;;  %v1331_v1 = vrot.slane %v1309_v59, %v6312_v54  ;;  %v2562_v3 = vrot.slane %v2548_v63, %v6312_v54 }
 0x49b   : > { %2030 = vbcast.lane.b32.xlu1 %v2008_v46, 296  ;;  %v2563_v4 = vcombine.high %v2555_v0, %v2555_v0  ;;  %v6328_v6 = vrot.slane %v2555_v0, %v6312_v54  ;;  %v1339_v21 = vcombine.high %v1317_v61, %v1317_v61  ;;  %v6357_v23 = vrot.slane %v1317_v61, %v6242_v39 }
 0x49c   : > { %v6324_v2 = vrot.slane %v1310_v60, %v6312_v54  ;;  %v2564_v5 = vcombine.high %v2562_v3, %v2562_v3  ;;  %v6331_v7 = vrot.slane %v2562_v3, %v6312_v54  ;;  %v1341_v22 = vcombine.high %v1331_v1, %v1331_v1 }
 0x49d   : > { %2045 = vbcast.lane.b32.xlu0 %v2043_v53, 256  ;;  %v6334_v8 = vrot.slane %v2563_v4, %v6312_v54  ;;  %v6360_v24 = vrot.slane %v1331_v1, %v6242_v39  ;;  %v6366_v27 = vrot.slane %v1339_v21, %v6242_v39  ;;  %v6373_v31 = vmul.f32 %v6357_v23, %v6363_v25 }
 0x49e   : > { %9018 = vst [vmem:[#allocation34_spill] sm:$0xff] %v6331_v7  ;;  %v6337_v9 = vrot.slane %v2564_v5, %v6312_v54  ;;  %v6369_v29 = vrot.slane %v1341_v22, %v6242_v39  ;;  %v1340_v38 = vcombine.high %v6319_v62, %v6319_v62  ;;  %v6383_v34 = vrot.slane %v6319_v62, %v6242_v39 }
 0x49f   : > { %2038 = vbcast.lane.b32.xlu1 %v2008_v46, 312  ;;  %9019 = vst [vmem:[#allocation35_spill] sm:$0xff] %v6334_v8  ;;  %9021 = vst [vmem:[#allocation37_spill] sm:$0xff] %v6360_v24  ;;  %v6379_v32 = vmul.f32 %v6360_v24, %v6363_v25  ;;  %v1342_v37 = vcombine.high %v6324_v2, %v6324_v2  ;;  %v6389_v40 = vrot.slane %v6324_v2, %v6242_v39 }
 0x4a0   : > { %9020 = vst [vmem:[#allocation36_spill] sm:$0xff] %v6337_v9  ;;  %9022 = vst [vmem:[#allocation38_spill] sm:$0xff] %v6369_v29  ;;  %v6394_v45 = vmul.f32 %v6366_v27, %v6363_v25  ;;  %v6398_v46 = vmul.f32 %v6369_v29, %v6363_v25  ;;  %v6401_v48 = vrot.slane %v1340_v38, %v6242_v39 }
 0x4a1   : > { %2053 = vbcast.lane.b32.xlu0 %v2043_v53, 272  ;;  %9023 = vst [vmem:[#allocation39_spill] sm:$0xff] %v6383_v34  ;;  %9024 = vst [vmem:[#allocation40_spill] sm:$0xff] %v6389_v40  ;;  %v6405_v49 = vmul.f32 %v6383_v34, %v6363_v25  ;;  %v6408_v50 = vrot.slane %v1342_v37, %v6242_v39  ;;  %v6416_v52 = vmul.f32 %v6389_v40, %v6363_v25 }
 0x4a2   : > { %9025 = vst [vmem:[#allocation41_spill] sm:$0xff] %v6401_v48  ;;  %v6421_v55 = vmul.f32 %v6401_v48, %v6363_v25  ;;  %v6433_v59 = vmul.f32 %v6360_v24, %v6424_v56  ;;  %v6438_v60 = vmul.f32 %v6369_v29, %v6424_v56  ;;  %v6446_v1 = vmul.f32 %v6389_v40, %v6424_v56 }
 0x4a3   : > { %2049 = vbcast.lane.b32.xlu1 %v2043_v53, 264  ;;  %v5294_v33 = vpop.eup %5293  ;;  %9026 = vst [vmem:[#allocation42_spill] sm:$0xff] %v6408_v50  ;;  %v6428_v57 = vmul.f32 %v6408_v50, %v6363_v25  ;;  %v6450_v2 = vmul.f32 %v6357_v23, %v6424_v56  ;;  %v6454_v3 = vmul.f32 %v6408_v50, %v6424_v56 }
 0x4a4   : > { %v1230_v47 = vmul.f32 0.6931472, %v5294_v33  ;;  %9027 = vst [vmem:[#allocation43_spill] sm:$0xff] %v6421_v55  ;;  %9029 = vst [vmem:[#allocation45_spill] sm:$0xff] %v6446_v1  ;;  %v6465_v14 = vmul.f32 %v6366_v27, %v6424_v56  ;;  %v6477_v33 = vrot.slane %v1207_v17, %v6242_v39 }
 0x4a5   : > { %2061 = vbcast.lane.b32.xlu0 %v2043_v53, 288  ;;  %9028 = vst [vmem:[#allocation44_spill] sm:$0xff] %v6428_v57  ;;  %9030 = vst [vmem:[#allocation46_spill] sm:$0xff] %v6454_v3 }
 0x4a6   : > { %9031 = vst [vmem:[#allocation47_spill] sm:$0xff] %v6465_v14 }
 0x4a7   : > { %2057 = vbcast.lane.b32.xlu1 %v2043_v53, 280 }
 0x4a9   : > { %2069 = vbcast.lane.b32.xlu0 %v2043_v53, 304 }
 0x4ab   : > { %2065 = vbcast.lane.b32.xlu1 %v2043_v53, 296 }
 0x4ad   : > { %2080 = vbcast.lane.b32.xlu0 %v2078_v12, 256 }
 0x4af   : > { %2073 = vbcast.lane.b32.xlu1 %v2043_v53, 312  ;;  %v1233_v53 = vsel %vm1219_vm13, %v6342_v11, %v1230_v47 }
 0x4b0   : > { %v1252_v30 = vrot.slane %v1233_v53, %v6312_v54  ;;  %v1245_v62 = vcombine.high %v1233_v53, %v1233_v53 }
 0x4b1   : > { %2088 = vbcast.lane.b32.xlu0 %v2078_v12, 272 }
 0x4b2   : > { %v1260_v63 = vcombine.high %v1252_v30, %v1252_v30  ;;  %v1268_v4 = vrot.slane %v1252_v30, %v6312_v54  ;;  %v1259_v11 = vrot.slane %v1245_v62, %v6312_v54  ;;  %v2495_v30 = vmul.f32 %v1233_v53, %v6282_v26 }
 0x4b3   : > { %2084 = vbcast.lane.b32.xlu1 %v2078_v12, 264  ;;  %v6521_v26 = vrot.slane %v1207_v17, %v6251_v44 }
 0x4b4   : > { %v1290_v18 = vcombine.high %v1268_v4, %v1268_v4  ;;  %v1261_v21 = vcombine.high %v1259_v11, %v1259_v11  ;;  %v6474_v38 = vrot.slane %v1268_v4, %v6242_v39  ;;  %v1275_v62 = vrot.slane %v1259_v11, %v6312_v54 }
 0x4b5   : > { %2096 = vbcast.lane.b32.xlu0 %v2078_v12, 288  ;;  %v2499_v15 = vcombine.high %v2495_v30, %v2495_v30  ;;  %v6504_v11 = vrot.slane %v1207_v17, %v6245_v41 }
 0x4b6   : > { %v1289_v42 = vrot.slane %v1261_v21, %v6312_v54  ;;  %v1291_v10 = vcombine.high %v1275_v62, %v1275_v62  ;;  %v6509_v28 = vrot.slane %v1275_v62, %v6242_v39  ;;  %v9038_v62 = vsub.s32 4, %v6235_v35 }
 0x4b7   : > { %2092 = vbcast.lane.b32.xlu1 %v2078_v12, 280  ;;  %v1423_v50 = vmul.f32 %v6474_v38, %v6363_v25  ;;  %v2513_v1 = vrot.slane %v2499_v15, %v6312_v54 }
 0x4b8   : > { %v6528_v9 = vrot.slane %v1207_v17, %v9038_v62  ;;  %v1293_v3 = vcombine.high %v1289_v42, %v1289_v42  ;;  %v6533_v57 = vrot.slane %v1289_v42, %v6242_v39  ;;  %v9040_v62 = vsub.s32 5, %v6235_v35 }
 0x4b9   : > { %2104 = vbcast.lane.b32.xlu0 %v2078_v12, 304  ;;  %v6548_v42 = vrot.slane %v1291_v10, %v6242_v39  ;;  %v1551_v10 = vmul.f32 1.442695, %v1423_v50 }
 0x4bb   : > { %2100 = vbcast.lane.b32.xlu1 %v2078_v12, 296 }
 0x4bd   : > { %2115 = vbcast.lane.b32.xlu0 %v2113_v16, 256 }
 0x4bf   : > { %2108 = vbcast.lane.b32.xlu1 %v2078_v12, 312  ;;  %v1282_v12 = vrot.slane %v1260_v63, %v6312_v54  ;;  %v6490_v63 = vrot.slane %v1290_v18, %v6242_v39 }
 0x4c1   : > { %2123 = vbcast.lane.b32.xlu0 %v2113_v16, 272  ;;  %v1292_v22 = vcombine.high %v1282_v12, %v1282_v12  ;;  %v6482_v47 = vrot.slane %v1282_v12, %v6242_v39  ;;  %v1439_v15 = vmul.f32 %v6490_v63, %v6363_v25 }
 0x4c3   : > { %2119 = vbcast.lane.b32.xlu1 %v2113_v16, 264  ;;  %v6497_v19 = vrot.slane %v1292_v22, %v6242_v39  ;;  %v6518_v22 = vmul.f32 %v6401_v48, %v6424_v56  ;;  %v6543_v48 = vrot.slane %v1207_v17, %v9040_v62  ;;  %v1431_v40 = vmul.f32 %v6482_v47, %v6363_v25 }
 0x4c4   : > { %v9043_v62 = vsub.s32 6, %v6235_v35 }
 0x4c5   : > { %2131 = vbcast.lane.b32.xlu0 %v2113_v16, 288  ;;  %9037 = vst [vmem:[#allocation53_spill] sm:$0xff] %v6518_v22  ;;  %v2506_v22 = vrot.slane %v2495_v30, %v6312_v54  ;;  %9041 = vst [vmem:[#allocation55_spill] sm:$0xff] %v6543_v48  ;;  %v1447_v50 = vmul.f32 %v6497_v19, %v6363_v25 }
 0x4c6   : > { %v6558_v48 = vrot.slane %v1207_v17, %v9043_v62 }
 0x4c7   : > { %2127 = vbcast.lane.b32.xlu1 %v2113_v16, 280 }
 0x4c8   : > { %9044 = vst [vmem:[#allocation57_spill] sm:$0xff] %v6558_v48  ;;  %v2514_v48 = vcombine.high %v2506_v22, %v2506_v22 }
 0x4c9   : > { %2139 = vbcast.lane.b32.xlu0 %v2113_v16, 304 }
 0x4cb   : > { %2135 = vbcast.lane.b32.xlu1 %v2113_v16, 296 }
 0x4cd   : > { %2150 = vbcast.lane.b32.xlu0 %v2148_v20, 256 }
 0x4cf   : > { %2143 = vbcast.lane.b32.xlu1 %v2113_v16, 312  ;;  %v6469_v16 = vmul.f32 %v6383_v34, %v6424_v56 }
 0x4d1   : > { %2158 = vbcast.lane.b32.xlu0 %v2148_v20, 272  ;;  %9032 = vst [vmem:[#allocation48_spill] sm:$0xff] %v6469_v16 }
 0x4d3   : > { %2154 = vbcast.lane.b32.xlu1 %v2148_v20, 264 }
 0x4d5   : > { %2166 = vbcast.lane.b32.xlu0 %v2148_v20, 288 }
 0x4d7   : > { %2162 = vbcast.lane.b32.xlu1 %v2148_v20, 280 }
 0x4d9   : > { %2174 = vbcast.lane.b32.xlu0 %v2148_v20, 304 }
 0x4db   : > { %2170 = vbcast.lane.b32.xlu1 %v2148_v20, 296 }
 0x4dd   : > { %2185 = vbcast.lane.b32.xlu0 %v2183_v51, 256 }
 0x4df   : > { %v2936_v58 = vpop.permute.xlu0 %2935  ;;  %2178 = vbcast.lane.b32.xlu1 %v2148_v20, 312 }
 0x4e0   : > { %2941 = vst.msk [vmem:[#allocation5] sm:$0xff] %vm874_vm5, %v2936_v58  ;;  %v6486_v58 = vld [vmem:[%s6157_s29 + $0x8] sm:$0xff] }
 0x4e1   : > { %v6440_v61 = vpop.permute.xlu1 %1944  ;;  %2193 = vbcast.lane.b32.xlu0 %v2183_v51, 272  ;;  %v1424_v53 = vmul.f32 %v6474_v38, %v6486_v58  ;;  %v1432_v18 = vmul.f32 %v6482_v47, %v6486_v58  ;;  %v1448_v36 = vmul.f32 %v6497_v19, %v6486_v58  ;;  %v1456_v30 = vmul.f32 %v6509_v28, %v6486_v58 }
 0x4e2   : > { %v1464_v62 = vmul.f32 %v6533_v57, %v6486_v58 }
 0x4e3   : > { %2189 = vbcast.lane.b32.xlu1 %v2183_v51, 264  ;;  %v6442_v0 = vpop.permute.xlu0 %1940  ;;  %v1553_v44 = vmul.f32 1.442695, %v1424_v53  ;;  %v1569_v55 = vmul.f32 1.442695, %v1432_v18  ;;  %v9045_v18 = vsub.s32 7, %v6235_v35 }
 0x4e4   : > { %v1567_v35 = vmul.f32 1.442695, %v1431_v40  ;;  %v1455_v40 = vmul.f32 %v6509_v28, %v6363_v25 }
 0x4e5   : > { %v6457_v5 = vpop.permute.xlu1 %1948  ;;  %2201 = vbcast.lane.b32.xlu0 %v2183_v51, 288  ;;  %5295 = vpow2.f32 %v1553_v44  ;;  %v1472_v44 = vmul.f32 %v6548_v42, %v6486_v58 }
 0x4e6   : > { %5297 = vpow2.f32 %v1569_v55  ;;  %v6585_v55 = vrot.slane %v2513_v1, %v6312_v54 }
 0x4e7   : > { %2197 = vbcast.lane.b32.xlu1 %v2183_v51, 280  ;;  %v6461_v13 = vpop.permute.xlu0 %1956 }
 0x4e9   : > { %v6471_v20 = vpop.permute.xlu1 %1952  ;;  %2209 = vbcast.lane.b32.xlu0 %v2183_v51, 304 }
 0x4eb   : > { %2205 = vbcast.lane.b32.xlu1 %v2183_v51, 296  ;;  %v6479_v37 = vpop.permute.xlu0 %1964 }
 0x4ec   : > { %9033 = vst [vmem:[#allocation49_spill] sm:$0xff] %v6479_v37 }
 0x4ed   : > { %v6492_v4 = vpop.permute.xlu1 %1960  ;;  %2220 = vbcast.lane.b32.xlu0 %v6477_v33, 256 }
 0x4ee   : > { %9034 = vst [vmem:[#allocation50_spill] sm:$0xff] %v6492_v4  ;;  %v6782_v4 = vld [vmem:[%s6157_s29 + $0x30] sm:$0xff] }
 0x4ef   : > { %2213 = vbcast.lane.b32.xlu1 %v2183_v51, 312  ;;  %v6499_v12 = vpop.permute.xlu0 %1975  ;;  %v1440_v51 = vmul.f32 %v6490_v63, %v6486_v58  ;;  %9090 = vst [vmem:[#allocation102_spill] sm:$0xff] %v6782_v4 }
 0x4f0   : > { %9035 = vst [vmem:[#allocation51_spill] sm:$0xff] %v6499_v12 }
 0x4f1   : > { %v6511_v21 = vpop.permute.xlu1 %1968  ;;  %2228 = vbcast.lane.b32.xlu0 %v6477_v33, 272  ;;  %v1585_v53 = vmul.f32 1.442695, %v1440_v51  ;;  %v1601_v51 = vmul.f32 1.442695, %v1448_v36  ;;  %v2522_v36 = vrot.slane %v2506_v22, %v6312_v54 }
 0x4f2   : > { %9036 = vst [vmem:[#allocation52_spill] sm:$0xff] %v6511_v21  ;;  %v1599_v22 = vmul.f32 1.442695, %v1447_v50  ;;  %v2545_v50 = vcombine.high %v6585_v55, %v6585_v55  ;;  %v6646_v21 = vld [vmem:[%s6157_s29 + $0x18] sm:$0xff] }
 0x4f3   : > { %v6535_v7 = vpop.permute.xlu0 %1983  ;;  %2937 = vrot.lane.b32.xlu1 %v1207_v17, %s5861_s26  ;;  %5299 = vpow2.f32 %v1585_v53  ;;  %v1633_v53 = vmul.f32 1.442695, %v1464_v62  ;;  %v1425_v62 = vmul.f32 %v6474_v38, %v6424_v56  ;;  %9056 = vst [vmem:[#allocation68_spill] sm:$0xff] %v6646_v21  ;;  %v1450_v12 = vmul.f32 %v6497_v19, %v6646_v21 }
 0x4f4   : > { %9039 = vst [vmem:[#allocation54_spill] sm:$0xff] %v6535_v7  ;;  %v6562_v7 = vrot.slane %v1207_v17, %v9045_v18  ;;  %v2515_v17 = vcombine.high %v2513_v1, %v2513_v1  ;;  %5301 = vpow2.f32 %v1551_v10  ;;  %v1463_v10 = vmul.f32 %v6533_v57, %v6363_v25 }
 0x4f5   : > { %v6551_v16 = vpop.permute.xlu1 %1979  ;;  %2236 = vbcast.lane.b32.xlu0 %v6477_v33, 288  ;;  %5303 = vpow2.f32 %v1601_v51  ;;  %v1649_v51 = vmul.f32 1.442695, %v1472_v44  ;;  %v6615_v44 = vrot.slane %v2522_v36, %v6242_v39 }
 0x4f6   : > { %9042 = vst [vmem:[#allocation56_spill] sm:$0xff] %v6551_v16  ;;  %9046 = vst [vmem:[#allocation58_spill] sm:$0xff] %v6562_v7  ;;  %v6567_v16 = vrot.slane %v1293_v3, %v6242_v39  ;;  %v1617_v3 = vmul.f32 1.442695, %v1456_v30  ;;  %v1583_v7 = vmul.f32 1.442695, %v1439_v15  ;;  %5305 = vpow2.f32 %v1567_v35 }
 0x4f7   : > { %v6569_v14 = vpop.permute.xlu0 %1991  ;;  %2224 = vbcast.lane.b32.xlu1 %v6477_v33, 264  ;;  %v6598_v1 = vrot.slane %v2515_v17, %v6312_v54  ;;  %v1471_v35 = vmul.f32 %v6548_v42, %v6363_v25 }
 0x4f8   : > { %9047 = vst [vmem:[#allocation59_spill] sm:$0xff] %v6569_v14  ;;  %v1480_v30 = vmul.f32 %v6567_v16, %v6486_v58  ;;  %5307 = vpow2.f32 %v1617_v3  ;;  %v1441_v3 = vmul.f32 %v6490_v63, %v6424_v56 }
 0x4f9   : > { %v6576_v18 = vpop.permute.xlu1 %1987  ;;  %2244 = vbcast.lane.b32.xlu0 %v6477_v33, 304  ;;  %5309 = vpow2.f32 %v1583_v7  ;;  %v1631_v7 = vmul.f32 1.442695, %v1463_v10 }
 0x4fa   : > { %9048 = vst [vmem:[#allocation60_spill] sm:$0xff] %v6576_v18  ;;  %v6593_v18 = vrot.slane %v2514_v48, %v6312_v54  ;;  %v1615_v48 = vmul.f32 1.442695, %v1455_v40  ;;  %5311 = vpow2.f32 %v1633_v53  ;;  %v1665_v17 = vmul.f32 1.442695, %v1480_v30 }
 0x4fb   : > { %v6587_v14 = vpop.permute.xlu0 %1999  ;;  %2232 = vbcast.lane.b32.xlu1 %v6477_v33, 280  ;;  %5313 = vpow2.f32 %v1599_v22  ;;  %v1479_v40 = vmul.f32 %v6567_v16, %v6363_v25  ;;  %v1555_v53 = vmul.f32 1.442695, %v1425_v62  ;;  %v1457_v30 = vmul.f32 %v6509_v28, %v6424_v56 }
 0x4fc   : > { %9049 = vst [vmem:[#allocation61_spill] sm:$0xff] %v6587_v14  ;;  %v2544_v14 = vcombine.high %v2522_v36, %v2522_v36  ;;  %5315 = vpow2.f32 %v1649_v51  ;;  %v2546_v36 = vcombine.high %v6593_v18, %v6593_v18  ;;  %v1647_v22 = vmul.f32 1.442695, %v1471_v35 }
 0x4fd   : > { %v6600_v15 = vpop.permute.xlu1 %1995  ;;  %2255 = vbcast.lane.b32.xlu0 %v6504_v11, 256  ;;  %5317 = vpow2.f32 %v1615_v48  ;;  %v1433_v25 = vmul.f32 %v6482_v47, %v6424_v56  ;;  %v1587_v51 = vmul.f32 1.442695, %v1441_v3  ;;  %v1473_v62 = vmul.f32 %v6548_v42, %v6424_v56 }
 0x4fe   : > { %9050 = vst [vmem:[#allocation62_spill] sm:$0xff] %v6600_v15  ;;  %v6621_v15 = vrot.slane %v6585_v55, %v6242_v39  ;;  %v2547_v55 = vcombine.high %v6598_v1, %v6598_v1  ;;  %5319 = vpow2.f32 %v1665_v17  ;;  %v6641_v48 = vrot.slane %v6593_v18, %v6242_v39 }
 0x4ff   : > { %v6609_v54 = vpop.permute.xlu0 %2010  ;;  %2240 = vbcast.lane.b32.xlu1 %v6477_v33, 296  ;;  %5321 = vpow2.f32 %v1631_v7  ;;  %v1663_v35 = vmul.f32 1.442695, %v1479_v40  ;;  %v1619_v3 = vmul.f32 1.442695, %v1457_v30  ;;  %v1434_v18 = vmul.f32 %v6482_v47, %v6646_v21 }
 0x500   : > { %9051 = vst [vmem:[#allocation63_spill] sm:$0xff] %v6609_v54  ;;  %9052 = vst [vmem:[#allocation64_spill] sm:$0xff] %v6621_v15  ;;  %v5296_v15 = vpop.eup %5295  ;;  %5323 = vpow2.f32 %v1555_v53  ;;  %v6660_v40 = vrot.slane %v6598_v1, %v6242_v39  ;;  %v1651_v30 = vmul.f32 1.442695, %v1473_v62 }
 0x501   : > { %v6623_v54 = vpop.permute.xlu1 %2003  ;;  %2263 = vbcast.lane.b32.xlu0 %v6504_v11, 272  ;;  %9055 = vst [vmem:[#allocation67_spill] sm:$0xff] %v6641_v48  ;;  %5325 = vpow2.f32 %v1647_v22  ;;  %v1571_v48 = vmul.f32 1.442695, %v1433_v25  ;;  %v6675_v22 = vrot.slane %v2546_v36, %v6242_v39  ;;  %v1573_v62 = vmul.f32 1.442695, %v1434_v18 }
 0x502   : > { %9053 = vst [vmem:[#allocation65_spill] sm:$0xff] %v6623_v54  ;;  %v1449_v54 = vmul.f32 %v6497_v19, %v6424_v56  ;;  %9059 = vst [vmem:[#allocation71_spill] sm:$0xff] %v6660_v40  ;;  %5327 = vpow2.f32 %v1587_v51  ;;  %v1466_v36 = vmul.f32 %v6533_v57, %v6646_v21 }
 0x503   : > { %v6634_v10 = vpop.permute.xlu0 %2018  ;;  %2248 = vbcast.lane.b32.xlu1 %v6477_v33, 312  ;;  %v6649_v33 = vrot.slane %v2544_v14, %v6242_v39  ;;  %v1465_v14 = vmul.f32 %v6533_v57, %v6424_v56  ;;  %9063 = vst [vmem:[#allocation75_spill] sm:$0xff] %v6675_v22 }
 0x504   : > { %9054 = vst [vmem:[#allocation66_spill] sm:$0xff] %v6634_v10  ;;  %v5298_v10 = vpop.eup %5297  ;;  %5329 = vpow2.f32 %v1663_v35  ;;  %v1603_v25 = vmul.f32 1.442695, %v1449_v54  ;;  %v6694_v35 = vld [vmem:[%s6157_s29 + $0x20] sm:$0xff]  ;;  %v6711_v54 = vrot.slane %v6334_v8, %v6242_v39 }
 0x505   : > { %9057 = vst [vmem:[#allocation69_spill] sm:$0xff] %v6649_v33  ;;  %v6651_v17 = vpop.permute.xlu1 %2014  ;;  %2271 = vbcast.lane.b32.xlu0 %v6504_v11, 288  ;;  %v6656_v7 = vpop.eup %5299  ;;  %5331 = vpow2.f32 %v1619_v3  ;;  %9067 = vst [vmem:[#allocation79_spill] sm:$0xff] %v6694_v35  ;;  %v6700_v3 = vrot.slane %v6328_v6, %v6242_v39 }
 0x506   : > { %9058 = vst [vmem:[#allocation70_spill] sm:$0xff] %v6651_v17  ;;  %v5302_v33 = vpop.eup %5301  ;;  %v6665_v17 = vrot.slane %v2545_v50, %v6242_v39  ;;  %v1481_v50 = vmul.f32 %v6567_v16, %v6424_v56  ;;  %5333 = vpow2.f32 %v1571_v48  ;;  %v1635_v56 = vmul.f32 1.442695, %v1465_v14  ;;  %9072 = vst [vmem:[#allocation84_spill] sm:$0xff] %v6711_v54 }
 0x507   : > { %v6667_v53 = vpop.permute.xlu0 %2026  ;;  %2259 = vbcast.lane.b32.xlu1 %v6504_v11, 264  ;;  %v6672_v1 = vpop.eup %5303  ;;  %9069 = vst [vmem:[#allocation81_spill] sm:$0xff] %v6700_v3  ;;  %5335 = vpow2.f32 %v1651_v30  ;;  %v1482_v48 = vmul.f32 %v6567_v16, %v6646_v21  ;;  %v1442_v3 = vmul.f32 %v6490_v63, %v6646_v21  ;;  %v1637_v30 = vmul.f32 1.442695, %v1466_v36 }
 0x508   : > { %9060 = vst [vmem:[#allocation72_spill] sm:$0xff] %v6665_v17  ;;  %9061 = vst [vmem:[#allocation73_spill] sm:$0xff] %v6667_v53  ;;  %v5306_v40 = vpop.eup %5305  ;;  %v6680_v17 = vrot.slane %v2547_v55, %v6242_v39  ;;  %v1426_v55 = vmul.f32 %v6474_v38, %v6646_v21  ;;  %5337 = vpow2.f32 %v1603_v25  ;;  %v6726_v25 = vmul.f32 0.0, %v5298_v10 }
 0x509   : > { %9062 = vst [vmem:[#allocation74_spill] sm:$0xff] %v6672_v1  ;;  %v6682_v51 = vpop.permute.xlu1 %2022  ;;  %2279 = vbcast.lane.b32.xlu0 %v6504_v11, 304  ;;  %v6687_v22 = vpop.eup %5307  ;;  %5339 = vpow2.f32 %v1573_v62  ;;  %v1458_v54 = vmul.f32 %v6509_v28, %v6646_v21  ;;  %v1669_v62 = vmul.f32 1.442695, %v1482_v48  ;;  %v1443_v10 = vmul.f32 %v6490_v63, %v6694_v35 }
 0x50a   : > { %9064 = vst [vmem:[#allocation76_spill] sm:$0xff] %v6680_v17  ;;  %9065 = vst [vmem:[#allocation77_spill] sm:$0xff] %v6682_v51  ;;  %v6696_v17 = vpop.eup %5309  ;;  %v1667_v51 = vmul.f32 1.442695, %v1481_v50  ;;  %5341 = vpow2.f32 %v1635_v56  ;;  %v1557_v50 = vmul.f32 1.442695, %v1426_v55  ;;  %v1474_v55 = vmul.f32 %v6548_v42, %v6646_v21 }
 0x50b   : > { %9066 = vst [vmem:[#allocation78_spill] sm:$0xff] %v6687_v22  ;;  %9068 = vst [vmem:[#allocation80_spill] sm:$0xff] %v6696_v17  ;;  %v6702_v18 = vpop.permute.xlu0 %2034  ;;  %2267 = vbcast.lane.b32.xlu1 %v6504_v11, 280  ;;  %v1605_v22 = vmul.f32 1.442695, %v1450_v12  ;;  %v6707_v14 = vpop.eup %5311  ;;  %v6720_v12 = vmul.f32 0.0, %v5296_v15  ;;  %v1483_v17 = vmul.f32 %v6567_v16, %v6694_v35  ;;  %v1461_v21 = vmul.f32 %v6509_v28, %v6782_v4 }
 0x50c   : > { %9070 = vst [vmem:[#allocation82_spill] sm:$0xff] %v6702_v18  ;;  %9071 = vst [vmem:[#allocation83_spill] sm:$0xff] %v6707_v14  ;;  %v6715_v53 = vpop.eup %5313  ;;  %v1427_v14 = vmul.f32 %v6474_v38, %v6694_v35  ;;  %v6735_v15 = vmul.f32 0.0, %v5302_v33  ;;  %v1589_v56 = vmul.f32 1.442695, %v1442_v3  ;;  %v1475_v3 = vmul.f32 %v6548_v42, %v6694_v35 }
 0x50d   : > { %9073 = vst [vmem:[#allocation85_spill] sm:$0xff] %v6715_v53  ;;  %v6717_v18 = vpop.permute.xlu1 %2030  ;;  %2290 = vbcast.lane.b32.xlu0 %v6521_v26, 256  ;;  %v6724_v8 = vpop.eup %5315  ;;  %9076 = vst [vmem:[#allocation88_spill] sm:$0xff] %v6726_v25  ;;  %5343 = vpow2.f32 %v1605_v22  ;;  %v1621_v25 = vmul.f32 1.442695, %v1458_v54 }
 0x50e   : > { %9074 = vst [vmem:[#allocation86_spill] sm:$0xff] %v6717_v18  ;;  %9075 = vst [vmem:[#allocation87_spill] sm:$0xff] %v6724_v8  ;;  %v6730_v18 = vpop.eup %5317  ;;  %5345 = vpow2.f32 %v1667_v51  ;;  %v1459_v8 = vmul.f32 %v6509_v28, %v6694_v35  ;;  %v1559_v22 = vmul.f32 1.442695, %v1427_v14  ;;  %v1435_v51 = vmul.f32 %v6482_v47, %v6694_v35 }
 0x50f   : > { %9077 = vst [vmem:[#allocation89_spill] sm:$0xff] %v6730_v18  ;;  %v6732_v1 = vpop.permute.xlu0 %2045  ;;  %2275 = vbcast.lane.b32.xlu1 %v6504_v11, 296  ;;  %9079 = vst [vmem:[#allocation91_spill] sm:$0xff] %v6735_v15  ;;  %v6739_v36 = vpop.eup %5319  ;;  %5347 = vpow2.f32 %v1637_v30  ;;  %v1591_v14 = vmul.f32 1.442695, %v1443_v10 }
 0x510   : > { %9078 = vst [vmem:[#allocation90_spill] sm:$0xff] %v6732_v1  ;;  %9080 = vst [vmem:[#allocation92_spill] sm:$0xff] %v6739_v36  ;;  %v6746_v1 = vld [vmem:[%s6157_s29 + $0x28] sm:$0xff]  ;;  %v6748_v18 = vpop.eup %5321  ;;  %v6757_v36 = vmul.f32 0.0, %v5306_v40  ;;  %5349 = vpow2.f32 %v1557_v50  ;;  %v1467_v40 = vmul.f32 %v6533_v57, %v6694_v35  ;;  %v1653_v54 = vmul.f32 1.442695, %v1474_v55 }
 0x511   : > { %9081 = vst [vmem:[#allocation93_spill] sm:$0xff] %v6746_v1  ;;  %9082 = vst [vmem:[#allocation94_spill] sm:$0xff] %v6748_v18  ;;  %v6750_v33 = vpop.permute.xlu1 %2038  ;;  %2298 = vbcast.lane.b32.xlu0 %v6521_v26, 272  ;;  %v5324_v48 = vpop.eup %5323  ;;  %v1451_v18 = vmul.f32 %v6497_v19, %v6694_v35  ;;  %5351 = vpow2.f32 %v1669_v62  ;;  %v1428_v30 = vmul.f32 %v6474_v38, %v6746_v1  ;;  %v1575_v62 = vmul.f32 1.442695, %v1435_v51 }
 0x512   : > { %9083 = vst [vmem:[#allocation95_spill] sm:$0xff] %v6750_v33  ;;  %9084 = vst [vmem:[#allocation96_spill] sm:$0xff] %v6757_v36  ;;  %v6761_v53 = vpop.eup %5325  ;;  %5353 = vpow2.f32 %v1589_v56  ;;  %v1623_v36 = vmul.f32 1.442695, %v1459_v8  ;;  %v1655_v10 = vmul.f32 1.442695, %v1475_v3  ;;  %v1460_v55 = vmul.f32 %v6509_v28, %v6746_v1 }
 0x513   : > { %9085 = vst [vmem:[#allocation97_spill] sm:$0xff] %v6761_v53  ;;  %v6763_v33 = vpop.permute.xlu0 %2053  ;;  %2283 = vbcast.lane.b32.xlu1 %v6504_v11, 312  ;;  %v6770_v50 = vpop.eup %5327  ;;  %v1444_v53 = vmul.f32 %v6490_v63, %v6746_v1  ;;  %5355 = vpow2.f32 %v1559_v22  ;;  %v1607_v8 = vmul.f32 1.442695, %v1451_v18  ;;  %v1561_v22 = vmul.f32 1.442695, %v1428_v30 }
 0x514   : > { %9086 = vst [vmem:[#allocation98_spill] sm:$0xff] %v6763_v33  ;;  %9087 = vst [vmem:[#allocation99_spill] sm:$0xff] %v6770_v50  ;;  %v6774_v33 = vpop.eup %5329  ;;  %5357 = vpow2.f32 %v1621_v25  ;;  %v1639_v51 = vmul.f32 1.442695, %v1467_v40  ;;  %v1476_v3 = vmul.f32 %v6548_v42, %v6746_v1  ;;  %v1452_v25 = vmul.f32 %v6497_v19, %v6746_v1 }
 0x515   : > { %9088 = vst [vmem:[#allocation100_spill] sm:$0xff] %v6774_v33  ;;  %v6776_v11 = vpop.permute.xlu1 %2049  ;;  %2306 = vbcast.lane.b32.xlu0 %v6521_v26, 288  ;;  %v6784_v56 = vpop.eup %5331  ;;  %v1436_v33 = vmul.f32 %v6482_v47, %v6746_v1  ;;  %5359 = vpow2.f32 %v1591_v14  ;;  %v1593_v18 = vmul.f32 1.442695, %v1444_v53  ;;  %v1429_v35 = vmul.f32 %v6474_v38, %v6782_v4 }
 0x516   : > { %9089 = vst [vmem:[#allocation101_spill] sm:$0xff] %v6776_v11  ;;  %9091 = vst [vmem:[#allocation103_spill] sm:$0xff] %v6784_v56  ;;  %v5334_v11 = vpop.eup %5333  ;;  %5361 = vpow2.f32 %v1653_v54  ;;  %v1671_v14 = vmul.f32 1.442695, %v1483_v17  ;;  %v1468_v30 = vmul.f32 %v6533_v57, %v6746_v1  ;;  %v1445_v53 = vmul.f32 %v6490_v63, %v6782_v4 }
 0x517   : > { %v6790_v50 = vpop.permute.xlu0 %2061  ;;  %2294 = vbcast.lane.b32.xlu1 %v6521_v26, 264  ;;  %v6795_v56 = vpop.eup %5335  ;;  %5363 = vpow2.f32 %v1623_v36  ;;  %v1625_v54 = vmul.f32 1.442695, %v1460_v55  ;;  %v6817_v17 = vmul.f32 0.0, %v5324_v48  ;;  %v1657_v36 = vmul.f32 1.442695, %v1476_v3 }
 0x518   : > { %9092 = vst [vmem:[#allocation104_spill] sm:$0xff] %v6790_v50  ;;  %9093 = vst [vmem:[#allocation105_spill] sm:$0xff] %v6795_v56  ;;  %v6801_v41 = vpop.eup %5337  ;;  %5365 = vpow2.f32 %v1575_v62  ;;  %v1577_v56 = vmul.f32 1.442695, %v1436_v33  ;;  %v1609_v33 = vmul.f32 1.442695, %v1452_v25  ;;  %v1477_v3 = vmul.f32 %v6548_v42, %v6782_v4 }
 0x519   : > { %9094 = vst [vmem:[#allocation106_spill] sm:$0xff] %v6801_v41  ;;  %v6803_v50 = vpop.permute.xlu1 %2057  ;;  %2314 = vbcast.lane.b32.xlu0 %v6521_v26, 304  ;;  %v5340_v40 = vpop.eup %5339  ;;  %v1484_v41 = vmul.f32 %v6567_v16, %v6746_v1  ;;  %5367 = vpow2.f32 %v1655_v10  ;;  %v1563_v55 = vmul.f32 1.442695, %v1429_v35  ;;  %v1437_v1 = vmul.f32 %v6482_v47, %v6782_v4 }
 0x51a   : > { %9095 = vst [vmem:[#allocation107_spill] sm:$0xff] %v6803_v50  ;;  %v6812_v37 = vpop.eup %5341  ;;  %5369 = vpow2.f32 %v1607_v8  ;;  %v1641_v48 = vmul.f32 1.442695, %v1468_v30  ;;  %v1595_v10 = vmul.f32 1.442695, %v1445_v53  ;;  %v6837_v35 = vmul.f32 0.0, %v5334_v11 }
 0x51b   : > { %9096 = vst [vmem:[#allocation108_spill] sm:$0xff] %v6812_v37  ;;  %v6814_v50 = vpop.permute.xlu0 %2069  ;;  %2302 = vbcast.lane.b32.xlu1 %v6521_v26, 280  ;;  %v6821_v62 = vpop.eup %5343  ;;  %v6826_v37 = vld [vmem:[%s6157_s29 + $0x38] sm:$0xff]  ;;  %5371 = vpow2.f32 %v1561_v22  ;;  %v6839_v25 = vmul.f32 1.442695, %v1484_v41  ;;  %v1469_v11 = vmul.f32 %v6533_v57, %v6782_v4 }
 0x51c   : > { %9097 = vst [vmem:[#allocation109_spill] sm:$0xff] %v6814_v50  ;;  %9098 = vst [vmem:[#allocation110_spill] sm:$0xff] %v6821_v62  ;;  %v6828_v50 = vpop.eup %5345  ;;  %5373 = vpow2.f32 %v1639_v51  ;;  %v6846_v22 = vmul.f32 1.442695, %v1461_v21  ;;  %v1430_v30 = vmul.f32 %v6474_v38, %v6826_v37  ;;  %v1579_v41 = vmul.f32 1.442695, %v1437_v1 }
 0x51d   : > { %9099 = vst [vmem:[#allocation111_spill] sm:$0xff] %v6828_v50  ;;  %v6830_v15 = vpop.permute.xlu1 %2065  ;;  %2325 = vbcast.lane.b32.xlu0 %v6524_v43, 256  ;;  %v6835_v8 = vpop.eup %5347  ;;  %v1453_v50 = vmul.f32 %v6497_v19, %v6782_v4  ;;  %5375 = vpow2.f32 %v1593_v18  ;;  %v1446_v53 = vmul.f32 %v6490_v63, %v6826_v37  ;;  %v6863_v38 = vmul.f32 1.442695, %v1477_v3 }
 0x51e   : > { %9100 = vst [vmem:[#allocation112_spill] sm:$0xff] %v6830_v15  ;;  %9101 = vst [vmem:[#allocation113_spill] sm:$0xff] %v6835_v8  ;;  %v5350_v62 = vpop.eup %5349  ;;  %5377 = vpow2.f32 %v1671_v14  ;;  %v1485_v8 = vmul.f32 %v6567_v16, %v6782_v4  ;;  %v1462_v18 = vmul.f32 %v6509_v28, %v6826_v37  ;;  %v1438_v1 = vmul.f32 %v6482_v47, %v6826_v37 }
 0x51f   : > { %v6843_v15 = vpop.permute.xlu0 %2080  ;;  %2310 = vbcast.lane.b32.xlu1 %v6521_v26, 296  ;;  %v6852_v51 = vpop.eup %5351  ;;  %5379 = vpow2.f32 %v1577_v56  ;;  %v6869_v63 = vmul.f32 0.0, %v5340_v40  ;;  %v1565_v28 = vmul.f32 1.442695, %v1430_v30  ;;  %v6880_v3 = vmul.f32 1.442695, %v1469_v11 }
 0x520   : > { %9102 = vst [vmem:[#allocation114_spill] sm:$0xff] %v6843_v15  ;;  %9103 = vst [vmem:[#allocation115_spill] sm:$0xff] %v6852_v51  ;;  %v6858_v15 = vpop.eup %5353  ;;  %5381 = vpow2.f32 %v1625_v54  ;;  %v6871_v51 = vmul.f32 1.442695, %v1453_v50  ;;  %v1454_v47 = vmul.f32 %v6497_v19, %v6826_v37  ;;  %v6886_v50 = vmul.f32 1.442695, %v1446_v53 }
 0x521   : > { %v6860_v21 = vpop.permute.xlu1 %2073  ;;  %2333 = vbcast.lane.b32.xlu0 %v6524_v43, 272  ;;  %v5356_v14 = vpop.eup %5355  ;;  %5383 = vpow2.f32 %v1657_v36  ;;  %v6888_v54 = vmul.f32 1.442695, %v1485_v8  ;;  %v6897_v36 = vmul.f32 1.442695, %v1462_v18  ;;  %v6903_v8 = vmul.f32 0.0, %v5350_v62 }
 0x522   : > { %9104 = vst [vmem:[#allocation116_spill] sm:$0xff] %v6860_v21  ;;  %v1478_v21 = vmul.f32 %v6548_v42, %v6826_v37  ;;  %v6875_v4 = vpop.eup %5357  ;;  %5385 = vpow2.f32 %v1609_v33  ;;  %v1470_v42 = vmul.f32 %v6533_v57, %v6826_v37  ;;  %v1581_v19 = vmul.f32 1.442695, %v1438_v1 }
 0x523   : > { %v6877_v56 = vpop.permute.xlu0 %2088  ;;  %2318 = vbcast.lane.b32.xlu1 %v6521_v26, 312  ;;  %v6884_v40 = vpop.eup %5359  ;;  %5387 = vpow2.f32 %v1563_v55  ;;  %v1486_v33 = vmul.f32 %v6567_v16, %v6826_v37  ;;  %v1488_v57 = vmul.f32 %v6357_v23, %v6486_v58  ;;  %v6912_v55 = vmul.f32 1.442695, %v1454_v47 }
 0x524   : > { %9105 = vst [vmem:[#allocation117_spill] sm:$0xff] %v6877_v56  ;;  %v6892_v56 = vpop.eup %5361  ;;  %5389 = vpow2.f32 %v1641_v48  ;;  %v6905_v11 = vmul.f32 1.442695, %v1478_v21  ;;  %v6915_v16 = vmul.f32 1.442695, %v6373_v31  ;;  %v1496_v62 = vmul.f32 %v6360_v24, %v6486_v58 }
 0x525   : > { %9106 = vst [vmem:[#allocation118_spill] sm:$0xff] %v6892_v56  ;;  %v6894_v26 = vpop.permute.xlu1 %2084  ;;  %2341 = vbcast.lane.b32.xlu0 %v6524_v43, 288  ;;  %v6901_v30 = vpop.eup %5363  ;;  %5391 = vpow2.f32 %v1579_v41  ;;  %v6921_v21 = vmul.f32 1.442695, %v1470_v42  ;;  %v6924_v18 = vmul.f32 1.442695, %v6379_v32  ;;  %v1504_v1 = vmul.f32 %v6366_v27, %v6486_v58 }
 0x526   : > { %9107 = vst [vmem:[#allocation119_spill] sm:$0xff] %v6894_v26  ;;  %v5366_v53 = vpop.eup %5365  ;;  %5393 = vpow2.f32 %v1595_v10  ;;  %v2678_v31 = vmul.f32 %v6615_v44, %v6440_v61  ;;  %v6936_v10 = vmul.f32 1.442695, %v1486_v33  ;;  %v1512_v32 = vmul.f32 %v6369_v29, %v6486_v58 }
 0x527   : > { %v6909_v56 = vpop.permute.xlu0 %2096  ;;  %2329 = vbcast.lane.b32.xlu1 %v6524_v43, 264  ;;  %v6919_v48 = vpop.eup %5367  ;;  %5395 = vpow2.f32 %v6839_v25  ;;  %v6943_v26 = vmul.f32 1.442695, %v1488_v57  ;;  %v1520_v61 = vmul.f32 %v6383_v34, %v6486_v58  ;;  %v2995_v25 = vmul.f32 0.0, %v5356_v14 }
 0x528   : > { %9108 = vst [vmem:[#allocation120_spill] sm:$0xff] %v6909_v56  ;;  %9109 = vst [vmem:[#allocation121_spill] sm:$0xff] %v6919_v48  ;;  %v6928_v41 = vpop.eup %5369  ;;  %5397 = vpow2.f32 %v1565_v28  ;;  %v6941_v48 = vmul.f32 1.442695, %v6394_v45  ;;  %v6954_v33 = vmul.f32 1.442695, %v6398_v46  ;;  %v6974_v46 = vadd.f32 %v6720_v12, %v2678_v31 }
 0x529   : > { %v6932_v47 = vpop.permute.xlu1 %2092  ;;  %2349 = vbcast.lane.b32.xlu0 %v6524_v43, 304  ;;  %v5372_v42 = vpop.eup %5371  ;;  %5399 = vpow2.f32 %v6846_v22  ;;  %v6956_v28 = vmul.f32 1.442695, %v1496_v62  ;;  %v6960_v57 = vmul.f32 0.0, %v5366_v53  ;;  %v6964_v58 = vmul.f32 1.442695, %v6405_v49 }
 0x52a   : > { %9110 = vst [vmem:[#allocation122_spill] sm:$0xff] %v6932_v47  ;;  %v6947_v47 = vpop.eup %5373  ;;  %5401 = vpow2.f32 %v6863_v38  ;;  %9115 = vst [vmem:[#allocation127_spill] sm:$0xff] %v6974_v46  ;;  %v6978_v22 = vmul.f32 1.442695, %v6416_v52  ;;  %v6980_v38 = vmul.f32 1.442695, %v1512_v32  ;;  %v2677_v53 = vmul.f32 %v6615_v44, %v6442_v0 }
 0x52b   : > { %9111 = vst [vmem:[#allocation123_spill] sm:$0xff] %v6947_v47  ;;  %v6949_v56 = vpop.permute.xlu0 %2104  ;;  %2337 = vbcast.lane.b32.xlu1 %v6524_v43, 280  ;;  %v6958_v45 = vpop.eup %5375  ;;  %5403 = vpow2.f32 %v6871_v51  ;;  %v2679_v62 = vmul.f32 %v6615_v44, %v6457_v5  ;;  %v2681_v51 = vmul.f32 %v6615_v44, %v6461_v13  ;;  %v6996_v31 = vmul.f32 0.0, %v5372_v42 }
 0x52c   : > { %9112 = vst [vmem:[#allocation124_spill] sm:$0xff] %v6949_v56  ;;  %v6966_v56 = vmul.f32 1.442695, %v1504_v1  ;;  %v6968_v47 = vpop.eup %5377  ;;  %9116 = vst [vmem:[#allocation128_spill] sm:$0xff] %v6978_v22  ;;  %5405 = vpow2.f32 %v6880_v3  ;;  %v6987_v1 = vmul.f32 1.442695, %v1520_v61  ;;  %v9119_v3 = vcombine.high %v6328_v6, %v6328_v6 }
 0x52d   : > { %9113 = vst [vmem:[#allocation125_spill] sm:$0xff] %v6968_v47  ;;  %v6970_v14 = vpop.permute.xlu1 %2100  ;;  %2360 = vbcast.lane.b32.xlu0 %v6528_v9, 256  ;;  %v5380_v49 = vpop.eup %5379  ;;  %5407 = vpow2.f32 %v1581_v19  ;;  %v6999_v0 = vmul.f32 1.442695, %v6433_v59  ;;  %v3055_v61 = vld [vmem:[#allocation5] sm:$0x3]  ;;  %v2680_v59 = vmul.f32 %v6615_v44, %v6471_v20  ;;  %v7034_v20 = vadd.f32 %v6817_v17, %v2679_v62 }
 0x52e   : > { %9114 = vst [vmem:[#allocation126_spill] sm:$0xff] %v6970_v14  ;;  %9117 = vst [vmem:[#allocation129_spill] sm:$0xff] %v6987_v1  ;;  %v6989_v12 = vpop.eup %5381  ;;  %v7007_v32 = vrot.slane %v9119_v3, %v6242_v39  ;;  %5409 = vpow2.f32 %v6886_v50  ;;  %v7011_v13 = vmul.f32 1.442695, %v6438_v60  ;;  %v7014_v42 = vmul.f32 1.442695, %v6450_v2 }
 0x52f   : > { %v6993_v52 = vpop.permute.xlu0 %2115  ;;  %2345 = vbcast.lane.b32.xlu1 %v6524_v43, 296  ;;  %v7001_v5 = vpop.eup %5383  ;;  %v3272_v6 = vld [vmem:[#allocation5 + $0x2] sm:$0x3]  ;;  %v3488_v3 = vld [vmem:[#allocation5 + $0x4] sm:$0x3]  ;;  %v7025_v50 = vmul.f32 %v6656_v7, %v6974_v46  ;;  %v7027_v60 = vmul.f32 0.0, %v5380_v49  ;;  %5411 = vpow2.f32 %v6888_v54  ;;  %v7047_v54 = vrot.slane %v3055_v61, %v6242_v39 }
 0x530   : > { %9118 = vst [vmem:[#allocation130_spill] sm:$0xff] %v7001_v5  ;;  %9120 = vst [vmem:[#allocation131_spill] sm:$0xff] %v7007_v32  ;;  %v7016_v19 = vpop.eup %5385  ;;  %v9122_v32 = vld [vmem:[#allocation91_spill] sm:$0xff]  ;;  %5413 = vpow2.f32 %v6897_v36  ;;  %v9125_v47 = vld [vmem:[#allocation68_spill] sm:$0xff]  ;;  %v7052_v62 = vadd.f32 %v2995_v25, %v2681_v51  ;;  %v7072_v25 = vadd.f32 %v6903_v8, %v2680_v59 }
 0x531   : > { %v7020_v22 = vpop.permute.xlu1 %2108  ;;  %2368 = vbcast.lane.b32.xlu0 %v6528_v9, 272  ;;  %v5388_v2 = vpop.eup %5387  ;;  %v7031_v1 = vadd.f32 %v9122_v32, %v2677_v53  ;;  %9124 = vst [vmem:[#allocation133_spill] sm:$0xff] %v7034_v20  ;;  %v1490_v5 = vmul.f32 %v6357_v23, %v9125_v47  ;;  %v9127_v7 = vld [vmem:[#allocation49_spill] sm:$0xff]  ;;  %9129 = vst [vmem:[#allocation134_spill] sm:$0xff] %v7047_v54  ;;  %v9130_v53 = vld [vmem:[#allocation30_spill] sm:$0xff]  ;;  %v7055_v32 = vrot.slane %v3272_v6, %v6242_v39 }
 0x532   : > { %9121 = vst [vmem:[#allocation132_spill] sm:$0xff] %v7020_v22  ;;  %v7039_v22 = vpop.eup %5389  ;;  %v2683_v49 = vmul.f32 %v6615_v44, %v9127_v7  ;;  %v7050_v17 = vrot.slane %v3055_v61, %v9130_v53  ;;  %9132 = vst [vmem:[#allocation136_spill] sm:$0xff] %v7052_v62  ;;  %v7061_v7 = vrot.slane %v3488_v3, %v6242_v39  ;;  %v9137_v54 = vld [vmem:[#allocation50_spill] sm:$0xff]  ;;  %v2997_v51 = vmul.f32 0.0, %v5388_v2  ;;  %v9141_v39 = vld [vmem:[#allocation51_spill] sm:$0xff] }
 0x533   : > { %9123 = vst [vmem:[#allocation91_spill] sm:$0xff] %v7031_v1  ;;  %9126 = vst [vmem:[#allocation68_spill] sm:$0xff] %v7039_v22  ;;  %v7043_v46 = vpop.permute.xlu0 %2123  ;;  %2353 = vbcast.lane.b32.xlu1 %v6524_v43, 312  ;;  %v5392_v36 = vpop.eup %5391  ;;  %v7058_v22 = vrot.slane %v3272_v6, %v9130_v53  ;;  %v7064_v43 = vrot.slane %v3488_v3, %v9130_v53  ;;  %v2682_v61 = vmul.f32 %v6615_v44, %v9137_v54  ;;  %v9143_v53 = vld [vmem:[#allocation80_spill] sm:$0xff]  ;;  %v9144_v54 = vld [vmem:[#allocation99_spill] sm:$0xff] }
 0x534   : > { %9128 = vst [vmem:[#allocation49_spill] sm:$0xff] %v7043_v46  ;;  %9131 = vst [vmem:[#allocation135_spill] sm:$0xff] %v7050_v17  ;;  %v5394_v46 = vpop.eup %5393  ;;  %5415 = vpow2.f32 %v6905_v11  ;;  %v7093_v11 = vmul.f32 %v6884_v40, %v7052_v62  ;;  %v7097_v2 = vmul.f32 0.0, %v5392_v36  ;;  %v1506_v40 = vmul.f32 %v6366_v27, %v9125_v47  ;;  %v9152_v36 = vld [vmem:[#allocation54_spill] sm:$0xff] }
 0x535   : > { %9133 = vst [vmem:[#allocation137_spill] sm:$0xff] %v7055_v32  ;;  %9134 = vst [vmem:[#allocation138_spill] sm:$0xff] %v7058_v22  ;;  %v7068_v17 = vpop.permute.xlu1 %2119  ;;  %2376 = vbcast.lane.b32.xlu0 %v6528_v9, 288  ;;  %v7075_v6 = vpop.eup %5395  ;;  %v7085_v22 = vmul.f32 %v9144_v54, %v7034_v20  ;;  %5417 = vpow2.f32 %v6912_v55  ;;  %v9147_v54 = vld [vmem:[#allocation52_spill] sm:$0xff]  ;;  %v9148_v20 = vld [vmem:[#allocation47_spill] sm:$0xff] }
 0x536   : > { %9135 = vst [vmem:[#allocation139_spill] sm:$0xff] %v7061_v7  ;;  %9136 = vst [vmem:[#allocation140_spill] sm:$0xff] %v7064_v43  ;;  %v9142_v7 = vld [vmem:[#allocation67_spill] sm:$0xff]  ;;  %v7081_v43 = vmul.f32 %v9143_v53, %v7031_v1  ;;  %v5398_v8 = vpop.eup %5397  ;;  %5419 = vpow2.f32 %v6915_v16  ;;  %v2684_v55 = vmul.f32 %v6615_v44, %v9147_v54  ;;  %v7106_v1 = vmul.f32 1.442695, %v9148_v20  ;;  %v9153_v54 = vld [vmem:[#allocation96_spill] sm:$0xff] }
 0x537   : > { %9138 = vst [vmem:[#allocation50_spill] sm:$0xff] %v7068_v17  ;;  %9139 = vst [vmem:[#allocation141_spill] sm:$0xff] %v7072_v25  ;;  %v2685_v3 = vmul.f32 %v9142_v7, %v9141_v39  ;;  %v7088_v59 = vpop.permute.xlu0 %2131  ;;  %2364 = vbcast.lane.b32.xlu1 %v6528_v9, 264  ;;  %v7095_v39 = vadd.f32 %v2997_v51, %v2683_v49  ;;  %v7100_v53 = vpop.eup %5399  ;;  %5421 = vpow2.f32 %v6921_v21  ;;  %v2998_v32 = vmul.f32 0.0, %v5398_v8  ;;  %v9178_v17 = vld [vmem:[#allocation106_spill] sm:$0xff] }
 0x538   : > { %9140 = vst [vmem:[#allocation142_spill] sm:$0xff] %v7075_v6  ;;  %9145 = vst [vmem:[#allocation51_spill] sm:$0xff] %v7088_v59  ;;  %v7110_v62 = vpop.eup %5401  ;;  %v7117_v16 = vmul.f32 %v6858_v15, %v7072_v25  ;;  %v7120_v44 = vadd.f32 %v6996_v31, %v2682_v61  ;;  %5423 = vpow2.f32 %v6924_v18  ;;  %v1522_v21 = vmul.f32 %v6383_v34, %v9125_v47  ;;  %v9157_v61 = vld [vmem:[#allocation48_spill] sm:$0xff] }
 0x539   : > { %9146 = vst [vmem:[#allocation67_spill] sm:$0xff] %v7095_v39  ;;  %9149 = vst [vmem:[#allocation80_spill] sm:$0xff] %v7110_v62  ;;  %v7112_v49 = vpop.permute.xlu1 %2127  ;;  %2384 = vbcast.lane.b32.xlu0 %v6528_v9, 304  ;;  %v7125_v20 = vpop.eup %5403  ;;  %v2687_v51 = vmul.f32 %v9142_v7, %v9152_v36  ;;  %v7130_v6 = vadd.f32 %v9153_v54, %v2685_v3  ;;  %v7140_v18 = vmul.f32 %v5394_v46, %v7095_v39  ;;  %v9160_v39 = vld [vmem:[#allocation59_spill] sm:$0xff] }
 0x53a   : > { %9150 = vst [vmem:[#allocation99_spill] sm:$0xff] %v7112_v49  ;;  %9151 = vst [vmem:[#allocation52_spill] sm:$0xff] %v7120_v44  ;;  %v7132_v49 = vmul.f32 1.442695, %v1490_v5  ;;  %v7134_v15 = vpop.eup %5405  ;;  %5425 = vpow2.f32 %v6936_v10  ;;  %v7144_v25 = vmul.f32 1.442695, %v9157_v61  ;;  %v1498_v3 = vmul.f32 %v6360_v24, %v9125_v47 }
 0x53b   : > { %9154 = vst [vmem:[#allocation47_spill] sm:$0xff] %v7130_v6  ;;  %9155 = vst [vmem:[#allocation54_spill] sm:$0xff] %v7134_v15  ;;  %v7136_v31 = vpop.permute.xlu0 %2139  ;;  %2372 = vbcast.lane.b32.xlu1 %v6528_v9, 280  ;;  %v5408_v8 = vpop.eup %5407  ;;  %v9158_v5 = vld [vmem:[#allocation56_spill] sm:$0xff]  ;;  %v7150_v54 = vadd.f32 %v2998_v32, %v2684_v55  ;;  %5427 = vpow2.f32 %v6941_v48  ;;  %v2689_v10 = vmul.f32 %v9142_v7, %v9160_v39  ;;  %v9162_v61 = vld [vmem:[#allocation55_spill] sm:$0xff] }
 0x53c   : > { %9156 = vst [vmem:[#allocation96_spill] sm:$0xff] %v7136_v31  ;;  %v2686_v36 = vmul.f32 %v9142_v7, %v9158_v5  ;;  %v7153_v31 = vmul.f32 1.442695, %v1506_v40  ;;  %v5410_v46 = vpop.eup %5409  ;;  %v7162_v62 = vmul.f32 %v6958_v45, %v7120_v44  ;;  %5429 = vpow2.f32 %v6943_v26  ;;  %v9165_v48 = vld [vmem:[#allocation60_spill] sm:$0xff]  ;;  %v9166_v5 = vld [vmem:[#allocation85_spill] sm:$0xff]  ;;  %v9189_v15 = vld [vmem:[#allocation110_spill] sm:$0xff] }
 0x53d   : > { %9159 = vst [vmem:[#allocation48_spill] sm:$0xff] %v7150_v54  ;;  %v7157_v59 = vpop.permute.xlu1 %2135  ;;  %2395 = vbcast.lane.b32.xlu0 %v9162_v61, 256  ;;  %v7165_v32 = vmul.f32 1.442695, %v1522_v21  ;;  %v7167_v55 = vpop.eup %5411  ;;  %v2688_v40 = vmul.f32 %v9142_v7, %v9165_v48  ;;  %v7173_v39 = vmul.f32 %v9166_v5, %v7130_v6  ;;  %5431 = vpow2.f32 %v6954_v33  ;;  %v9168_v5 = vld [vmem:[#allocation61_spill] sm:$0xff] }
 0x53e   : > { %9161 = vst [vmem:[#allocation56_spill] sm:$0xff] %v7157_v59  ;;  %9164 = vst [vmem:[#allocation55_spill] sm:$0xff] %v7167_v55  ;;  %v7176_v59 = vadd.f32 %v6837_v35, %v2687_v51  ;;  %v7179_v45 = vpop.eup %5413  ;;  %v3006_v26 = vmul.f32 0.0, %v5408_v8  ;;  %5433 = vpow2.f32 %v6956_v28  ;;  %v7185_v21 = vmul.f32 1.442695, %v1498_v3  ;;  %v9169_v51 = vld [vmem:[#allocation88_spill] sm:$0xff] }
 0x53f   : > { %9163 = vst [vmem:[#allocation59_spill] sm:$0xff] %v7165_v32  ;;  %v7181_v44 = vpop.permute.xlu0 %2150  ;;  %2380 = vbcast.lane.b32.xlu1 %v6528_v9, 296  ;;  %v1514_v48 = vmul.f32 %v6369_v29, %v9125_v47  ;;  %v2691_v35 = vmul.f32 %v9142_v7, %v9168_v5  ;;  %v7192_v6 = vadd.f32 %v9169_v51, %v2686_v36  ;;  %v9171_v32 = vld [vmem:[#allocation79_spill] sm:$0xff]  ;;  %v9172_v8 = vld [vmem:[#allocation62_spill] sm:$0xff]  ;;  %5435 = vpow2.f32 %v6964_v58  ;;  %v9177_v51 = vld [vmem:[#allocation69_spill] sm:$0xff] }
 0x540   : > { %9167 = vst [vmem:[#allocation60_spill] sm:$0xff] %v7176_v59  ;;  %v7195_v33 = vmul.f32 %v5410_v46, %v7150_v54  ;;  %v1491_v55 = vmul.f32 %v6357_v23, %v9171_v32  ;;  %v2690_v28 = vmul.f32 %v9142_v7, %v9172_v8  ;;  %v7205_v47 = vadd.f32 %v6960_v57, %v2689_v10  ;;  %v9176_v5 = vld [vmem:[#allocation63_spill] sm:$0xff]  ;;  %v9180_v10 = vld [vmem:[#allocation65_spill] sm:$0xff] }
 0x541   : > { %9170 = vst [vmem:[#allocation85_spill] sm:$0xff] %v7192_v6  ;;  %v7201_v3 = vpop.permute.xlu1 %2143  ;;  %2403 = vbcast.lane.b32.xlu0 %v9162_v61, 272  ;;  %v1507_v36 = vmul.f32 %v6366_v27, %v9171_v32  ;;  %v7210_v46 = vpop.eup %5415  ;;  %v2693_v54 = vmul.f32 %v9177_v51, %v9176_v5  ;;  %v7216_v8 = vmul.f32 %v9178_v17, %v7176_v59  ;;  %5437 = vpow2.f32 %v6966_v56 }
 0x542   : > { %9173 = vst [vmem:[#allocation61_spill] sm:$0xff] %v7201_v3  ;;  %9174 = vst [vmem:[#allocation88_spill] sm:$0xff] %v7205_v47  ;;  %v7219_v3 = vadd.f32 %v6869_v63, %v2688_v40  ;;  %v5418_v57 = vpop.eup %5417  ;;  %v2692_v58 = vmul.f32 %v9142_v7, %v9180_v10  ;;  %5439 = vpow2.f32 %v6980_v38  ;;  %v7228_v5 = vmul.f32 1.442695, %v1514_v48  ;;  %v9181_v63 = vld [vmem:[#allocation74_spill] sm:$0xff]  ;;  %v9184_v10 = vld [vmem:[#allocation57_spill] sm:$0xff] }
 0x543   : > { %9175 = vst [vmem:[#allocation79_spill] sm:$0xff] %v7210_v46  ;;  %v7224_v14 = vpop.permute.xlu0 %2158  ;;  %2388 = vbcast.lane.b32.xlu1 %v6528_v9, 312  ;;  %v1523_v17 = vmul.f32 %v6383_v34, %v9171_v32  ;;  %v7232_v59 = vpop.eup %5419  ;;  %v7236_v56 = vmul.f32 %v9181_v63, %v7192_v6  ;;  %v7239_v40 = vadd.f32 %v7097_v2, %v2691_v35  ;;  %v7241_v7 = vmul.f32 1.442695, %v1491_v55  ;;  %v9187_v6 = vld [vmem:[#allocation66_spill] sm:$0xff] }
 0x544   : > { %9179 = vst [vmem:[#allocation62_spill] sm:$0xff] %v7219_v3  ;;  %v1499_v9 = vmul.f32 %v6360_v24, %v9171_v32  ;;  %v7245_v38 = vpop.eup %5421  ;;  %v7252_v34 = vmul.f32 %v6928_v41, %v7205_v47  ;;  %v7255_v63 = vadd.f32 %v7027_v60, %v2690_v28  ;;  %v7257_v2 = vmul.f32 1.442695, %v1507_v36  ;;  %v9190_v60 = vld [vmem:[#allocation70_spill] sm:$0xff] }
 0x545   : > { %9182 = vst [vmem:[#allocation63_spill] sm:$0xff] %v7239_v40  ;;  %9183 = vst [vmem:[#allocation69_spill] sm:$0xff] %v7245_v38  ;;  %v7247_v48 = vpop.permute.xlu1 %2154  ;;  %2430 = vbcast.lane.b32.xlu0 %v9184_v10, 256  ;;  %v1515_v55 = vmul.f32 %v6369_v29, %v9171_v32  ;;  %v7261_v35 = vpop.eup %5423  ;;  %v2695_v38 = vmul.f32 %v9177_v51, %v9187_v6  ;;  %v7266_v46 = vadd.f32 %v7081_v43, %v2693_v54  ;;  %v9193_v6 = vld [vmem:[#allocation93_spill] sm:$0xff] }
 0x546   : > { %9185 = vst [vmem:[#allocation106_spill] sm:$0xff] %v7255_v63  ;;  %9186 = vst [vmem:[#allocation65_spill] sm:$0xff] %v7261_v35  ;;  %v7270_v41 = vmul.f32 %v9189_v15, %v7219_v3  ;;  %5441 = vpow2.f32 %v6999_v0  ;;  %v2694_v28 = vmul.f32 %v9177_v51, %v9190_v60  ;;  %v7278_v32 = vadd.f32 %v3006_v26, %v2692_v58  ;;  %v9195_v15 = vld [vmem:[#allocation73_spill] sm:$0xff] }
 0x547   : > { %9188 = vst [vmem:[#allocation74_spill] sm:$0xff] %v7266_v46  ;;  %v7275_v36 = vpop.permute.xlu0 %2166  ;;  %2399 = vbcast.lane.b32.xlu1 %v9162_v61, 264  ;;  %v7280_v47 = vmul.f32 1.442695, %v1523_v17  ;;  %v1492_v43 = vmul.f32 %v6357_v23, %v9193_v6  ;;  %v7284_v54 = vpop.eup %5425  ;;  %v2697_v3 = vmul.f32 %v9177_v51, %v9195_v15  ;;  %v7290_v0 = vmul.f32 %v7125_v20, %v7239_v40  ;;  %v9197_v17 = vld [vmem:[#allocation58_spill] sm:$0xff] }
 0x548   : > { %9191 = vst [vmem:[#allocation57_spill] sm:$0xff] %v7278_v32  ;;  %9194 = vst [vmem:[#allocation110_spill] sm:$0xff] %v7284_v54  ;;  %5443 = vpow2.f32 %v7011_v13  ;;  %v7293_v60 = vmul.f32 1.442695, %v1499_v9  ;;  %v7295_v26 = vpop.eup %5427  ;;  %v7302_v54 = vmul.f32 %v7016_v19, %v7255_v63  ;;  %v7305_v15 = vmul.f32 1.442695, %v1515_v55 }
 0x549   : > { %9192 = vst [vmem:[#allocation66_spill] sm:$0xff] %v7280_v47  ;;  %v7297_v58 = vpop.permute.xlu1 %2162  ;;  %2465 = vbcast.lane.b32.xlu0 %v9197_v17, 256  ;;  %5445 = vpow2.f32 %v7014_v42  ;;  %v1508_v20 = vmul.f32 %v6366_v27, %v9193_v6  ;;  %v7309_v13 = vpop.eup %5429  ;;  %v9199_v9 = vld [vmem:[#allocation77_spill] sm:$0xff]  ;;  %v9203_v19 = vld [vmem:[#allocation82_spill] sm:$0xff] }
 0x54a   : > { %9196 = vst [vmem:[#allocation70_spill] sm:$0xff] %v7297_v58  ;;  %9198 = vst [vmem:[#allocation93_spill] sm:$0xff] %v7309_v13  ;;  %v2696_v40 = vmul.f32 %v9177_v51, %v9199_v9  ;;  %v9200_v47 = vld [vmem:[#allocation89_spill] sm:$0xff]  ;;  %v7318_v58 = vadd.f32 %v7085_v22, %v2695_v38  ;;  %5447 = vpow2.f32 %v7106_v1  ;;  %v7321_v42 = vpop.eup %5431  ;;  %v2699_v55 = vmul.f32 %v9177_v51, %v9203_v19  ;;  %v9207_v1 = vld [vmem:[#allocation86_spill] sm:$0xff] }
 0x54b   : > { %v7315_v35 = vmul.f32 %v9200_v47, %v7266_v46  ;;  %9202 = vst [vmem:[#allocation58_spill] sm:$0xff] %v7321_v42  ;;  %v7325_v63 = vpop.permute.xlu0 %2174  ;;  %2407 = vbcast.lane.b32.xlu1 %v9162_v61, 280  ;;  %v7329_v9 = vadd.f32 %v7025_v50, %v2694_v28  ;;  %v7332_v47 = vmul.f32 %v5418_v57, %v7278_v32  ;;  %v7334_v46 = vmul.f32 1.442695, %v1492_v43  ;;  %v7336_v22 = vpop.eup %5433  ;;  %v9209_v50 = vld [vmem:[#allocation90_spill] sm:$0xff]  ;;  %v9210_v28 = vld [vmem:[#allocation75_spill] sm:$0xff] }
 0x54c   : > { %9201 = vst [vmem:[#allocation73_spill] sm:$0xff] %v7318_v58  ;;  %9206 = vst [vmem:[#allocation82_spill] sm:$0xff] %v7336_v22  ;;  %v2698_v38 = vmul.f32 %v9177_v51, %v9207_v1  ;;  %v7341_v42 = vadd.f32 %v7093_v11, %v2697_v3  ;;  %5449 = vpow2.f32 %v7132_v49  ;;  %v1500_v19 = vmul.f32 %v6360_v24, %v9193_v6  ;;  %v7356_v3 = vpop.eup %5435  ;;  %v9212_v49 = vld [vmem:[#allocation103_spill] sm:$0xff] }
 0x54d   : > { %9204 = vst [vmem:[#allocation77_spill] sm:$0xff] %v7329_v9  ;;  %9205 = vst [vmem:[#allocation89_spill] sm:$0xff] %v7332_v47  ;;  %v2701_v13 = vmul.f32 %v9210_v28, %v9209_v50  ;;  %v7348_v57 = vpop.permute.xlu1 %2170  ;;  %2411 = vbcast.lane.b32.xlu0 %v9162_v61, 288  ;;  %5451 = vpow2.f32 %v7144_v25  ;;  %v7352_v43 = vmul.f32 1.442695, %v1508_v20  ;;  %v1516_v11 = vmul.f32 %v6369_v29, %v9193_v6  ;;  %v9214_v50 = vld [vmem:[#allocation102_spill] sm:$0xff] }
 0x54e   : > { %9208 = vst [vmem:[#allocation86_spill] sm:$0xff] %v7341_v42  ;;  %9211 = vst [vmem:[#allocation90_spill] sm:$0xff] %v7356_v3  ;;  %v7360_v1 = vmul.f32 %v9212_v49, %v7318_v58  ;;  %v7363_v32 = vadd.f32 %v7117_v16, %v2696_v40  ;;  %5453 = vpow2.f32 %v7153_v31  ;;  %v1493_v47 = vmul.f32 %v6357_v23, %v9214_v50  ;;  %v7368_v25 = vpop.eup %5437  ;;  %v9215_v20 = vld [vmem:[#allocation95_spill] sm:$0xff]  ;;  %v9216_v49 = vld [vmem:[#allocation78_spill] sm:$0xff] }
 0x54f   : > { %v2700_v22 = vmul.f32 %v9177_v51, %v9215_v20  ;;  %v7372_v6 = vpop.permute.xlu0 %2185  ;;  %2434 = vbcast.lane.b32.xlu1 %v9184_v10, 264  ;;  %v7377_v58 = vmul.f32 %v9216_v49, %v7329_v9  ;;  %v7380_v16 = vadd.f32 %v7140_v18, %v2699_v55  ;;  %5455 = vpow2.f32 %v7185_v21  ;;  %v7383_v31 = vpop.eup %5439  ;;  %v9220_v9 = vld [vmem:[#allocation98_spill] sm:$0xff] }
 0x550   : > { %9213 = vst [vmem:[#allocation75_spill] sm:$0xff] %v7363_v32  ;;  %9218 = vst [vmem:[#allocation102_spill] sm:$0xff] %v7383_v31  ;;  %v7387_v40 = vmul.f32 %v6901_v30, %v7341_v42  ;;  %v7390_v51 = vadd.f32 %v7162_v62, %v2698_v38  ;;  %v7392_v20 = vmul.f32 1.442695, %v1500_v19  ;;  %v1509_v49 = vmul.f32 %v6366_v27, %v9214_v50  ;;  %v9223_v62 = vld [vmem:[#allocation114_spill] sm:$0xff]  ;;  %v9224_v38 = vld [vmem:[#allocation64_spill] sm:$0xff] }
 0x551   : > { %9217 = vst [vmem:[#allocation103_spill] sm:$0xff] %v7380_v16  ;;  %v2703_v18 = vmul.f32 %v9210_v28, %v9220_v9  ;;  %v7398_v55 = vpop.permute.xlu1 %2178  ;;  %2473 = vbcast.lane.b32.xlu0 %v9197_v17, 272  ;;  %v7402_v21 = vadd.f32 %v7173_v39, %v2701_v13  ;;  %5457 = vpow2.f32 %v7228_v5  ;;  %v7405_v30 = vmul.f32 1.442695, %v1516_v11  ;;  %v9225_v31 = vld [vmem:[#allocation101_spill] sm:$0xff] }
 0x552   : > { %9219 = vst [vmem:[#allocation95_spill] sm:$0xff] %v7390_v51  ;;  %v2709_v19 = vmul.f32 %v9224_v38, %v9223_v62  ;;  %v7411_v42 = vmul.f32 %v6875_v4, %v7363_v32  ;;  %5459 = vpow2.f32 %v7241_v7  ;;  %v7414_v9 = vmul.f32 1.442695, %v1493_v47  ;;  %v9227_v47 = vld [vmem:[#allocation104_spill] sm:$0xff] }
 0x553   : > { %9221 = vst [vmem:[#allocation78_spill] sm:$0xff] %v7402_v21  ;;  %9222 = vst [vmem:[#allocation98_spill] sm:$0xff] %v7405_v30  ;;  %v7416_v3 = vpop.eup %5441  ;;  %v2702_v39 = vmul.f32 %v9210_v28, %v9225_v31  ;;  %v7420_v13 = vpop.permute.xlu0 %2193  ;;  %2469 = vbcast.lane.b32.xlu1 %v9197_v17, 264  ;;  %v7425_v5 = vmul.f32 %v7100_v53, %v7380_v16  ;;  %v7428_v4 = vadd.f32 %v7195_v33, %v2700_v22  ;;  %v9229_v53 = vld [vmem:[#allocation107_spill] sm:$0xff]  ;;  %v9230_v22 = vld [vmem:[#allocation94_spill] sm:$0xff] }
 0x554   : > { %v1501_v7 = vmul.f32 %v6360_v24, %v9214_v50  ;;  %v2705_v11 = vmul.f32 %v9210_v28, %v9227_v47  ;;  %v7436_v31 = vmul.f32 %v6989_v12, %v7390_v51  ;;  %5461 = vpow2.f32 %v7257_v2  ;;  %v9232_v2 = vld [vmem:[#allocation117_spill] sm:$0xff] }
 0x555   : > { %9226 = vst [vmem:[#allocation114_spill] sm:$0xff] %v7428_v4  ;;  %v1723_v62 = vmul.f32 1.442695, %v1509_v49  ;;  %v7439_v32 = vpop.eup %5443  ;;  %v2704_v16 = vmul.f32 %v9210_v28, %v9229_v53  ;;  %v7443_v33 = vpop.permute.xlu1 %2189  ;;  %2442 = vbcast.lane.b32.xlu0 %v9184_v10, 280  ;;  %v7448_v24 = vmul.f32 %v9230_v22, %v7402_v21  ;;  %v7451_v47 = vadd.f32 %v7216_v8, %v2703_v18  ;;  %v9235_v18 = vld [vmem:[#allocation72_spill] sm:$0xff] }
 0x556   : > { %9228 = vst [vmem:[#allocation64_spill] sm:$0xff] %v7439_v32  ;;  %5463 = vpow2.f32 %v7293_v60  ;;  %v7454_v12 = vpop.eup %5445  ;;  %v2711_v49 = vmul.f32 %v9224_v38, %v9232_v2  ;;  %v7459_v53 = vadd.f32 %v7315_v35, %v2709_v19  ;;  %v1517_v51 = vmul.f32 %v6369_v29, %v9214_v50  ;;  %v9237_v2 = vld [vmem:[#allocation109_spill] sm:$0xff] }
 0x557   : > { %9231 = vst [vmem:[#allocation101_spill] sm:$0xff] %v7451_v47  ;;  %5465 = vpow2.f32 %v7305_v15  ;;  %v7464_v22 = vpop.eup %5447  ;;  %v7466_v21 = vpop.permute.xlu0 %2201  ;;  %2438 = vbcast.lane.b32.xlu1 %v9184_v10, 272  ;;  %v7470_v8 = vadd.f32 %v7236_v56, %v2702_v39  ;;  %v7474_v60 = vmul.f32 %v7179_v45, %v7428_v4  ;;  %v1707_v35 = vmul.f32 1.442695, %v1501_v7 }
 0x558   : > { %9233 = vst [vmem:[#allocation104_spill] sm:$0xff] %v7459_v53  ;;  %v1494_v15 = vmul.f32 %v6357_v23, %v6826_v37  ;;  %v2725_v50 = vmul.f32 %v9235_v18, %v7181_v44  ;;  %v7481_v19 = vadd.f32 %v7252_v34, %v2705_v11  ;;  %5467 = vpow2.f32 %v7334_v46  ;;  %v9238_v23 = vld [vmem:[#allocation108_spill] sm:$0xff]  ;;  %v9242_v11 = vld [vmem:[#allocation97_spill] sm:$0xff] }
 0x559   : > { %9234 = vst [vmem:[#allocation107_spill] sm:$0xff] %v7470_v8  ;;  %v1510_v56 = vmul.f32 %v6366_v27, %v6826_v37  ;;  %v7486_v39 = vpop.eup %5449  ;;  %v2707_v45 = vmul.f32 %v9210_v28, %v9237_v2  ;;  %v7490_v7 = vpop.permute.xlu1 %2197  ;;  %2419 = vbcast.lane.b32.xlu0 %v9162_v61, 304  ;;  %v7495_v44 = vmul.f32 %v9238_v23, %v7451_v47  ;;  %5469 = vpow2.f32 %v7352_v43  ;;  %v9241_v27 = vld [vmem:[#allocation120_spill] sm:$0xff]  ;;  %v9244_v23 = vld [vmem:[#allocation119_spill] sm:$0xff] }
 0x55a   : > { %9236 = vst [vmem:[#allocation94_spill] sm:$0xff] %v7481_v19  ;;  %v7498_v34 = vadd.f32 %v7270_v41, %v2704_v16  ;;  %v7501_v46 = vpop.eup %5451  ;;  %v2713_v37 = vmul.f32 %v9224_v38, %v9241_v27  ;;  %v3639_v2 = vmul.f32 %v9242_v11, %v7459_v53  ;;  %v7508_v4 = vadd.f32 %v7360_v1, %v2711_v49  ;;  %v9245_v43 = vld [vmem:[#allocation83_spill] sm:$0xff] }
 0x55b   : > { %9240 = vst [vmem:[#allocation72_spill] sm:$0xff] %v7501_v46  ;;  %v1739_v29 = vmul.f32 1.442695, %v1517_v51  ;;  %v7510_v32 = vpop.eup %5453  ;;  %v2710_v41 = vmul.f32 %v9224_v38, %v9244_v23  ;;  %v7514_v16 = vpop.permute.xlu0 %2209  ;;  %2415 = vbcast.lane.b32.xlu1 %v9162_v61, 296  ;;  %v7519_v47 = vmul.f32 %v9245_v43, %v7470_v8  ;;  %5471 = vpow2.f32 %v7392_v20  ;;  %v9247_v49 = vld [vmem:[#allocation123_spill] sm:$0xff]  ;;  %v9248_v46 = vld [vmem:[#allocation112_spill] sm:$0xff] }
 0x55c   : > { %9239 = vst [vmem:[#allocation117_spill] sm:$0xff] %v7498_v34  ;;  %9243 = vst [vmem:[#allocation109_spill] sm:$0xff] %v7508_v4  ;;  %v1693_v27 = vmul.f32 1.442695, %v1494_v15  ;;  %v7522_v11 = vpop.eup %5455  ;;  %v2727_v1 = vmul.f32 %v9235_v18, %v7224_v14  ;;  %v7526_v51 = vadd.f32 %v3639_v2, %v2725_v50  ;;  %v7530_v23 = vmul.f32 %v9247_v49, %v7481_v19  ;;  %v9249_v20 = vld [vmem:[#allocation113_spill] sm:$0xff]  ;;  %v9252_v2 = vld [vmem:[#allocation122_spill] sm:$0xff] }
 0x55d   : > { %v1725_v53 = vmul.f32 1.442695, %v1510_v56  ;;  %v2706_v30 = vmul.f32 %v9210_v28, %v9248_v46  ;;  %v7534_v43 = vpop.permute.xlu1 %2205  ;;  %2481 = vbcast.lane.b32.xlu0 %v9197_v17, 288  ;;  %v7539_v15 = vmul.f32 %v9249_v20, %v7498_v34  ;;  %v7542_v14 = vadd.f32 %v7290_v0, %v2707_v45  ;;  %v9253_v46 = vld [vmem:[#allocation105_spill] sm:$0xff]  ;;  %v9255_v20 = vld [vmem:[#allocation124_spill] sm:$0xff]  ;;  %v9256_v0 = vld [vmem:[#allocation71_spill] sm:$0xff] }
 0x55e   : > { %9246 = vst [vmem:[#allocation108_spill] sm:$0xff] %v7526_v51  ;;  %5473 = vpow2.f32 %v7414_v9  ;;  %v7545_v50 = vpop.eup %5457  ;;  %v2712_v56 = vmul.f32 %v9224_v38, %v9252_v2  ;;  %v3641_v49 = vmul.f32 %v9253_v46, %v7508_v4  ;;  %v7552_v19 = vadd.f32 %v7387_v40, %v2713_v37  ;;  %v9257_v40 = vld [vmem:[#allocation81_spill] sm:$0xff] }
 0x55f   : > { %9250 = vst [vmem:[#allocation120_spill] sm:$0xff] %v7542_v14  ;;  %9251 = vst [vmem:[#allocation97_spill] sm:$0xff] %v7545_v50  ;;  %5475 = vpow2.f32 %v1723_v62  ;;  %v5460_v8 = vpop.eup %5459  ;;  %v2715_v34 = vmul.f32 %v9224_v38, %v9255_v20  ;;  %v2717_v45 = vmul.f32 %v9256_v0, %v6993_v52  ;;  %2477 = vbcast.lane.b32.xlu1 %v9197_v17, 280  ;;  %v2221_v9 = vpop.permute.xlu0 %2220 }
 0x560   : > { %9254 = vst [vmem:[#allocation119_spill] sm:$0xff] %v7552_v19  ;;  %v7560_v50 = vadd.f32 %v7377_v58, %v2710_v41  ;;  %5477 = vpow2.f32 %v1707_v35  ;;  %v2729_v2 = vmul.f32 %v9235_v18, %v7275_v36  ;;  %v2741_v37 = vmul.f32 %v9257_v40, %v2221_v9  ;;  %v9259_v36 = vld [vmem:[#allocation54_spill] sm:$0xff] }
 0x561   : > { %v7565_v62 = vadd.f32 %v3641_v49, %v2727_v1  ;;  %v3855_v46 = vmul.f32 %v7232_v59, %v7526_v51  ;;  %v7569_v20 = vpop.eup %5461  ;;  %v2726_v52 = vmul.f32 %v9235_v18, %v7247_v48  ;;  %v7573_v4 = vpop.permute.xlu1 %2213  ;;  %2450 = vbcast.lane.b32.xlu0 %v9184_v10, 296  ;;  %v7577_v58 = vadd.f32 %v7302_v54, %v2706_v30  ;;  %v9260_v59 = vld [vmem:[#allocation126_spill] sm:$0xff]  ;;  %v9262_v48 = vld [vmem:[#allocation121_spill] sm:$0xff] }
 0x562   : > { %v7581_v35 = vmul.f32 %v9259_v36, %v7542_v14  ;;  %5479 = vpow2.f32 %v1739_v29  ;;  %v2714_v1 = vmul.f32 %v9224_v38, %v9260_v59  ;;  %v7588_v49 = vadd.f32 %v7411_v42, %v2712_v56  ;;  %v9264_v29 = vld [vmem:[#allocation87_spill] sm:$0xff] }
 0x563   : > { %9258 = vst [vmem:[#allocation83_spill] sm:$0xff] %v7577_v58  ;;  %v7583_v41 = vpop.eup %5463  ;;  %v3643_v9 = vmul.f32 %v9262_v48, %v7552_v19  ;;  %v7592_v51 = vadd.f32 %v3855_v46, %v2741_v37  ;;  %2446 = vbcast.lane.b32.xlu1 %v9184_v10, 288  ;;  %v2229_v30 = vpop.permute.xlu0 %2228  ;;  %v3640_v36 = vmul.f32 %v9264_v29, %v7560_v50  ;;  %5481 = vpow2.f32 %v1693_v27  ;;  %v9267_v29 = vld [vmem:[#allocation49_spill] sm:$0xff] }
 0x564   : > { %9261 = vst [vmem:[#allocation123_spill] sm:$0xff] %v7588_v49  ;;  %v7594_v54 = vpop.eup %5465  ;;  %v7600_v14 = vadd.f32 %v7448_v24, %v2717_v45  ;;  %v7603_v59 = vadd.f32 %v7425_v5, %v2715_v34  ;;  %v2743_v42 = vmul.f32 %v9257_v40, %v2229_v30  ;;  %v3857_v46 = vmul.f32 %v7454_v12, %v7565_v62  ;;  %v9268_v45 = vld [vmem:[#allocation50_spill] sm:$0xff] }
 0x565   : > { %9263 = vst [vmem:[#allocation112_spill] sm:$0xff] %v7592_v51  ;;  %v7606_v56 = vadd.f32 %v3643_v9, %v2729_v2  ;;  %v7610_v37 = vmul.f32 %v7295_v26, %v7592_v51  ;;  %v7614_v48 = vpop.eup %5467  ;;  %v2719_v24 = vmul.f32 %v9256_v0, %v9267_v29  ;;  %v2718_v5 = vmul.f32 %v9256_v0, %v9268_v45  ;;  %v2938_v34 = vpop.permute.xlu1 %2937  ;;  %v9269_v26 = vld [vmem:[#allocation70_spill] sm:$0xff]  ;;  %v9273_v51 = vld [vmem:[#allocation132_spill] sm:$0xff] }
 0x566   : > { %9265 = vst [vmem:[#allocation113_spill] sm:$0xff] %v7603_v59  ;;  %2454 = vbcast.lane.b32.xlu0 %v9184_v10, 304  ;;  %v7621_v27 = vadd.f32 %v3640_v36, %v2726_v52  ;;  %5483 = vpow2.f32 %v1725_v53  ;;  %v7623_v2 = vpop.eup %5469  ;;  %v2728_v9 = vmul.f32 %v9235_v18, %v9269_v26  ;;  %2942 = vst.msk [vmem:[#allocation5 + $0x8] sm:$0xff] %vm874_vm5, %v2938_v34  ;;  %v9270_v12 = vld [vmem:[#allocation118_spill] sm:$0xff]  ;;  %v9274_v36 = vld [vmem:[#allocation76_spill] sm:$0xff] }
 0x567   : > { %9266 = vst [vmem:[#allocation122_spill] sm:$0xff] %v7606_v56  ;;  %v3642_v30 = vmul.f32 %v9270_v12, %v7588_v49  ;;  %v7631_v29 = vadd.f32 %v7436_v31, %v2714_v1  ;;  %v7633_v45 = vadd.f32 %v3857_v46, %v2743_v42  ;;  %v2716_v52 = vmul.f32 %v9224_v38, %v9273_v51  ;;  %v2237_v34 = vpop.permute.xlu0 %2236  ;;  %v9275_v26 = vld [vmem:[#allocation80_spill] sm:$0xff] }
 0x568   : > { %v2731_v53 = vmul.f32 %v9235_v18, %v7325_v63  ;;  %v2733_v19 = vmul.f32 %v9274_v36, %v7372_v6  ;;  %2423 = vbcast.lane.b32.xlu1 %v9162_v61, 312  ;;  %v3645_v12 = vmul.f32 %v9275_v26, %v7603_v59  ;;  %v7644_v49 = vpop.eup %5471  ;;  %v2745_v31 = vmul.f32 %v9257_v40, %v2237_v34  ;;  %v9276_v1 = vld [vmem:[#allocation100_spill] sm:$0xff]  ;;  %v9277_v6 = vld [vmem:[#allocation51_spill] sm:$0xff]  ;;  %v9279_v26 = vld [vmem:[#allocation93_spill] sm:$0xff] }
 0x569   : > { %9271 = vst [vmem:[#allocation105_spill] sm:$0xff] %v7631_v29  ;;  %9272 = vst [vmem:[#allocation124_spill] sm:$0xff] %v7633_v45  ;;  %v3647_v42 = vmul.f32 %v9276_v1, %v7600_v14  ;;  %v7651_v38 = vmul.f32 %v7464_v22, %v7633_v45  ;;  %v3859_v63 = vmul.f32 %v5460_v8, %v7606_v56  ;;  %v2225_v51 = vpop.permute.xlu1 %2224  ;;  %v9282_v56 = vld [vmem:[#allocation99_spill] sm:$0xff] }
 0x56a   : > { %v2721_v61 = vmul.f32 %v9256_v0, %v9277_v6  ;;  %2458 = vbcast.lane.b32.xlu0 %v9184_v10, 312  ;;  %v7658_v46 = vadd.f32 %v7519_v47, %v2718_v5  ;;  %v7661_v34 = vadd.f32 %v7495_v44, %v2719_v24  ;;  %v3856_v1 = vmul.f32 %v9279_v26, %v7621_v27 }
 0x56b   : > { %v5474_v59 = vpop.eup %5473  ;;  %v2730_v22 = vmul.f32 %v9235_v18, %v7348_v57  ;;  %v2742_v8 = vmul.f32 %v9257_v40, %v2225_v51  ;;  %v7668_v45 = vadd.f32 %v3642_v30, %v2728_v9  ;;  %v7670_v6 = vadd.f32 %v3859_v63, %v2745_v31  ;;  %v2245_v24 = vpop.permute.xlu0 %2244  ;;  %v9284_v9 = vld [vmem:[#allocation130_spill] sm:$0xff]  ;;  %v9289_v51 = vld [vmem:[#allocation111_spill] sm:$0xff] }
 0x56c   : > { %9278 = vst [vmem:[#allocation71_spill] sm:$0xff] %v7661_v34  ;;  %v5476_v10 = vpop.eup %5475  ;;  %v2720_v47 = vmul.f32 %v9256_v0, %v9282_v56  ;;  %v2735_v44 = vmul.f32 %v9274_v36, %v7420_v13  ;;  %2485 = vbcast.lane.b32.xlu1 %v9197_v17, 296  ;;  %v7677_v5 = vadd.f32 %v3647_v42, %v2733_v19  ;;  %v9287_v42 = vld [vmem:[#allocation134_spill] sm:$0xff] }
 0x56d   : > { %9280 = vst [vmem:[#allocation81_spill] sm:$0xff] %v7668_v45  ;;  %9281 = vst [vmem:[#allocation54_spill] sm:$0xff] %v7670_v6  ;;  %v7679_v26 = vadd.f32 %v3645_v12, %v2731_v53  ;;  %v7681_v57 = vpop.eup %5477  ;;  %v3644_v30 = vmul.f32 %v9284_v9, %v7631_v29  ;;  %v7686_v31 = vadd.f32 %v7474_v60, %v2716_v52  ;;  %v2233_v19 = vpop.permute.xlu1 %2232  ;;  %v9288_v53 = vld [vmem:[#allocation92_spill] sm:$0xff] }
 0x56e   : > { %v7688_v63 = vadd.f32 %v3856_v1, %v2742_v8  ;;  %v7692_v13 = vmul.f32 %v7569_v20, %v7670_v6  ;;  %v2747_v56 = vmul.f32 %v9257_v40, %v2245_v24  ;;  %3065 = vbcast.lane.b32.xlu0 %v9287_v42, 264  ;;  %v3648_v12 = vmul.f32 %v9288_v53, %v7658_v46  ;;  %v9291_v1 = vld [vmem:[#allocation96_spill] sm:$0xff] }
 0x56f   : > { %9283 = vst [vmem:[#allocation126_spill] sm:$0xff] %v7679_v26  ;;  %9285 = vst [vmem:[#allocation121_spill] sm:$0xff] %v7686_v31  ;;  %v3649_v9 = vmul.f32 %v9289_v51, %v7661_v34  ;;  %v7701_v60 = vadd.f32 %v7530_v23, %v2721_v61  ;;  %v7703_v52 = vpop.eup %5479  ;;  %v2723_v20 = vmul.f32 %v9256_v0, %v9291_v1  ;;  %v2256_v53 = vpop.permute.xlu0 %2255  ;;  %v9294_v61 = vld [vmem:[#allocation65_spill] sm:$0xff] }
 0x570   : > { %9286 = vst [vmem:[#allocation87_spill] sm:$0xff] %v7688_v63  ;;  %v2744_v8 = vmul.f32 %v9257_v40, %v2233_v19  ;;  %v7708_v24 = vadd.f32 %v3644_v30, %v2730_v22  ;;  %v3858_v6 = vmul.f32 %v7486_v39, %v7668_v45  ;;  %2489 = vbcast.lane.b32.xlu1 %v9197_v17, 304  ;;  %v7721_v34 = vpop.eup %5481  ;;  %v9295_v30 = vld [vmem:[#allocation84_spill] sm:$0xff] }
 0x571   : > { %9290 = vst [vmem:[#allocation49_spill] sm:$0xff] %v7701_v60  ;;  %v7713_v29 = vadd.f32 %v3649_v9, %v2735_v44  ;;  %v7716_v23 = vadd.f32 %v7539_v15, %v2720_v47  ;;  %v3863_v51 = vmul.f32 %v9294_v61, %v7677_v5  ;;  %v3861_v1 = vmul.f32 %v5474_v59, %v7679_v26  ;;  %v9297_v15 = vld [vmem:[#allocation56_spill] sm:$0xff]  ;;  %v2241_v59 = vpop.permute.xlu1 %2240  ;;  %v9298_v61 = vld [vmem:[#allocation135_spill] sm:$0xff]  ;;  %v9299_v26 = vld [vmem:[#allocation125_spill] sm:$0xff] }
 0x572   : > { %9292 = vst [vmem:[#allocation50_spill] sm:$0xff] %v7708_v24  ;;  %v2737_v22 = vmul.f32 %v9274_v36, %v7466_v21  ;;  %v2749_v39 = vmul.f32 %v9295_v30, %v2256_v53  ;;  %v7728_v19 = vmul.f32 %v7368_v25, %v7688_v63  ;;  %v7730_v44 = vadd.f32 %v3858_v6, %v2744_v8 }
 0x573   : > { %9293 = vst [vmem:[#allocation70_spill] sm:$0xff] %v7716_v23  ;;  %v2722_v47 = vmul.f32 %v9256_v0, %v9297_v15  ;;  %v2734_v9 = vmul.f32 %v9274_v36, %v7443_v33  ;;  %3100 = vbcast.lane.b32.xlu0 %v9298_v61, 264  ;;  %v3651_v21 = vmul.f32 %v9299_v26, %v7701_v60  ;;  %v7741_v53 = vpop.eup %5483  ;;  %v2264_v26 = vpop.permute.xlu0 %2263 }
 0x574   : > { %9296 = vst [vmem:[#allocation118_spill] sm:$0xff] %v7730_v44  ;;  %v7739_v45 = vadd.f32 %v3861_v1, %v2747_v56  ;;  %v2746_v25 = vmul.f32 %v9257_v40, %v2241_v59  ;;  %v7744_v6 = vadd.f32 %v3863_v51, %v2749_v39  ;;  %v7748_v8 = vmul.f32 %v7510_v32, %v7730_v44  ;;  %v9316_v44 = vld [vmem:[#allocation64_spill] sm:$0xff] }
 0x575   : > { %v3860_v33 = vmul.f32 %v7614_v48, %v7708_v24  ;;  %v2732_v15 = vmul.f32 %v9235_v18, %v7398_v55  ;;  %2493 = vbcast.lane.b32.xlu1 %v9197_v17, 312  ;;  %v7756_v56 = vadd.f32 %v7581_v35, %v2723_v20  ;;  %v3865_v51 = vmul.f32 %v7416_v3, %v7713_v29  ;;  %v9304_v48 = vld [vmem:[#allocation58_spill] sm:$0xff]  ;;  %v2249_v3 = vpop.permute.xlu1 %2248  ;;  %v9306_v20 = vld [vmem:[#allocation137_spill] sm:$0xff] }
 0x576   : > { %9300 = vst [vmem:[#allocation132_spill] sm:$0xff] %v7739_v45  ;;  %9301 = vst [vmem:[#allocation76_spill] sm:$0xff] %v7744_v6  ;;  %v7761_v1 = vmul.f32 %v5476_v10, %v7739_v45  ;;  %v2751_v32 = vmul.f32 %v9295_v30, %v2264_v26  ;;  %v7764_v39 = vadd.f32 %v3651_v21, %v2737_v22  ;;  %v9307_v22 = vld [vmem:[#allocation68_spill] sm:$0xff]  ;;  %v9308_v21 = vld [vmem:[#allocation79_spill] sm:$0xff] }
 0x577   : > { %9302 = vst [vmem:[#allocation80_spill] sm:$0xff] %v7756_v56  ;;  %v7768_v55 = vmul.f32 %v9304_v48, %v7744_v6  ;;  %v7770_v17 = vadd.f32 %v3860_v33, %v2746_v25  ;;  %v2736_v18 = vmul.f32 %v9274_v36, %v7490_v7  ;;  %v2739_v35 = vmul.f32 %v9274_v36, %v7514_v16  ;;  %v7790_v7 = vld [vmem:[%s6157_s29 + $0x30] sm:$0xff]  ;;  %v9310_v16 = vld [vmem:[#allocation39_spill] sm:$0xff] }
 0x578   : > { %9303 = vst [vmem:[#allocation100_spill] sm:$0xff] %v7764_v39  ;;  %3282 = vbcast.lane.b32.xlu0 %v9306_v20, 264  ;;  %v7777_v10 = vadd.f32 %v3648_v12, %v2734_v9  ;;  %v3436_v59 = vmul.f32 %v9307_v22, %v7577_v58  ;;  %v3646_v26 = vmul.f32 %v9308_v21, %v7686_v31  ;;  %v2272_v12 = vpop.permute.xlu0 %2271  ;;  %v9311_v9 = vld [vmem:[#allocation115_spill] sm:$0xff]  ;;  %v9314_v21 = vld [vmem:[#allocation98_spill] sm:$0xff] }
 0x579   : > { %9305 = vst [vmem:[#allocation51_spill] sm:$0xff] %v7770_v17  ;;  %v7783_v48 = vadd.f32 %v3865_v51, %v2751_v32  ;;  %v7787_v25 = vmul.f32 %v7623_v2, %v7770_v17  ;;  %v1525_v33 = vmul.f32 %v7790_v7, %v9310_v16  ;;  %3061 = vbcast.lane.b32.xlu1 %v9287_v42, 256  ;;  %v9313_v51 = vld [vmem:[#allocation55_spill] sm:$0xff]  ;;  %5485 = vpow2.f32 %v9314_v21  ;;  %v2260_v60 = vpop.permute.xlu1 %2259 }
 0x57a   : > { %v3650_v22 = vmul.f32 %v9311_v9, %v7716_v23  ;;  %v7797_v45 = vadd.f32 %v3436_v59, %v2722_v47  ;;  %v3653_v32 = vmul.f32 %v9313_v51, %v7756_v56  ;;  %v2753_v2 = vmul.f32 %v9295_v30, %v2272_v12  ;;  %v9317_v9 = vld [vmem:[#allocation138_spill] sm:$0xff]  ;;  %v7819_v12 = vld [vmem:[%s6157_s29 + $0x38] sm:$0xff] }
 0x57b   : > { %9309 = vst [vmem:[#allocation93_spill] sm:$0xff] %v7783_v48  ;;  %v7803_v17 = vadd.f32 %v3646_v26, %v2732_v15  ;;  %v7807_v63 = vmul.f32 %v9316_v44, %v7783_v48  ;;  %v3867_v6 = vmul.f32 %v7583_v41, %v7764_v39  ;;  %v9320_v51 = vld [vmem:[#allocation82_spill] sm:$0xff]  ;;  %v9321_v15 = vld [vmem:[#allocation37_spill] sm:$0xff]  ;;  %v2738_v44 = vmul.f32 %v9274_v36, %v7534_v43 }
 0x57c   : > { %9312 = vst [vmem:[#allocation99_spill] sm:$0xff] %v7797_v45  ;;  %3317 = vbcast.lane.b32.xlu0 %v9317_v9, 264  ;;  %v7812_v47 = vadd.f32 %v3650_v22, %v2736_v18  ;;  %v7814_v59 = vadd.f32 %v3653_v32, %v2739_v35  ;;  %v3864_v21 = vmul.f32 %v9320_v51, %v7777_v10  ;;  %v9323_v18 = vld [vmem:[#allocation116_spill] sm:$0xff]  ;;  %v2280_v22 = vpop.permute.xlu0 %2279  ;;  %v9324_v32 = vld [vmem:[#allocation142_spill] sm:$0xff] }
 0x57d   : > { %9315 = vst [vmem:[#allocation130_spill] sm:$0xff] %v7803_v17  ;;  %v1502_v26 = vmul.f32 %v7819_v12, %v9321_v15  ;;  %v2748_v41 = vmul.f32 %v9257_v40, %v2249_v3  ;;  %v2750_v48 = vmul.f32 %v9295_v30, %v2260_v60  ;;  %v7827_v56 = vadd.f32 %v3867_v6, %v2753_v2  ;;  %v9325_v39 = vld [vmem:[#allocation66_spill] sm:$0xff]  ;;  %v2268_v60 = vpop.permute.xlu1 %2267  ;;  %v9327_v6 = vld [vmem:[#allocation139_spill] sm:$0xff] }
 0x57e   : > { %9318 = vst [vmem:[#allocation134_spill] sm:$0xff] %v7812_v47  ;;  %9319 = vst [vmem:[#allocation92_spill] sm:$0xff] %v7814_v59  ;;  %v2708_v35 = vmul.f32 %v9210_v28, %v9323_v18  ;;  %3096 = vbcast.lane.b32.xlu1 %v9298_v61, 256  ;;  %v3652_v51 = vmul.f32 %v9324_v32, %v7797_v45  ;;  %5487 = vpow2.f32 %v9325_v39  ;;  %v1755_v15 = vmul.f32 1.442695, %v1525_v33  ;;  %v9330_v18 = vld [vmem:[#allocation102_spill] sm:$0xff] }
 0x57f   : > { %9322 = vst [vmem:[#allocation111_spill] sm:$0xff] %v7827_v56  ;;  %v2755_v43 = vmul.f32 %v9295_v30, %v2280_v22  ;;  %v7836_v31 = vadd.f32 %v3864_v21, %v2750_v48  ;;  %v7840_v40 = vmul.f32 %v7594_v54, %v7827_v56  ;;  %v3862_v28 = vmul.f32 %v7721_v34, %v7803_v17  ;;  %v9328_v48 = vld [vmem:[#allocation38_spill] sm:$0xff]  ;;  %v9332_v32 = vld [vmem:[#allocation89_spill] sm:$0xff]  ;;  %v7948_v45 = vld [vmem:[%s6157_s29 + $0x18] sm:$0xff] }
 0x580   : > { %3498 = vbcast.lane.b32.xlu0 %v9327_v6, 264  ;;  %v3866_v3 = vmul.f32 %v7522_v11, %v7812_v47  ;;  %v3869_v39 = vmul.f32 %v7681_v57, %v7814_v59  ;;  %v1709_v33 = vmul.f32 1.442695, %v1502_v26  ;;  %v1518_v2 = vmul.f32 %v7819_v12, %v9328_v48  ;;  %v2291_v11 = vpop.permute.xlu0 %2290  ;;  %v9334_v57 = vld [vmem:[#allocation129_spill] sm:$0xff] }
 0x581   : > { %9326 = vst [vmem:[#allocation96_spill] sm:$0xff] %v7836_v31  ;;  %v2752_v54 = vmul.f32 %v9295_v30, %v2268_v60  ;;  %v7852_v21 = vadd.f32 %v3652_v51, %v2738_v44  ;;  %v7856_v34 = vmul.f32 %v9330_v18, %v7836_v31  ;;  %v7858_v22 = vadd.f32 %v3862_v28, %v2748_v41  ;;  %v7866_v26 = vld [vmem:[%s6157_s29 + $0x28] sm:$0xff]  ;;  %v9336_v60 = vld [vmem:[#allocation131_spill] sm:$0xff]  ;;  %v3704_v18 = vld [vmem:[#allocation5 + $0x6] sm:$0x3] }
 0x582   : > { %3278 = vbcast.lane.b32.xlu1 %v9306_v20, 256  ;;  %v7862_v56 = vadd.f32 %v9332_v32, %v2708_v35  ;;  %5489 = vpow2.f32 %v9334_v57  ;;  %v1524_v44 = vmul.f32 %v7866_v26, %v9310_v16  ;;  %v7870_v51 = vadd.f32 %v3869_v39, %v2755_v43  ;;  %v9338_v35 = vld [vmem:[#allocation61_spill] sm:$0xff]  ;;  %v2276_v57 = vpop.permute.xlu1 %2275  ;;  %v9339_v31 = vld [vmem:[#allocation140_spill] sm:$0xff] }
 0x583   : > { %9329 = vst [vmem:[#allocation65_spill] sm:$0xff] %v7852_v21  ;;  %9331 = vst [vmem:[#allocation84_spill] sm:$0xff] %v7858_v22  ;;  %v2757_v48 = vmul.f32 %v9336_v60, %v2291_v11  ;;  %v7873_v41 = vadd.f32 %v3866_v3, %v2752_v54  ;;  %5491 = vpow2.f32 %v1755_v15  ;;  %v7877_v28 = vmul.f32 %v7741_v53, %v7858_v22  ;;  %v9341_v53 = vld [vmem:[#allocation97_spill] sm:$0xff] }
 0x584   : > { %9333 = vst [vmem:[#allocation56_spill] sm:$0xff] %v7862_v56  ;;  %9335 = vst [vmem:[#allocation135_spill] sm:$0xff] %v7870_v51  ;;  %v2724_v32 = vmul.f32 %v9256_v0, %v9338_v35  ;;  %3533 = vbcast.lane.b32.xlu0 %v9339_v31, 264  ;;  %v7884_v43 = vmul.f32 %v7703_v52, %v7870_v51  ;;  %5493 = vpow2.f32 %v1709_v33  ;;  %v1741_v39 = vmul.f32 1.442695, %v1518_v2  ;;  %v2299_v11 = vpop.permute.xlu0 %2298  ;;  %v9342_v35 = vld [vmem:[#allocation29_spill] sm:$0xff] }
 0x585   : > { %9337 = vst [vmem:[#allocation125_spill] sm:$0xff] %v7873_v41  ;;  %v2754_v3 = vmul.f32 %v9295_v30, %v2276_v57  ;;  %v7888_v15 = vadd.f32 %v7610_v37, %v2757_v48  ;;  %v7892_v54 = vmul.f32 %v9341_v53, %v7873_v41  ;;  %v3868_v0 = vmul.f32 %v7644_v49, %v7852_v21  ;;  %v9343_v33 = vld [vmem:[#allocation69_spill] sm:$0xff]  ;;  %v9344_v53 = vld [vmem:[#allocation90_spill] sm:$0xff]  ;;  %v9345_v51 = vld [vmem:[#allocation59_spill] sm:$0xff] }
 0x586   : > { %3313 = vbcast.lane.b32.xlu1 %v9317_v9, 256  ;;  %v7898_v52 = vrot.slane %v3704_v18, %v9342_v35  ;;  %v3438_v2 = vmul.f32 %v9343_v33, %v7862_v56  ;;  %v1753_v57 = vmul.f32 1.442695, %v1524_v44  ;;  %v5486_v37 = vpop.eup %5485  ;;  %v2759_v48 = vmul.f32 %v9336_v60, %v2299_v11  ;;  %v2284_v41 = vpop.permute.xlu1 %2283  ;;  %v9348_v21 = vld [vmem:[#allocation45_spill] sm:$0xff]  ;;  %v9349_v44 = vld [vmem:[#allocation128_spill] sm:$0xff] }
 0x587   : > { %9340 = vst [vmem:[#allocation58_spill] sm:$0xff] %v7888_v15  ;;  %v7905_v22 = vmul.f32 %v9344_v53, %v7888_v15  ;;  %5495 = vpow2.f32 %v9345_v51  ;;  %v7908_v49 = vadd.f32 %v3868_v0, %v2754_v3  ;;  %v1763_v33 = vmul.f32 1.442695, %v9348_v21  ;;  %v7919_v53 = vld [vmem:[%s6157_s29 + $0x20] sm:$0xff] }
 0x588   : > { %3714 = vbcast.lane.b32.xlu0 %v7898_v52, 264  ;;  %v7911_v59 = vadd.f32 %v3438_v2, %v2724_v32  ;;  %5497 = vpow2.f32 %v1741_v39  ;;  %v7916_v11 = vadd.f32 %v7651_v38, %v2759_v48  ;;  %v9351_v15 = vld [vmem:[#allocation40_spill] sm:$0xff]  ;;  %v2740_v32 = vmul.f32 %v9274_v36, %v7573_v4  ;;  %v2307_v21 = vpop.permute.xlu0 %2306  ;;  %v9352_v39 = vld [vmem:[#allocation30_spill] sm:$0xff]  ;;  %v7933_v38 = vld [vmem:[%s6157_s29 + $0x8] sm:$0xff] }
 0x589   : > { %9346 = vst [vmem:[#allocation137_spill] sm:$0xff] %v7908_v49  ;;  %5499 = vpow2.f32 %v9349_v44  ;;  %v1531_v51 = vmul.f32 %v7919_v53, %v9351_v15  ;;  %v7924_v3 = vmul.f32 %v5486_v37, %v7908_v49  ;;  %v7930_v0 = vrot.slane %v3704_v18, %v9352_v39  ;;  %v9353_v37 = vld [vmem:[#allocation72_spill] sm:$0xff]  ;;  %v9354_v4 = vld [vmem:[#allocation35_spill] sm:$0xff]  ;;  %v9355_v18 = vld [vmem:[#allocation110_spill] sm:$0xff] }
 0x58a   : > { %9347 = vst [vmem:[#allocation68_spill] sm:$0xff] %v7911_v59  ;;  %9350 = vst [vmem:[#allocation79_spill] sm:$0xff] %v7916_v11  ;;  %3494 = vbcast.lane.b32.xlu1 %v9327_v6, 256  ;;  %v1528_v2 = vmul.f32 %v7933_v38, %v9351_v15  ;;  %v2761_v44 = vmul.f32 %v9336_v60, %v2307_v21  ;;  %v7940_v49 = vmul.f32 %v9353_v37, %v7916_v11  ;;  %v2295_v56 = vpop.permute.xlu1 %2294 }
 0x58b   : > { %v5488_v48 = vpop.eup %5487  ;;  %5501 = vpow2.f32 %v1753_v57  ;;  %v2595_v36 = vcombine.high %v9354_v4, %v9354_v4  ;;  %v3654_v17 = vmul.f32 %v9355_v18, %v7911_v59  ;;  %v1530_v58 = vmul.f32 %v7948_v45, %v9351_v15 }
 0x58c   : > { %3749 = vbcast.lane.b32.xlu0 %v7930_v0, 264  ;;  %v2758_v21 = vmul.f32 %v9336_v60, %v2295_v56  ;;  %5503 = vpow2.f32 %v1763_v33  ;;  %v7954_v37 = vadd.f32 %v7692_v13, %v2761_v44  ;;  %v1767_v57 = vmul.f32 1.442695, %v1531_v51  ;;  %v2315_v4 = vpop.permute.xlu0 %2314 }
 0x58d   : > { %v7957_v11 = vadd.f32 %v3654_v17, %v2740_v32  ;;  %v1761_v24 = vmul.f32 1.442695, %v1528_v2  ;;  %v2763_v18 = vmul.f32 %v9336_v60, %v2315_v4  ;;  %v1526_v13 = vmul.f32 %v7819_v12, %v9310_v16 }
 0x58e   : > { %9356 = vst [vmem:[#allocation39_spill] sm:$0xff] %v7954_v37  ;;  %3529 = vbcast.lane.b32.xlu1 %v9339_v31, 256  ;;  %v7961_v59 = vadd.f32 %v7728_v19, %v2758_v21  ;;  %v7964_v23 = vmul.f32 %v5488_v48, %v7954_v37  ;;  %v7969_v33 = vrot.slane %v2595_v36, %v9342_v35  ;;  %v2303_v51 = vpop.permute.xlu1 %2302  ;;  %v1765_v32 = vmul.f32 1.442695, %v1530_v58 }
 0x58f   : > { %9357 = vst [vmem:[#allocation115_spill] sm:$0xff] %v7957_v11  ;;  %v5490_v47 = vpop.eup %5489  ;;  %v2756_v17 = vmul.f32 %v9295_v30, %v2284_v41  ;;  %v2760_v19 = vmul.f32 %v9336_v60, %v2303_v51  ;;  %5505 = vpow2.f32 %v1767_v57  ;;  %v7978_v48 = vadd.f32 %v7761_v1, %v2763_v18 }
 0x590   : > { %9358 = vst [vmem:[#allocation55_spill] sm:$0xff] %v7961_v59  ;;  %v5492_v56 = vpop.eup %5491  ;;  %3069 = vbcast.lane.b32.xlu0 %v9287_v42, 272  ;;  %v7975_v44 = vmul.f32 %v5490_v47, %v7961_v59  ;;  %v2326_v16 = vpop.permute.xlu0 %2325  ;;  %5507 = vpow2.f32 %v1761_v24  ;;  %v1532_v30 = vmul.f32 %v7866_v26, %v9351_v15  ;;  %v1533_v58 = vmul.f32 %v7790_v7, %v9351_v15 }
 0x591   : > { %v5494_v2 = vpop.eup %5493  ;;  %9359 = vst [vmem:[#allocation98_spill] sm:$0xff] %v7978_v48  ;;  %v2765_v36 = vmul.f32 %v7969_v33, %v2326_v16  ;;  %v7988_v47 = vadd.f32 %v7748_v8, %v2760_v19  ;;  %v7991_v1 = vmul.f32 %v5492_v56, %v7978_v48  ;;  %v1757_v21 = vmul.f32 1.442695, %v1526_v13  ;;  %v9363_v16 = vld [vmem:[#allocation43_spill] sm:$0xff] }
 0x592   : > { %3710 = vbcast.lane.b32.xlu1 %v7898_v52, 256  ;;  %v3870_v41 = vmul.f32 %v5494_v2, %v7957_v11  ;;  %v2311_v4 = vpop.permute.xlu1 %2310  ;;  %v1775_v37 = vmul.f32 1.442695, %v9363_v16  ;;  %5509 = vpow2.f32 %v1765_v32  ;;  %v1769_v19 = vmul.f32 1.442695, %v1532_v30  ;;  %v9365_v16 = vld [vmem:[#allocation41_spill] sm:$0xff] }
 0x593   : > { %9360 = vst [vmem:[#allocation64_spill] sm:$0xff] %v7988_v47  ;;  %v2762_v51 = vmul.f32 %v9336_v60, %v2311_v4  ;;  %v7998_v2 = vadd.f32 %v7768_v55, %v2765_v36  ;;  %v1771_v48 = vmul.f32 1.442695, %v1533_v58  ;;  %5511 = vpow2.f32 %v1757_v21  ;;  %v9367_v58 = vld [vmem:[#allocation53_spill] sm:$0xff] }
 0x594   : > { %v5496_v57 = vpop.eup %5495  ;;  %3286 = vbcast.lane.b32.xlu0 %v9306_v20, 272  ;;  %v7994_v24 = vadd.f32 %v3870_v41, %v2756_v17  ;;  %v2334_v13 = vpop.permute.xlu0 %2333  ;;  %v1539_v32 = vmul.f32 %v7919_v53, %v9365_v16  ;;  %5513 = vpow2.f32 %v1775_v37 }
 0x595   : > { %v5498_v18 = vpop.eup %5497  ;;  %9362 = vst [vmem:[#allocation82_spill] sm:$0xff] %v7998_v2  ;;  %v8002_v8 = vmul.f32 %v5496_v57, %v7988_v47  ;;  %v2767_v41 = vmul.f32 %v7969_v33, %v2334_v13  ;;  %v8013_v36 = vadd.f32 %v7787_v25, %v2762_v51  ;;  %5515 = vpow2.f32 %v1769_v19 }
 0x596   : > { %9361 = vst [vmem:[#allocation138_spill] sm:$0xff] %v7994_v24  ;;  %v5500_v56 = vpop.eup %5499  ;;  %3745 = vbcast.lane.b32.xlu1 %v7930_v0, 256  ;;  %v8006_v17 = vmul.f32 %v5498_v18, %v7994_v24  ;;  %v2319_v4 = vpop.permute.xlu1 %2318  ;;  %v1779_v18 = vmul.f32 1.442695, %v9367_v58  ;;  %v1536_v51 = vmul.f32 %v7933_v38, %v9365_v16  ;;  %5517 = vpow2.f32 %v1771_v48 }
 0x597   : > { %v8010_v55 = vmul.f32 %v5500_v56, %v7998_v2  ;;  %9364 = vst [vmem:[#allocation37_spill] sm:$0xff] %v8013_v36  ;;  %v8019_v30 = vadd.f32 %v7807_v63, %v2767_v41  ;;  %v1538_v41 = vmul.f32 %v7948_v45, %v9365_v16  ;;  %v2764_v58 = vmul.f32 %v9336_v60, %v2319_v4 }
 0x598   : > { %v5502_v57 = vpop.eup %5501  ;;  %3502 = vbcast.lane.b32.xlu0 %v9327_v6, 272  ;;  %v2342_v25 = vpop.permute.xlu0 %2341  ;;  %5519 = vpow2.f32 %v1779_v18  ;;  %v1541_v48 = vmul.f32 %v7790_v7, %v9365_v16  ;;  %v1777_v60 = vmul.f32 1.442695, %v1536_v51 }
 0x599   : > { %9366 = vst [vmem:[#allocation116_spill] sm:$0xff] %v8019_v30  ;;  %v8023_v56 = vmul.f32 %v5502_v57, %v8013_v36  ;;  %v5504_v13 = vpop.eup %5503  ;;  %v2769_v21 = vmul.f32 %v7969_v33, %v2342_v25  ;;  %v1783_v57 = vmul.f32 1.442695, %v1539_v32 }
 0x59a   : > { %3104 = vbcast.lane.b32.xlu1 %v9298_v61, 272  ;;  %v8030_v37 = vmul.f32 %v5504_v13, %v8019_v30  ;;  %v2330_v63 = vpop.permute.xlu1 %2329  ;;  %v1534_v30 = vmul.f32 %v7819_v12, %v9351_v15 }
 0x59b   : > { %v2766_v19 = vmul.f32 %v7969_v33, %v2330_v63  ;;  %v8038_v25 = vadd.f32 %v7840_v40, %v2769_v21  ;;  %v9370_v40 = vld [vmem:[#allocation34_spill] sm:$0xff]  ;;  %v1781_v63 = vmul.f32 1.442695, %v1538_v41  ;;  %5521 = vpow2.f32 %v1783_v57 }
 0x59c   : > { %3718 = vbcast.lane.b32.xlu0 %v7898_v52, 272  ;;  %v5506_v24 = vpop.eup %5505  ;;  %v2350_v13 = vpop.permute.xlu0 %2349  ;;  %v8052_v18 = vrot.slane %v9370_v40, %v9342_v35  ;;  %5523 = vpow2.f32 %v1777_v60 }
 0x59d   : > { %9368 = vst [vmem:[#allocation142_spill] sm:$0xff] %v8038_v25  ;;  %v5508_v36 = vpop.eup %5507  ;;  %v2771_v47 = vmul.f32 %v7969_v33, %v2350_v13  ;;  %v8045_v32 = vadd.f32 %v7856_v34, %v2766_v19  ;;  %v8048_v4 = vmul.f32 %v5506_v24, %v8038_v25  ;;  %v8062_v24 = vadd.f32 %v7877_v28, %v2764_v58  ;;  %v9374_v58 = vld [vmem:[#allocation44_spill] sm:$0xff] }
 0x59e   : > { %3321 = vbcast.lane.b32.xlu1 %v9317_v9, 272  ;;  %v2338_v21 = vpop.permute.xlu1 %2337  ;;  %v1787_v19 = vmul.f32 1.442695, %v1541_v48  ;;  %5525 = vpow2.f32 %v1781_v63  ;;  %v1773_v48 = vmul.f32 1.442695, %v1534_v30 }
 0x59f   : > { %9369 = vst [vmem:[#allocation66_spill] sm:$0xff] %v8045_v32  ;;  %v2768_v13 = vmul.f32 %v7969_v33, %v2338_v21  ;;  %v8059_v34 = vmul.f32 %v5508_v36, %v8045_v32  ;;  %9371 = vst [vmem:[#allocation139_spill] sm:$0xff] %v8062_v24  ;;  %v8066_v25 = vadd.f32 %v7884_v43, %v2771_v47  ;;  %v5510_v41 = vpop.eup %5509  ;;  %v1791_v21 = vmul.f32 1.442695, %v9374_v58 }
 0x5a0   : > { %3108 = vbcast.lane.b32.xlu0 %v9298_v61, 280  ;;  %v2361_v51 = vpop.permute.xlu0 %2360  ;;  %v1540_v36 = vmul.f32 %v7866_v26, %v9365_v16  ;;  %v5512_v57 = vpop.eup %5511  ;;  %5527 = vpow2.f32 %v1787_v19 }
 0x5a1   : > { %9372 = vst [vmem:[#allocation38_spill] sm:$0xff] %v8066_v25  ;;  %v2773_v59 = vmul.f32 %v8052_v18, %v2361_v51  ;;  %v8070_v15 = vadd.f32 %v7892_v54, %v2768_v13  ;;  %v8084_v54 = vmul.f32 %v5512_v57, %v8062_v24  ;;  %v5514_v13 = vpop.eup %5513  ;;  %5529 = vpow2.f32 %v1791_v21  ;;  %v9377_v57 = vld [vmem:[#allocation46_spill] sm:$0xff] }
 0x5a2   : > { %3537 = vbcast.lane.b32.xlu1 %v9339_v31, 272  ;;  %v2346_v28 = vpop.permute.xlu1 %2345  ;;  %v5516_v32 = vpop.eup %5515  ;;  %v1795_v58 = vmul.f32 1.442695, %v9377_v57  ;;  %5531 = vpow2.f32 %v1773_v48 }
 0x5a3   : > { %9373 = vst [vmem:[#allocation102_spill] sm:$0xff] %v8070_v15  ;;  %v2770_v43 = vmul.f32 %v7969_v33, %v2346_v28  ;;  %v8078_v47 = vadd.f32 %v7905_v22, %v2773_v59  ;;  %v8081_v60 = vmul.f32 %v5510_v41, %v8070_v15  ;;  %v1785_v28 = vmul.f32 1.442695, %v1540_v36  ;;  %v5518_v22 = vpop.eup %5517 }
 0x5a4   : > { %3325 = vbcast.lane.b32.xlu0 %v9317_v9, 280  ;;  %v2369_v51 = vpop.permute.xlu0 %2368 }
 0x5a5   : > { %9375 = vst [vmem:[#allocation89_spill] sm:$0xff] %v8078_v47  ;;  %v2775_v63 = vmul.f32 %v8052_v18, %v2369_v51  ;;  %v8089_v30 = vmul.f32 %v5514_v13, %v8078_v47  ;;  %v8092_v59 = vadd.f32 %v7924_v3, %v2770_v43  ;;  %v8103_v13 = vmul.f32 %v5518_v22, %v8066_v25  ;;  %v5520_v36 = vpop.eup %5519  ;;  %v9379_v51 = vld [vmem:[#allocation42_spill] sm:$0xff]  ;;  %v9424_v47 = vld [vmem:[#allocation31_spill] sm:$0xff] }
 0x5a6   : > { %3753 = vbcast.lane.b32.xlu1 %v7930_v0, 272  ;;  %v2354_v41 = vpop.permute.xlu1 %2353  ;;  %v1544_v21 = vmul.f32 %v7933_v38, %v9379_v51  ;;  %5533 = vpow2.f32 %v1785_v28  ;;  %v1546_v38 = vmul.f32 %v7948_v45, %v9379_v51  ;;  %v1542_v45 = vmul.f32 %v7819_v12, %v9365_v16 }
 0x5a7   : > { %9376 = vst [vmem:[#allocation129_spill] sm:$0xff] %v8092_v59  ;;  %v8097_v24 = vadd.f32 %v7940_v49, %v2775_v63  ;;  %v8100_v19 = vmul.f32 %v5516_v32, %v8092_v59  ;;  %5535 = vpow2.f32 %v1795_v58  ;;  %v4699_v2 = vsub.f32 0.0, %v9424_v47 }
 0x5a8   : > { %3541 = vbcast.lane.b32.xlu0 %v9339_v31, 280  ;;  %v2377_v3 = vpop.permute.xlu0 %2376  ;;  %v5522_v63 = vpop.eup %5521 }
 0x5a9   : > { %9378 = vst [vmem:[#allocation131_spill] sm:$0xff] %v8097_v24  ;;  %v2777_v43 = vmul.f32 %v8052_v18, %v2377_v3  ;;  %v8110_v57 = vmul.f32 %v5520_v36, %v8097_v24  ;;  %v1793_v3 = vmul.f32 1.442695, %v1544_v21  ;;  %v5524_v58 = vpop.eup %5523 }
 0x5aa   : > { %3073 = vbcast.lane.b32.xlu1 %v9287_v42, 280  ;;  %v2365_v49 = vpop.permute.xlu1 %2364 }
 0x5ab   : > { %v2774_v32 = vmul.f32 %v8052_v18, %v2365_v49  ;;  %v8115_v48 = vadd.f32 %v7964_v23, %v2777_v43  ;;  %v9382_v23 = vld [vmem:[#allocation36_spill] sm:$0xff]  ;;  %v2772_v49 = vmul.f32 %v7969_v33, %v2354_v41  ;;  %v1797_v41 = vmul.f32 1.442695, %v1546_v38 }
 0x5ac   : > { %3757 = vbcast.lane.b32.xlu0 %v7930_v0, 280  ;;  %v2385_v22 = vpop.permute.xlu0 %2384  ;;  %v8129_v43 = vrot.slane %v9382_v23, %v9342_v35  ;;  %5537 = vpow2.f32 %v1793_v3 }
 0x5ad   : > { %9380 = vst [vmem:[#allocation61_spill] sm:$0xff] %v8115_v48  ;;  %v2779_v36 = vmul.f32 %v8052_v18, %v2385_v22  ;;  %v8122_v28 = vadd.f32 %v7975_v44, %v2774_v32  ;;  %v8125_v25 = vmul.f32 %v5522_v63, %v8115_v48  ;;  %v5526_v22 = vpop.eup %5525  ;;  %v1547_v32 = vmul.f32 %v7919_v53, %v9379_v51 }
 0x5ae   : > { %3290 = vbcast.lane.b32.xlu1 %v9306_v20, 280  ;;  %v2373_v59 = vpop.permute.xlu1 %2372  ;;  %v5528_v48 = vpop.eup %5527  ;;  %5539 = vpow2.f32 %v1797_v41 }
 0x5af   : > { %9381 = vst [vmem:[#allocation140_spill] sm:$0xff] %v8122_v28  ;;  %v2776_v44 = vmul.f32 %v8052_v18, %v2373_v59  ;;  %v8137_v21 = vmul.f32 %v5524_v58, %v8122_v28  ;;  %v8142_v63 = vadd.f32 %v7991_v1, %v2779_v36  ;;  %v2594_v59 = vcombine.high %v9370_v40, %v9370_v40  ;;  %v5530_v38 = vpop.eup %5529 }
 0x5b0   : > { %3077 = vbcast.lane.b32.xlu0 %v9287_v42, 288  ;;  %v2396_v33 = vpop.permute.xlu0 %2395  ;;  %v1789_v1 = vmul.f32 1.442695, %v1542_v45  ;;  %v8156_v36 = vadd.f32 %v8006_v17, %v2772_v49  ;;  %v1799_v40 = vmul.f32 1.442695, %v1547_v32 }
 0x5b1   : > { %9383 = vst [vmem:[#allocation97_spill] sm:$0xff] %v8142_v63  ;;  %v2781_v15 = vmul.f32 %v8129_v43, %v2396_v33  ;;  %v8147_v16 = vadd.f32 %v8002_v8, %v2776_v44  ;;  %v8153_v53 = vmul.f32 %v5528_v48, %v8142_v63  ;;  %v5532_v44 = vpop.eup %5531  ;;  %v8178_v32 = vrot.slane %v2594_v59, %v9342_v35 }
 0x5b2   : > { %3506 = vbcast.lane.b32.xlu1 %v9327_v6, 280  ;;  %v2381_v58 = vpop.permute.xlu1 %2380  ;;  %9385 = vst [vmem:[#allocation69_spill] sm:$0xff] %v8156_v36  ;;  %v8172_v45 = vmul.f32 %v5532_v44, %v8156_v36  ;;  %5541 = vpow2.f32 %v1789_v1 }
 0x5b3   : > { %9384 = vst [vmem:[#allocation29_spill] sm:$0xff] %v8147_v16  ;;  %v2778_v33 = vmul.f32 %v8052_v18, %v2381_v58  ;;  %v8160_v3 = vadd.f32 %v8010_v55, %v2781_v15  ;;  %v8163_v8 = vmul.f32 %v5526_v22, %v8147_v16  ;;  %v5534_v55 = vpop.eup %5533  ;;  %v2596_v15 = vcombine.high %v9382_v23, %v9382_v23 }
 0x5b4   : > { %3294 = vbcast.lane.b32.xlu0 %v9306_v20, 288  ;;  %v2404_v24 = vpop.permute.xlu0 %2403  ;;  %5543 = vpow2.f32 %v1799_v40  ;;  %v5536_v41 = vpop.eup %5535 }
 0x5b5   : > { %9386 = vst [vmem:[#allocation90_spill] sm:$0xff] %v8160_v3  ;;  %v2783_v48 = vmul.f32 %v8129_v43, %v2404_v24  ;;  %v4511_v17 = vmul.f32 %v5530_v38, %v8160_v3  ;;  %v8169_v49 = vadd.f32 %v8023_v56, %v2778_v33  ;;  %v8191_v59 = vrot.slane %v2596_v15, %v9342_v35 }
 0x5b6   : > { %3722 = vbcast.lane.b32.xlu1 %v7898_v52, 280  ;;  %v2389_v22 = vpop.permute.xlu1 %2388 }
 0x5b7   : > { %9387 = vst [vmem:[#allocation59_spill] sm:$0xff] %v8169_v49  ;;  %v8181_v24 = vadd.f32 %v8030_v37, %v2783_v48  ;;  %v8184_v56 = vmul.f32 %v5534_v55, %v8169_v49  ;;  %v2780_v44 = vmul.f32 %v8052_v18, %v2389_v22 }
 0x5b8   : > { %3510 = vbcast.lane.b32.xlu0 %v9327_v6, 288  ;;  %v2431_v58 = vpop.permute.xlu0 %2430 }
 0x5b9   : > { %9388 = vst [vmem:[#allocation45_spill] sm:$0xff] %v8181_v24  ;;  %v2789_v23 = vmul.f32 %v8178_v32, %v2431_v58  ;;  %v4513_v38 = vmul.f32 %v5536_v41, %v8181_v24  ;;  %v1548_v41 = vmul.f32 %v7866_v26, %v9379_v51  ;;  %v5538_v15 = vpop.eup %5537  ;;  %v8218_v36 = vadd.f32 %v8084_v54, %v2780_v44 }
 0x5ba   : > { %3112 = vbcast.lane.b32.xlu1 %v9298_v61, 288  ;;  %v2400_v33 = vpop.permute.xlu1 %2399 }
 0x5bb   : > { %v2782_v37 = vmul.f32 %v8129_v43, %v2400_v33  ;;  %v8195_v1 = vadd.f32 %v8089_v30, %v2789_v23  ;;  %v5540_v22 = vpop.eup %5539  ;;  %9393 = vst [vmem:[#allocation35_spill] sm:$0xff] %v8218_v36 }
 0x5bc   : > { %3726 = vbcast.lane.b32.xlu0 %v7898_v52, 288  ;;  %v2466_v40 = vpop.permute.xlu0 %2465 }
 0x5bd   : > { %9389 = vst [vmem:[#allocation128_spill] sm:$0xff] %v8195_v1  ;;  %v2797_v48 = vmul.f32 %v8191_v59, %v2466_v40  ;;  %v8201_v55 = vadd.f32 %v8059_v34, %v2782_v37  ;;  %v1549_v34 = vmul.f32 %v7790_v7, %v9379_v51  ;;  %v1801_v40 = vmul.f32 1.442695, %v1548_v41 }
 0x5be   : > { %3329 = vbcast.lane.b32.xlu1 %v9317_v9, 288  ;;  %v2408_v58 = vpop.permute.xlu1 %2407 }
 0x5bf   : > { %9390 = vst [vmem:[#allocation40_spill] sm:$0xff] %v8201_v55  ;;  %v2784_v30 = vmul.f32 %v8129_v43, %v2408_v58  ;;  %v8207_v23 = vadd.f32 %v4511_v17, %v2797_v48  ;;  %v4512_v33 = vmul.f32 %v5538_v15, %v8201_v55  ;;  %v5542_v48 = vpop.eup %5541  ;;  %5545 = vpow2.f32 %v1801_v40 }
 0x5c0   : > { %3081 = vbcast.lane.b32.xlu0 %v9287_v42, 296  ;;  %v2412_v18 = vpop.permute.xlu0 %2411  ;;  %v8228_v41 = vmul.f32 %v5542_v48, %v8218_v36 }
 0x5c1   : > { %9391 = vst [vmem:[#allocation30_spill] sm:$0xff] %v8207_v23  ;;  %v2785_v37 = vmul.f32 %v8129_v43, %v2412_v18  ;;  %v8215_v26 = vadd.f32 %v8081_v60, %v2784_v30  ;;  %v5544_v63 = vpop.eup %5543  ;;  %v1803_v30 = vmul.f32 1.442695, %v1549_v34 }
 0x5c2   : > { %3545 = vbcast.lane.b32.xlu1 %v9339_v31, 288  ;;  %v2435_v17 = vpop.permute.xlu1 %2434 }
 0x5c3   : > { %9392 = vst [vmem:[#allocation72_spill] sm:$0xff] %v8215_v26  ;;  %v2790_v15 = vmul.f32 %v8178_v32, %v2435_v17  ;;  %v4514_v58 = vmul.f32 %v5540_v22, %v8215_v26  ;;  %v8224_v7 = vadd.f32 %v8048_v4, %v2785_v37  ;;  %5547 = vpow2.f32 %v1803_v30 }
 0x5c4   : > { %3298 = vbcast.lane.b32.xlu0 %v9306_v20, 296  ;;  %v2474_v60 = vpop.permute.xlu0 %2473 }
 0x5c5   : > { %9394 = vst [vmem:[#allocation110_spill] sm:$0xff] %v8224_v7  ;;  %v2799_v54 = vmul.f32 %v8191_v59, %v2474_v60  ;;  %v8232_v44 = vadd.f32 %v8137_v21, %v2790_v15  ;;  %v4515_v18 = vmul.f32 %v5544_v63, %v8224_v7 }
 0x5c6   : > { %3761 = vbcast.lane.b32.xlu1 %v7930_v0, 288  ;;  %v2470_v22 = vpop.permute.xlu1 %2469 }
 0x5c7   : > { %9395 = vst [vmem:[#allocation43_spill] sm:$0xff] %v8232_v44  ;;  %v2798_v4 = vmul.f32 %v8191_v59, %v2470_v22  ;;  %v8237_v37 = vadd.f32 %v4513_v38, %v2799_v54 }
 0x5c8   : > { %3514 = vbcast.lane.b32.xlu0 %v9327_v6, 296  ;;  %v2443_v34 = vpop.permute.xlu0 %2442 }
 0x5c9   : > { %9396 = vst [vmem:[#allocation41_spill] sm:$0xff] %v8237_v37  ;;  %v2792_v17 = vmul.f32 %v8178_v32, %v2443_v34  ;;  %v8241_v48 = vadd.f32 %v4512_v33, %v2798_v4 }
 0x5ca   : > { %3116 = vbcast.lane.b32.xlu1 %v9298_v61, 296  ;;  %v2439_v21 = vpop.permute.xlu1 %2438 }
 0x5cb   : > { %9397 = vst [vmem:[#allocation53_spill] sm:$0xff] %v8241_v48  ;;  %v2791_v63 = vmul.f32 %v8178_v32, %v2439_v21  ;;  %v8246_v40 = vadd.f32 %v8163_v8, %v2792_v17 }
 0x5cc   : > { %3730 = vbcast.lane.b32.xlu0 %v7898_v52, 296  ;;  %v2420_v38 = vpop.permute.xlu0 %2419  ;;  %v5546_v4 = vpop.eup %5545 }
 0x5cd   : > { %9398 = vst [vmem:[#allocation34_spill] sm:$0xff] %v8246_v40  ;;  %v8250_v15 = vadd.f32 %v8110_v57, %v2791_v63  ;;  %v2787_v54 = vmul.f32 %v8129_v43, %v2420_v38  ;;  %v1550_v63 = vmul.f32 %v7819_v12, %v9379_v51 }
 0x5ce   : > { %3333 = vbcast.lane.b32.xlu1 %v9317_v9, 296  ;;  %v2416_v60 = vpop.permute.xlu1 %2415 }
 0x5cf   : > { %9399 = vst [vmem:[#allocation44_spill] sm:$0xff] %v8250_v15  ;;  %v2786_v33 = vmul.f32 %v8129_v43, %v2416_v60  ;;  %v1805_v51 = vmul.f32 1.442695, %v1550_v63 }
 0x5d0   : > { %3085 = vbcast.lane.b32.xlu0 %v9287_v42, 304  ;;  %v2482_v30 = vpop.permute.xlu0 %2481 }
 0x5d1   : > { %v2801_v22 = vmul.f32 %v8191_v59, %v2482_v30  ;;  %v8258_v8 = vadd.f32 %v8100_v19, %v2786_v33  ;;  %v8272_v33 = vadd.f32 %v8103_v13, %v2787_v54  ;;  %v5548_v30 = vpop.eup %5547  ;;  %5549 = vpow2.f32 %v1805_v51 }
 0x5d2   : > { %3549 = vbcast.lane.b32.xlu1 %v9339_v31, 296  ;;  %v2478_v34 = vpop.permute.xlu1 %2477 }
 0x5d3   : > { %9400 = vst [vmem:[#allocation46_spill] sm:$0xff] %v8258_v8  ;;  %v2800_v57 = vmul.f32 %v8191_v59, %v2478_v34  ;;  %v8262_v17 = vadd.f32 %v4515_v18, %v2801_v22  ;;  %v4516_v21 = vmul.f32 %v5546_v4, %v8258_v8  ;;  %9403 = vst [vmem:[#allocation143_spill] sm:$0xff] %v8272_v33 }
 0x5d4   : > { %3302 = vbcast.lane.b32.xlu0 %v9306_v20, 304  ;;  %v2451_v38 = vpop.permute.xlu0 %2450  ;;  %v4517_v12 = vmul.f32 %v5548_v30, %v8272_v33 }
 0x5d5   : > { %9401 = vst [vmem:[#allocation42_spill] sm:$0xff] %v8262_v17  ;;  %v2794_v60 = vmul.f32 %v8178_v32, %v2451_v38  ;;  %v8269_v19 = vadd.f32 %v4514_v58, %v2800_v57 }
 0x5d6   : > { %3765 = vbcast.lane.b32.xlu1 %v7930_v0, 296  ;;  %v2447_v36 = vpop.permute.xlu1 %2446 }
 0x5d7   : > { %9402 = vst [vmem:[#allocation36_spill] sm:$0xff] %v8269_v19  ;;  %v2793_v18 = vmul.f32 %v8178_v32, %v2447_v36  ;;  %v8277_v22 = vadd.f32 %v8184_v56, %v2794_v60 }
 0x5d8   : > { %3518 = vbcast.lane.b32.xlu0 %v9327_v6, 304  ;;  %v2455_v4 = vpop.permute.xlu0 %2454 }
 0x5d9   : > { %9404 = vst [vmem:[#allocation144_spill] sm:$0xff] %v8277_v22  ;;  %v2795_v58 = vmul.f32 %v8178_v32, %v2455_v4  ;;  %v8283_v13 = vadd.f32 %v8125_v25, %v2793_v18 }
 0x5da   : > { %3120 = vbcast.lane.b32.xlu1 %v9298_v61, 304  ;;  %v2424_v54 = vpop.permute.xlu1 %2423 }
 0x5db   : > { %9405 = vst [vmem:[#allocation145_spill] sm:$0xff] %v8283_v13  ;;  %v8288_v56 = vadd.f32 %v8153_v53, %v2795_v58  ;;  %v2788_v60 = vmul.f32 %v8129_v43, %v2424_v54 }
 0x5dc   : > { %3734 = vbcast.lane.b32.xlu0 %v7898_v52, 304  ;;  %v2459_v36 = vpop.permute.xlu0 %2458 }
 0x5dd   : > { %9406 = vst [vmem:[#allocation146_spill] sm:$0xff] %v8288_v56  ;;  %v2796_v30 = vmul.f32 %v8178_v32, %v2459_v36  ;;  %v8306_v51 = vadd.f32 %v8172_v45, %v2788_v60  ;;  %v3920_v32 = vld [vmem:[#allocation5 + $0x8] sm:$0x3] }
 0x5de   : > { %3337 = vbcast.lane.b32.xlu1 %v9317_v9, 304  ;;  %v2486_v34 = vpop.permute.xlu1 %2485 }
 0x5df   : > { %v2802_v57 = vmul.f32 %v8191_v59, %v2486_v34  ;;  %9408 = vst [vmem:[#allocation148_spill] sm:$0xff] %v8306_v51  ;;  %v8312_v43 = vadd.f32 %v8228_v41, %v2796_v30  ;;  %v4352_v30 = vld [vmem:[#allocation5 + $0xc] sm:$0x3] }
 0x5e0   : > { %3089 = vbcast.lane.b32.xlu0 %v9287_v42, 312  ;;  %v8293_v63 = vpop.permute.xlu0 %3065 }
 0x5e1   : > { %v8295_v25 = vadd.f32 %v4516_v21, %v2802_v57  ;;  %v5550_v21 = vpop.eup %5549  ;;  %9409 = vst [vmem:[#allocation149_spill] sm:$0xff] %v8312_v43 }
 0x5e2   : > { %3553 = vbcast.lane.b32.xlu1 %v9339_v31, 304  ;;  %v2490_v38 = vpop.permute.xlu1 %2489  ;;  %v4518_v4 = vmul.f32 %v5550_v21, %v8306_v51 }
 0x5e3   : > { %9407 = vst [vmem:[#allocation147_spill] sm:$0xff] %v8295_v25  ;;  %v2803_v18 = vmul.f32 %v8191_v59, %v2490_v38 }
 0x5e4   : > { %3306 = vbcast.lane.b32.xlu0 %v9306_v20, 312 }
 0x5e5   : > { %v8301_v53 = vpop.permute.xlu0 %3100 }
 0x5e6   : > { %3769 = vbcast.lane.b32.xlu1 %v7930_v0, 304 }
 0x5e7   : > { %v2494_v42 = vpop.permute.xlu1 %2493 }
 0x5e8   : > { %3522 = vbcast.lane.b32.xlu0 %v9327_v6, 312  ;;  %v8318_v6 = vadd.f32 %v4517_v12, %v2803_v18  ;;  %v2804_v41 = vmul.f32 %v8191_v59, %v2494_v42  ;;  %v4136_v12 = vld [vmem:[#allocation5 + $0xa] sm:$0x3]  ;;  %v8363_v18 = vrot.slane %v4352_v30, %v9342_v35 }
 0x5e9   : > { %v8345_v59 = vrot.slane %v4136_v12, %v9342_v35  ;;  %v8354_v60 = vrot.slane %v4136_v12, %v9352_v39 }
 0x5ea   : > { %3124 = vbcast.lane.b32.xlu1 %v9298_v61, 312  ;;  %v8309_v20 = vpop.permute.xlu0 %3282  ;;  %9410 = vst [vmem:[#allocation150_spill] sm:$0xff] %v8318_v6  ;;  %v8324_v61 = vrot.slane %v3920_v32, %v9342_v35  ;;  %v8339_v34 = vadd.f32 %v4518_v4, %v2804_v41  ;;  %v8372_v4 = vrot.slane %v4352_v30, %v9352_v39  ;;  %v4568_v41 = vld [vmem:[#allocation5 + $0xe] sm:$0x3] }
 0x5eb   : > { %v8315_v58 = vpop.permute.xlu1 %3061  ;;  %v8381_v51 = vrot.slane %v4568_v41, %v9342_v35  ;;  %v8390_v6 = vrot.slane %v4568_v41, %v9352_v39 }
 0x5ec   : > { %3738 = vbcast.lane.b32.xlu0 %v7898_v52, 312  ;;  %v8334_v52 = vrot.slane %v3920_v32, %v9352_v39  ;;  %9411 = vst [vmem:[#allocation151_spill] sm:$0xff] %v8339_v34 }
 0x5ee   : > { %3341 = vbcast.lane.b32.xlu1 %v9317_v9, 312  ;;  %v8321_v45 = vpop.permute.xlu0 %3317 }
 0x5f0   : > { %v8326_v54 = vpop.permute.xlu1 %3096  ;;  %3926 = vbcast.lane.b32.xlu0 %v8324_v61, 256 }
 0x5f2   : > { %3557 = vbcast.lane.b32.xlu1 %v9339_v31, 312  ;;  %v8331_v36 = vpop.permute.xlu0 %3498 }
 0x5f4   : > { %v8336_v9 = vpop.permute.xlu1 %3278  ;;  %3961 = vbcast.lane.b32.xlu0 %v8334_v52, 256 }
 0x5f6   : > { %3773 = vbcast.lane.b32.xlu1 %v7930_v0, 312  ;;  %v8342_v57 = vpop.permute.xlu0 %3533 }
 0x5f8   : > { %v8347_v31 = vpop.permute.xlu1 %3313  ;;  %4142 = vbcast.lane.b32.xlu0 %v8345_v59, 256 }
 0x5fa   : > { %3930 = vbcast.lane.b32.xlu1 %v8324_v61, 264  ;;  %v8351_v38 = vpop.permute.xlu0 %3714 }
 0x5fc   : > { %v8356_v42 = vpop.permute.xlu1 %3494  ;;  %4177 = vbcast.lane.b32.xlu0 %v8354_v60, 256 }
 0x5fe   : > { %3965 = vbcast.lane.b32.xlu1 %v8334_v52, 264  ;;  %v8360_v0 = vpop.permute.xlu0 %3749 }
 0x600   : > { %v8365_v21 = vpop.permute.xlu1 %3529  ;;  %4358 = vbcast.lane.b32.xlu0 %v8363_v18, 256 }
 0x602   : > { %4146 = vbcast.lane.b32.xlu1 %v8345_v59, 264  ;;  %v8369_v32 = vpop.permute.xlu0 %3069 }
 0x604   : > { %v8374_v12 = vpop.permute.xlu1 %3710  ;;  %4393 = vbcast.lane.b32.xlu0 %v8372_v4, 256 }
 0x606   : > { %4181 = vbcast.lane.b32.xlu1 %v8354_v60, 264  ;;  %v8378_v34 = vpop.permute.xlu0 %3286 }
 0x608   : > { %v8383_v43 = vpop.permute.xlu1 %3745  ;;  %4574 = vbcast.lane.b32.xlu0 %v8381_v51, 256 }
 0x60a   : > { %4362 = vbcast.lane.b32.xlu1 %v8363_v18, 264  ;;  %v8387_v30 = vpop.permute.xlu0 %3502 }
 0x60c   : > { %v8392_v33 = vpop.permute.xlu1 %3104  ;;  %4609 = vbcast.lane.b32.xlu0 %v8390_v6, 256 }
 0x60e   : > { %4397 = vbcast.lane.b32.xlu1 %v8372_v4, 264  ;;  %v8396_v56 = vpop.permute.xlu0 %3718 }
 0x610   : > { %v8398_v35 = vpop.permute.xlu1 %3321  ;;  %3969 = vbcast.lane.b32.xlu0 %v8334_v52, 272 }
 0x612   : > { %4578 = vbcast.lane.b32.xlu1 %v8381_v51, 264  ;;  %v8402_v25 = vpop.permute.xlu0 %3108 }
 0x614   : > { %v8404_v8 = vpop.permute.xlu1 %3537  ;;  %4185 = vbcast.lane.b32.xlu0 %v8354_v60, 272 }
 0x616   : > { %4613 = vbcast.lane.b32.xlu1 %v8390_v6, 264  ;;  %v8408_v39 = vpop.permute.xlu0 %3325 }
 0x618   : > { %v8410_v41 = vpop.permute.xlu1 %3753  ;;  %4401 = vbcast.lane.b32.xlu0 %v8372_v4, 272 }
 0x619   : > { %9412 = vst [vmem:[#allocation152_spill] sm:$0xff] %v8410_v41 }
 0x61a   : > { %3934 = vbcast.lane.b32.xlu1 %v8324_v61, 272  ;;  %v8414_v22 = vpop.permute.xlu0 %3541 }
 0x61b   : > { %9413 = vst [vmem:[#allocation153_spill] sm:$0xff] %v8414_v22  ;;  %v9427_v22 = vld [vmem:[#allocation47_spill] sm:$0xff] }
 0x61c   : > { %v8416_v49 = vpop.permute.xlu1 %3073  ;;  %4617 = vbcast.lane.b32.xlu0 %v8390_v6, 272 }
 0x61e   : > { %4150 = vbcast.lane.b32.xlu1 %v8345_v59, 272  ;;  %v8420_v17 = vpop.permute.xlu0 %3757 }
 0x61f   : > { %9414 = vst [vmem:[#allocation154_spill] sm:$0xff] %v8420_v17  ;;  %v9426_v17 = vld [vmem:[#allocation91_spill] sm:$0xff] }
 0x620   : > { %v8422_v7 = vpop.permute.xlu1 %3290  ;;  %3938 = vbcast.lane.b32.xlu0 %v8324_v61, 280 }
 0x622   : > { %4366 = vbcast.lane.b32.xlu1 %v8363_v18, 272  ;;  %v8426_v13 = vpop.permute.xlu0 %3077 }
 0x624   : > { %v8428_v19 = vpop.permute.xlu1 %3506  ;;  %4154 = vbcast.lane.b32.xlu0 %v8345_v59, 280 }
 0x626   : > { %4582 = vbcast.lane.b32.xlu1 %v8381_v51, 272  ;;  %v8432_v26 = vpop.permute.xlu0 %3294 }
 0x628   : > { %v8434_v40 = vpop.permute.xlu1 %3722  ;;  %4370 = vbcast.lane.b32.xlu0 %v8363_v18, 280 }
 0x629   : > { %9415 = vst [vmem:[#allocation155_spill] sm:$0xff] %v8434_v40 }
 0x62a   : > { %3973 = vbcast.lane.b32.xlu1 %v8334_v52, 280  ;;  %v8438_v16 = vpop.permute.xlu0 %3510 }
 0x62c   : > { %v8440_v15 = vpop.permute.xlu1 %3112  ;;  %4586 = vbcast.lane.b32.xlu0 %v8381_v51, 280 }
 0x62d   : > { %9416 = vst [vmem:[#allocation156_spill] sm:$0xff] %v8440_v15  ;;  %v9431_v15 = vld [vmem:[#allocation85_spill] sm:$0xff] }
 0x62e   : > { %4189 = vbcast.lane.b32.xlu1 %v8354_v60, 280  ;;  %v8444_v37 = vpop.permute.xlu0 %3726  ;;  %v3135_v40 = vmul.f32 %v8301_v53, %v9431_v15 }
 0x62f   : > { %9417 = vst [vmem:[#allocation157_spill] sm:$0xff] %v8444_v37 }
 0x630   : > { %v8446_v24 = vpop.permute.xlu1 %3329  ;;  %3942 = vbcast.lane.b32.xlu0 %v8324_v61, 288 }
 0x631   : > { %9418 = vst [vmem:[#allocation158_spill] sm:$0xff] %v8446_v24  ;;  %v3126_v24 = vmul.f32 %v8315_v58, %v9426_v17 }
 0x632   : > { %4405 = vbcast.lane.b32.xlu1 %v8372_v4, 280  ;;  %v3082_v48 = vpop.permute.xlu0 %3081 }
 0x634   : > { %v8450_v44 = vpop.permute.xlu1 %3545  ;;  %4158 = vbcast.lane.b32.xlu0 %v8345_v59, 288 }
 0x635   : > { %9419 = vst [vmem:[#allocation159_spill] sm:$0xff] %v8450_v44  ;;  %v4701_v44 = vmul.f32 1.442695, %v4699_v2  ;;  %v9432_v2 = vld [vmem:[#allocation78_spill] sm:$0xff] }
 0x636   : > { %4621 = vbcast.lane.b32.xlu1 %v8390_v6, 280  ;;  %v8454_v55 = vpop.permute.xlu0 %3298  ;;  %v3351_v41 = vmul.f32 %v8347_v31, %v9432_v2  ;;  %v3567_v31 = vmul.f32 %v8365_v21, %v7600_v14  ;;  %v9441_v21 = vld [vmem:[#allocation109_spill] sm:$0xff] }
 0x637   : > { %5551 = vpow2.f32 %v4701_v44  ;;  %v3560_v44 = vmul.f32 %v8331_v36, %v7560_v50 }
 0x638   : > { %v8456_v23 = vpop.permute.xlu1 %3761  ;;  %4374 = vbcast.lane.b32.xlu0 %v8363_v18, 288 }
 0x639   : > { %9420 = vst [vmem:[#allocation160_spill] sm:$0xff] %v8456_v23 }
 0x63a   : > { %3977 = vbcast.lane.b32.xlu1 %v8334_v52, 288  ;;  %v8460_v28 = vpop.permute.xlu0 %3514 }
 0x63b   : > { %9421 = vst [vmem:[#allocation161_spill] sm:$0xff] %v8460_v28 }
 0x63c   : > { %v8462_v1 = vpop.permute.xlu1 %3116  ;;  %4590 = vbcast.lane.b32.xlu0 %v8381_v51, 288 }
 0x63d   : > { %9422 = vst [vmem:[#allocation162_spill] sm:$0xff] %v8462_v1  ;;  %v3134_v1 = vmul.f32 %v8326_v54, %v9427_v22  ;;  %v9433_v22 = vld [vmem:[#allocation77_spill] sm:$0xff]  ;;  %v9434_v54 = vld [vmem:[#allocation104_spill] sm:$0xff] }
 0x63e   : > { %4193 = vbcast.lane.b32.xlu1 %v8354_v60, 288  ;;  %v8466_v3 = vpop.permute.xlu0 %3730  ;;  %v3344_v58 = vmul.f32 %v8309_v20, %v9433_v22 }
 0x63f   : > { %9423 = vst [vmem:[#allocation163_spill] sm:$0xff] %v8466_v3  ;;  %v9429_v3 = vld [vmem:[#allocation74_spill] sm:$0xff]  ;;  %v3155_v53 = vadd.f32 %v3135_v40, %v3134_v1  ;;  %v3776_v1 = vmul.f32 %v8351_v38, %v7621_v27  ;;  %v9439_v40 = vld [vmem:[#allocation73_spill] sm:$0xff]  ;;  %v3784_v27 = vmul.f32 %v8360_v0, %v7777_v10 }
 0x640   : > { %v8469_v11 = vpop.permute.xlu1 %3333  ;;  %3946 = vbcast.lane.b32.xlu0 %v8324_v61, 296  ;;  %v3343_v47 = vmul.f32 %v8336_v9, %v9429_v3  ;;  %v3559_v3 = vmul.f32 %v8356_v42, %v9434_v54  ;;  %v9435_v9 = vld [vmem:[#allocation133_spill] sm:$0xff]  ;;  %v3568_v42 = vmul.f32 %v8342_v57, %v7658_v46  ;;  %v3783_v46 = vmul.f32 %v8383_v43, %v7677_v5  ;;  %v9444_v54 = vld [vmem:[#allocation52_spill] sm:$0xff] }
 0x641   : > { %9425 = vst [vmem:[#allocation164_spill] sm:$0xff] %v8469_v11  ;;  %v9430_v11 = vld [vmem:[#allocation127_spill] sm:$0xff]  ;;  %v3777_v5 = vmul.f32 %v8396_v56, %v7565_v62  ;;  %v3131_v10 = vmul.f32 %v3082_v48, %v9444_v54  ;;  %v9447_v56 = vld [vmem:[#allocation86_spill] sm:$0xff]  ;;  %v9460_v54 = vld [vmem:[#allocation156_spill] sm:$0xff] }
 0x642   : > { %4409 = vbcast.lane.b32.xlu1 %v8372_v4, 288  ;;  %v3086_v23 = vpop.permute.xlu0 %3085  ;;  %v3127_v28 = vmul.f32 %v8293_v63, %v9430_v11  ;;  %v3128_v11 = vmul.f32 %v8369_v32, %v9435_v9  ;;  %v3359_v20 = vadd.f32 %v3344_v58, %v3343_v47  ;;  %v9437_v32 = vld [vmem:[#allocation141_spill] sm:$0xff]  ;;  %v3575_v47 = vadd.f32 %v3560_v44, %v3559_v3  ;;  %v9443_v58 = vld [vmem:[#allocation75_spill] sm:$0xff] }
 0x643   : > { %v3588_v38 = vadd.f32 %v3568_v42, %v3567_v31  ;;  %v9445_v9 = vld [vmem:[#allocation101_spill] sm:$0xff]  ;;  %v3347_v31 = vmul.f32 %v8432_v26, %v9447_v56  ;;  %v9465_v56 = vld [vmem:[#allocation106_spill] sm:$0xff] }
 0x644   : > { %v8477_v37 = vpop.permute.xlu1 %3549  ;;  %4162 = vbcast.lane.b32.xlu0 %v8345_v59, 296  ;;  %v3142_v63 = vadd.f32 %v3127_v28, %v3126_v24  ;;  %v3129_v28 = vmul.f32 %v8416_v49, %v9437_v32  ;;  %v9440_v49 = vld [vmem:[#allocation136_spill] sm:$0xff] }
 0x645   : > { %9428 = vst [vmem:[#allocation91_spill] sm:$0xff] %v8477_v37  ;;  %v9436_v37 = vld [vmem:[#allocation107_spill] sm:$0xff]  ;;  %v3130_v57 = vmul.f32 %v8426_v13, %v9440_v49  ;;  %v3346_v13 = vmul.f32 %v8422_v7, %v9443_v58 }
 0x646   : > { %4625 = vbcast.lane.b32.xlu1 %v8390_v6, 288  ;;  %v8489_v17 = vpop.permute.xlu0 %3302  ;;  %v3352_v15 = vmul.f32 %v8321_v45, %v9436_v37  ;;  %v9438_v37 = vld [vmem:[#allocation108_spill] sm:$0xff]  ;;  %v3345_v45 = vmul.f32 %v8378_v34, %v9439_v40  ;;  %v3143_v36 = vadd.f32 %v3142_v63, %v3128_v11  ;;  %v9446_v11 = vld [vmem:[#allocation62_spill] sm:$0xff]  ;;  %v9448_v7 = vld [vmem:[#allocation67_spill] sm:$0xff] }
 0x647   : > { %v3775_v14 = vmul.f32 %v8374_v12, %v9438_v37  ;;  %v3561_v12 = vmul.f32 %v8387_v30, %v9441_v21  ;;  %v9442_v34 = vld [vmem:[#allocation60_spill] sm:$0xff]  ;;  %v3353_v30 = vmul.f32 %v8398_v35, %v9445_v9  ;;  %v3132_v44 = vmul.f32 %v3086_v23, %v9448_v7  ;;  %v9450_v35 = vld [vmem:[#allocation123_spill] sm:$0xff] }
 0x648   : > { %v8501_v2 = vpop.permute.xlu1 %3765  ;;  %4378 = vbcast.lane.b32.xlu0 %v8363_v18, 296  ;;  %v3372_v24 = vadd.f32 %v3352_v15, %v3351_v41  ;;  %v3136_v41 = vmul.f32 %v8392_v33, %v9442_v34  ;;  %v3144_v43 = vadd.f32 %v3143_v36, %v3129_v28  ;;  %v3360_v3 = vadd.f32 %v3359_v20, %v3345_v45  ;;  %v9449_v20 = vld [vmem:[#allocation71_spill] sm:$0xff]  ;;  %v9455_v21 = vld [vmem:[#allocation48_spill] sm:$0xff]  ;;  %v8564_v34 = vpop.eup %5551 }
 0x649   : > { %v3791_v0 = vadd.f32 %v3776_v1, %v3775_v14  ;;  %v3137_v33 = vmul.f32 %v8402_v25, %v9446_v11  ;;  %v3804_v15 = vadd.f32 %v3784_v27, %v3783_v46  ;;  %v3576_v48 = vadd.f32 %v3575_v47, %v3561_v12  ;;  %v9451_v40 = vld [vmem:[#allocation95_spill] sm:$0xff]  ;;  %v9452_v47 = vld [vmem:[#allocation117_spill] sm:$0xff] }
 0x64a   : > { %3981 = vbcast.lane.b32.xlu1 %v8334_v52, 296  ;;  %v8517_v50 = vpop.permute.xlu0 %3518  ;;  %v3145_v62 = vadd.f32 %v3144_v43, %v3130_v57  ;;  %v3156_v42 = vadd.f32 %v3155_v53, %v3136_v41  ;;  %v3569_v32 = vmul.f32 %v8404_v8, %v9449_v20  ;;  %v3562_v28 = vmul.f32 %v8428_v19, %v9450_v35  ;;  %v9453_v36 = vld [vmem:[#allocation119_spill] sm:$0xff]  ;;  %v9468_v35 = vld [vmem:[#allocation114_spill] sm:$0xff] }
 0x64b   : > { %v3792_v1 = vadd.f32 %v3791_v0, %v3777_v5  ;;  %v3361_v37 = vadd.f32 %v3360_v3, %v3346_v13  ;;  %v3348_v26 = vmul.f32 %v8454_v55, %v9451_v40  ;;  %v3373_v45 = vadd.f32 %v3372_v24, %v3353_v30  ;;  %v9454_v57 = vld [vmem:[#allocation103_spill] sm:$0xff]  ;;  %v9456_v24 = vld [vmem:[#allocation152_spill] sm:$0xff]  ;;  %v9457_v5 = vld [vmem:[#allocation81_spill] sm:$0xff] }
 0x64c   : > { %v8529_v22 = vpop.permute.xlu1 %3120  ;;  %4594 = vbcast.lane.b32.xlu0 %v8381_v51, 296  ;;  %v3146_v14 = vadd.f32 %v3145_v62, %v3131_v10  ;;  %v3157_v23 = vadd.f32 %v3156_v42, %v3137_v33  ;;  %v3354_v53 = vmul.f32 %v8408_v39, %v9452_v47  ;;  %v3563_v8 = vmul.f32 %v8438_v16, %v9453_v36  ;;  %v9458_v43 = vld [vmem:[#allocation155_spill] sm:$0xff]  ;;  %v9459_v13 = vld [vmem:[#allocation88_spill] sm:$0xff]  ;;  %v9461_v0 = vld [vmem:[#allocation105_spill] sm:$0xff] }
 0x64d   : > { %v3362_v46 = vadd.f32 %v3361_v37, %v3347_v31  ;;  %v3349_v27 = vmul.f32 %v8489_v17, %v9454_v57  ;;  %v3589_v55 = vadd.f32 %v3588_v38, %v3569_v32  ;;  %v3785_v41 = vmul.f32 %v9456_v24, %v7713_v29  ;;  %v9462_v3 = vld [vmem:[#allocation161_spill] sm:$0xff]  ;;  %v9463_v33 = vld [vmem:[#allocation122_spill] sm:$0xff] }
 0x64e   : > { %4197 = vbcast.lane.b32.xlu1 %v8354_v60, 296  ;;  %v8542_v63 = vpop.permute.xlu0 %3734  ;;  %v3147_v49 = vadd.f32 %v3146_v14, %v3132_v44  ;;  %v3577_v39 = vadd.f32 %v3576_v48, %v3562_v28  ;;  %v3778_v16 = vmul.f32 %v9458_v43, %v9457_v5  ;;  %v3138_v10 = vmul.f32 %v9460_v54, %v9459_v13  ;;  %v9464_v29 = vld [vmem:[#allocation157_spill] sm:$0xff]  ;;  %v9466_v31 = vld [vmem:[#allocation162_spill] sm:$0xff]  ;;  %v9479_v13 = vld [vmem:[#allocation164_spill] sm:$0xff] }
 0x64f   : > { %v3363_v17 = vadd.f32 %v3362_v46, %v3348_v26  ;;  %v3564_v9 = vmul.f32 %v9462_v3, %v9461_v0  ;;  %v3374_v38 = vadd.f32 %v3373_v45, %v3354_v53  ;;  %v3779_v62 = vmul.f32 %v9464_v29, %v9463_v33  ;;  %v9467_v42 = vld [vmem:[#allocation113_spill] sm:$0xff]  ;;  %v9469_v14 = vld [vmem:[#allocation70_spill] sm:$0xff]  ;;  %v9482_v3 = vld [vmem:[#allocation159_spill] sm:$0xff] }
 0x650   : > { %v8551_v25 = vpop.permute.xlu1 %3337  ;;  %3950 = vbcast.lane.b32.xlu0 %v8324_v61, 304  ;;  %v3578_v11 = vadd.f32 %v3577_v39, %v3563_v8  ;;  %v3139_v7 = vmul.f32 %v9466_v31, %v9465_v56  ;;  %v3565_v20 = vmul.f32 %v8517_v50, %v9467_v42  ;;  %v3805_v37 = vadd.f32 %v3804_v15, %v3785_v41  ;;  %v9470_v40 = vld [vmem:[#allocation153_spill] sm:$0xff]  ;;  %v9471_v47 = vld [vmem:[#allocation94_spill] sm:$0xff]  ;;  %v9477_v41 = vld [vmem:[#allocation163_spill] sm:$0xff] }
 0x651   : > { %v3364_v48 = vadd.f32 %v3363_v17, %v3349_v27  ;;  %v3570_v26 = vmul.f32 %v9470_v40, %v9469_v14  ;;  %v3793_v45 = vadd.f32 %v3792_v1, %v3778_v16  ;;  %v9472_v53 = vld [vmem:[#allocation158_spill] sm:$0xff]  ;;  %v9478_v16 = vld [vmem:[#allocation83_spill] sm:$0xff]  ;;  %v9481_v0 = vld [vmem:[#allocation49_spill] sm:$0xff] }
 0x652   : > { %4413 = vbcast.lane.b32.xlu1 %v8372_v4, 296  ;;  %v3090_v19 = vpop.permute.xlu0 %3089  ;;  %v3355_v36 = vmul.f32 %v9472_v53, %v9471_v47  ;;  %v3579_v46 = vadd.f32 %v3578_v11, %v3564_v9  ;;  %v9474_v27 = vld [vmem:[#allocation134_spill] sm:$0xff]  ;;  %v3571_v9 = vmul.f32 %v9482_v3, %v9481_v0  ;;  %v9484_v56 = vld [vmem:[#allocation120_spill] sm:$0xff]  ;;  %v9487_v14 = vld [vmem:[#allocation91_spill] sm:$0xff] }
 0x653   : > { %v3133_v12 = vmul.f32 %v3090_v19, %v9455_v21  ;;  %v3158_v19 = vadd.f32 %v3157_v23, %v3138_v10  ;;  %v9475_v21 = vld [vmem:[#allocation154_spill] sm:$0xff]  ;;  %v3356_v23 = vmul.f32 %v9479_v13, %v9478_v16  ;;  %v9480_v10 = vld [vmem:[#allocation121_spill] sm:$0xff]  ;;  %v3357_v31 = vmul.f32 %v8551_v25, %v9484_v56  ;;  %v9488_v53 = vld [vmem:[#allocation100_spill] sm:$0xff] }
 0x654   : > { %v8570_v58 = vpop.permute.xlu1 %3553  ;;  %4166 = vbcast.lane.b32.xlu0 %v8345_v59, 304  ;;  %v3786_v15 = vmul.f32 %v9475_v21, %v9474_v27  ;;  %v9476_v24 = vld [vmem:[#allocation50_spill] sm:$0xff]  ;;  %v3580_v54 = vadd.f32 %v3579_v46, %v3565_v20  ;;  %v3590_v42 = vadd.f32 %v3589_v55, %v3570_v26  ;;  %v9491_v27 = vld [vmem:[#allocation80_spill] sm:$0xff]  ;;  %v9493_v16 = vld [vmem:[#allocation65_spill] sm:$0xff] }
 0x655   : > { %v3148_v30 = vadd.f32 %v3147_v49, %v3133_v12  ;;  %v9473_v49 = vld [vmem:[#allocation63_spill] sm:$0xff]  ;;  %v3794_v12 = vadd.f32 %v3793_v45, %v3779_v62  ;;  %v3780_v1 = vmul.f32 %v9477_v41, %v9476_v24  ;;  %v3159_v43 = vadd.f32 %v3158_v19, %v3139_v7  ;;  %v9483_v11 = vld [vmem:[#allocation126_spill] sm:$0xff]  ;;  %v9495_v3 = vld [vmem:[#allocation92_spill] sm:$0xff] }
 0x656   : > { %4629 = vbcast.lane.b32.xlu1 %v8390_v6, 296  ;;  %v3307_v44 = vpop.permute.xlu0 %3306  ;;  %v3140_v50 = vmul.f32 %v8529_v22, %v9473_v49  ;;  %v3375_v22 = vadd.f32 %v3374_v38, %v3355_v36  ;;  %v3781_v33 = vmul.f32 %v8542_v63, %v9483_v11  ;;  %v3806_v20 = vadd.f32 %v3805_v37, %v3786_v15  ;;  %v9486_v63 = vld [vmem:[#allocation99_spill] sm:$0xff]  ;;  %v9489_v36 = vld [vmem:[#allocation160_spill] sm:$0xff]  ;;  %v9490_v49 = vld [vmem:[#allocation130_spill] sm:$0xff] }
 0x657   : > { %v3149_v32 = vrot.slane %v3148_v30, 4  ;;  %v3350_v28 = vmul.f32 %v3307_v44, %v9468_v35  ;;  %v9485_v44 = vld [vmem:[#allocation57_spill] sm:$0xff]  ;;  %v3795_v38 = vadd.f32 %v3794_v12, %v3780_v1  ;;  %v3572_v40 = vmul.f32 %v9487_v14, %v9486_v63  ;;  %v9492_v1 = vld [vmem:[#allocation56_spill] sm:$0xff]  ;;  %v9498_v63 = vld [vmem:[#allocation115_spill] sm:$0xff] }
 0x658   : > { %v8589_v8 = vpop.permute.xlu1 %3769  ;;  %4382 = vbcast.lane.b32.xlu0 %v8363_v18, 304  ;;  %v3787_v19 = vmul.f32 %v9489_v36, %v9488_v53  ;;  %v3591_v37 = vadd.f32 %v3590_v42, %v3571_v9  ;;  %v3573_v21 = vmul.f32 %v8570_v58, %v9491_v27  ;;  %v3788_v13 = vmul.f32 %v8501_v2, %v9493_v16  ;;  %v9497_v42 = vld [vmem:[#allocation76_spill] sm:$0xff] }
 0x659   : > { %v3365_v57 = vadd.f32 %v3364_v48, %v3350_v28  ;;  %v3150_v39 = vadd.f32 %v3149_v32, %v3148_v30  ;;  %v3160_v30 = vadd.f32 %v3159_v43, %v3140_v50  ;;  %v3376_v28 = vadd.f32 %v3375_v22, %v3356_v23 }
 0x65a   : > { %3985 = vbcast.lane.b32.xlu1 %v8334_v52, 304  ;;  %v3523_v5 = vpop.permute.xlu0 %3522  ;;  %v3796_v25 = vadd.f32 %v3795_v38, %v3781_v33  ;;  %v3789_v9 = vmul.f32 %v8589_v8, %v9495_v3  ;;  %v9496_v33 = vld [vmem:[#allocation68_spill] sm:$0xff] }
 0x65b   : > { %v3566_v17 = vmul.f32 %v3523_v5, %v9480_v10  ;;  %v3366_v29 = vrot.slane %v3365_v57, 4  ;;  %v3151_v32 = vrot.slane %v3150_v39, 2  ;;  %v3377_v26 = vadd.f32 %v3376_v28, %v3357_v31 }
 0x65c   : > { %v3125_v62 = vpop.permute.xlu1 %3124  ;;  %4598 = vbcast.lane.b32.xlu0 %v8381_v51, 304  ;;  %v3807_v10 = vadd.f32 %v3806_v20, %v3787_v19 }
 0x65d   : > { %v3581_v7 = vadd.f32 %v3580_v54, %v3566_v17  ;;  %v3141_v48 = vmul.f32 %v3125_v62, %v9485_v44  ;;  %v3367_v46 = vadd.f32 %v3366_v29, %v3365_v57  ;;  %v3152_v12 = vadd.f32 %v3151_v32, %v3150_v39 }
 0x65e   : > { %4201 = vbcast.lane.b32.xlu1 %v8354_v60, 304  ;;  %v3739_v35 = vpop.permute.xlu0 %3738  ;;  %v3592_v57 = vadd.f32 %v3591_v37, %v3572_v40 }
 0x65f   : > { %v3582_v45 = vrot.slane %v3581_v7, 4  ;;  %v3161_v47 = vadd.f32 %v3160_v30, %v3141_v48  ;;  %v3782_v50 = vmul.f32 %v3739_v35, %v9490_v49  ;;  %v3368_v17 = vrot.slane %v3367_v46, 2  ;;  %v9499_v49 = vld [vmem:[#allocation58_spill] sm:$0xff] }
 0x660   : > { %v3342_v55 = vpop.permute.xlu1 %3341  ;;  %3954 = vbcast.lane.b32.xlu0 %v8324_v61, 312  ;;  %v9494_v61 = vld [vmem:[#allocation112_spill] sm:$0xff]  ;;  %v3593_v39 = vadd.f32 %v3592_v57, %v3573_v21  ;;  %v3153_v62 = vrot.slane %v3152_v12, 1 }
 0x661   : > { %v3162_v15 = vrot.slane %v3161_v47, 4  ;;  %v3583_v24 = vadd.f32 %v3582_v45, %v3581_v7  ;;  %v3797_v41 = vadd.f32 %v3796_v25, %v3782_v50  ;;  %v3358_v5 = vmul.f32 %v3342_v55, %v9492_v1 }
 0x662   : > { %4417 = vbcast.lane.b32.xlu1 %v8372_v4, 304  ;;  %v3927_v43 = vpop.permute.xlu0 %3926  ;;  %v3808_v7 = vadd.f32 %v3807_v10, %v3788_v13  ;;  %v3154_v40 = vadd.f32 %v3153_v62, %v3152_v12 }
 0x663   : > { %v3163_v23 = vadd.f32 %v3162_v15, %v3161_v47  ;;  %v3991_v54 = vmul.f32 %v3927_v43, %v9494_v61  ;;  %v3798_v22 = vrot.slane %v3797_v41, 4  ;;  %v3378_v58 = vadd.f32 %v3377_v26, %v3358_v5  ;;  %v9500_v15 = vld [vmem:[#allocation87_spill] sm:$0xff] }
 0x664   : > { %v3558_v0 = vpop.permute.xlu1 %3557  ;;  %4170 = vbcast.lane.b32.xlu0 %v8345_v59, 312  ;;  %v3584_v30 = vrot.slane %v3583_v24, 2  ;;  %v3369_v59 = vadd.f32 %v3368_v17, %v3367_v46  ;;  %v3809_v8 = vadd.f32 %v3808_v7, %v3789_v9 }
 0x665   : > { %v3164_v11 = vrot.slane %v3163_v23, 2  ;;  %v3574_v29 = vmul.f32 %v3558_v0, %v9496_v33  ;;  %v3799_v2 = vadd.f32 %v3798_v22, %v3797_v41  ;;  %v3379_v56 = vrot.slane %v3378_v58, 4  ;;  %v9503_v33 = vld [vmem:[#allocation89_spill] sm:$0xff] }
 0x666   : > { %4633 = vbcast.lane.b32.xlu1 %v8390_v6, 304  ;;  %v3962_v31 = vpop.permute.xlu0 %3961  ;;  %v3585_v45 = vadd.f32 %v3584_v30, %v3583_v24  ;;  %v3370_v55 = vrot.slane %v3369_v59, 1  ;;  %v4705_v24 = vadd.f32 1.0, %v8564_v34 }
 0x667   : > { %v3165_v44 = vadd.f32 %v3164_v11, %v3163_v23  ;;  %v3594_v48 = vadd.f32 %v3593_v39, %v3574_v29  ;;  %v3999_v20 = vmul.f32 %v3962_v31, %v9497_v42  ;;  %v3380_v38 = vadd.f32 %v3379_v56, %v3378_v58  ;;  %v9502_v58 = vld [vmem:[#allocation96_spill] sm:$0xff]  ;;  %v9504_v56 = vld [vmem:[#allocation55_spill] sm:$0xff] }
 0x668   : > { %v3774_v32 = vpop.permute.xlu1 %3773  ;;  %4386 = vbcast.lane.b32.xlu0 %v8363_v18, 312  ;;  %v3800_v47 = vrot.slane %v3799_v2, 2  ;;  %v3371_v23 = vadd.f32 %v3370_v55, %v3369_v59  ;;  %5553 = vrcp.f32 %v4705_v24  ;;  %v9512_v24 = vld [vmem:[#allocation40_spill] sm:$0xff] }
 0x669   : > { %v3166_v35 = vrot.slane %v3165_v44, 1  ;;  %v3595_v28 = vrot.slane %v3594_v48, 4  ;;  %v3790_v14 = vmul.f32 %v3774_v32, %v9498_v63  ;;  %v3381_v53 = vrot.slane %v3380_v38, 2  ;;  %v4726_v63 = vld [vmem:[%s6166_s20 + $0x68] sm:$0xff] }
 0x66a   : > { %3989 = vbcast.lane.b32.xlu1 %v8334_v52, 312  ;;  %v4143_v36 = vpop.permute.xlu0 %4142  ;;  %v3586_v52 = vrot.slane %v3585_v45, 1  ;;  %v3801_v41 = vadd.f32 %v3800_v47, %v3799_v2 }
 0x66b   : > { %v3167_v19 = vadd.f32 %v3166_v35, %v3165_v44  ;;  %v3596_v25 = vadd.f32 %v3595_v28, %v3594_v48  ;;  %v3810_v46 = vadd.f32 %v3809_v8, %v3790_v14  ;;  %v4207_v50 = vmul.f32 %v4143_v36, %v9499_v49  ;;  %v4728_v44 = vld [vmem:[%s6166_s20 + $0x78] sm:$0xff]  ;;  %v9506_v35 = vld [vmem:[#allocation66_spill] sm:$0xff]  ;;  %v4725_v14 = vld [vmem:[%s6166_s20 + $0x60] sm:$0xff] }
 0x66c   : > { %v3382_v37 = vadd.f32 %v3381_v53, %v3380_v38  ;;  %v3931_v18 = vpop.permute.xlu1 %3930  ;;  %4602 = vbcast.lane.b32.xlu0 %v8381_v51, 312  ;;  %v9501_v51 = vld [vmem:[#allocation82_spill] sm:$0xff]  ;;  %v3587_v0 = vadd.f32 %v3586_v52, %v3585_v45  ;;  %v3802_v39 = vrot.slane %v3801_v41, 1  ;;  %5125 = vmatprep.subr.mxu0 %v4728_v44  ;;  %v9507_v45 = vld [vmem:[#allocation128_spill] sm:$0xff]  ;;  %v4724_v36 = vld [vmem:[%s6166_s20 + $0x58] sm:$0xff] }
 0x66d   : > { %v3171_v26 = vsel %vm3170_vm14, %v3167_v19, %v3154_v40  ;;  %v3597_v27 = vrot.slane %v3596_v25, 2  ;;  %v3811_v21 = vrot.slane %v3810_v46, 4  ;;  %v3992_v12 = vmul.f32 %v3931_v18, %v9500_v15  ;;  %5126 = vmatpush3.msra.mxu0 %v4728_v44  ;;  %v8665_v19 = vld [vmem:[%s755_s14] ss:$0 sm:$0xff]  ;;  %v9510_v18 = vld [vmem:[#allocation30_spill] sm:$0xff] }
 0x66e   : > { %3173 = vst [vmem:[#allocation7] sm:$0x3] %v3171_v26  ;;  %v3383_v1 = vrot.slane %v3382_v37, 1  ;;  %4205 = vbcast.lane.b32.xlu1 %v8354_v60, 312  ;;  %v4178_v5 = vpop.permute.xlu0 %4177  ;;  %v3803_v48 = vadd.f32 %v3802_v39, %v3801_v41 }
 0x66f   : > { %v3598_v43 = vadd.f32 %v3597_v27, %v3596_v25  ;;  %v3812_v57 = vadd.f32 %v3811_v21, %v3810_v46  ;;  %v8639_v16 = vadd.f32 %v3992_v12, %v3991_v54  ;;  %v4215_v13 = vmul.f32 %v4178_v5, %v9501_v51  ;;  %v9509_v25 = vld [vmem:[#allocation140_spill] sm:$0xff]  ;;  %v4722_v12 = vld [vmem:[%s6166_s20 + $0x48] sm:$0xff] }
 0x670   : > { %v3384_v61 = vadd.f32 %v3383_v1, %v3382_v37  ;;  %v3966_v10 = vpop.permute.xlu1 %3965  ;;  %v9511_v21 = vld [vmem:[#allocation32_spill] sm:$0xff]  ;;  %v9513_v1 = vld [vmem:[#allocation31_spill] sm:$0xff] }
 0x671   : > { %v3599_v17 = vrot.slane %v3598_v43, 1  ;;  %v3813_v22 = vrot.slane %v3812_v57, 2  ;;  %v4000_v34 = vmul.f32 %v3966_v10, %v9502_v58  ;;  %v4695_v15 = vmul.f32 %v8665_v19, %v9511_v21  ;;  %v4721_v51 = vld [vmem:[%s6166_s20 + $0x40] sm:$0xff] }
 0x672   : > { %v3387_v60 = vsel %vm3170_vm14, %v3384_v61, %v3371_v23  ;;  %4421 = vbcast.lane.b32.xlu1 %v8372_v4, 312  ;;  %v4359_v54 = vpop.permute.xlu0 %4358  ;;  %v4727_v4 = vld [vmem:[%s6166_s20 + $0x70] sm:$0xff]  ;;  %v9514_v23 = vld [vmem:[#allocation93_spill] sm:$0xff]  ;;  %v9524_v21 = vld [vmem:[#allocation64_spill] sm:$0xff] }
 0x673   : > { %3389 = vst [vmem:[#allocation7 + $0x2] sm:$0x3] %v3387_v60  ;;  %v3600_v3 = vadd.f32 %v3599_v17, %v3598_v43  ;;  %v3814_v9 = vadd.f32 %v3813_v22, %v3812_v57  ;;  %v4020_v11 = vadd.f32 %v4000_v34, %v3999_v20  ;;  %v4423_v29 = vmul.f32 %v4359_v54, %v9503_v33  ;;  %v9505_v20 = vld [vmem:[#allocation90_spill] sm:$0xff]  ;;  %v4720_v22 = vld [vmem:[%s6166_s20 + $0x38] sm:$0xff] }
 0x674   : > { %v4147_v62 = vpop.permute.xlu1 %4146  ;;  %5127 = vmatprep.subr.mxu0 %v4727_v4  ;;  %v9515_v34 = vld [vmem:[#allocation43_spill] sm:$0xff]  ;;  %v4719_v60 = vld [vmem:[%s6166_s20 + $0x30] sm:$0xff] }
 0x675   : > { %v3603_v30 = vsel %vm3170_vm14, %v3600_v3, %v3587_v0  ;;  %v3815_v2 = vrot.slane %v3814_v9, 1  ;;  %v4208_v31 = vmul.f32 %v4147_v62, %v9504_v56  ;;  %5128 = vmatpush3.msra.mxu0 %v4727_v4  ;;  %v5554_v55 = vpop.eup %5553  ;;  %v9516_v3 = vld [vmem:[#allocation116_spill] sm:$0xff] }
 0x676   : > { %3605 = vst [vmem:[#allocation7 + $0x4] sm:$0x3] %v3603_v30  ;;  %4637 = vbcast.lane.b32.xlu1 %v8390_v6, 312  ;;  %v4394_v7 = vpop.permute.xlu0 %4393  ;;  %5129 = vmatprep.subr.mxu0 %v4726_v63  ;;  %v4709_v5 = vmul.f32 %v5554_v55, %v9513_v1  ;;  %v9517_v30 = vld [vmem:[#allocation53_spill] sm:$0xff]  ;;  %v4717_v56 = vld [vmem:[%s6166_s20 + $0x20] sm:$0xff]  ;;  %v9523_v55 = vld [vmem:[#allocation131_spill] sm:$0xff] }
 0x677   : > { %v3816_v42 = vadd.f32 %v3815_v2, %v3814_v9  ;;  %v8651_v59 = vadd.f32 %v4208_v31, %v4207_v50  ;;  %v4431_v38 = vmul.f32 %v4394_v7, %v9505_v20  ;;  %5130 = vmatpush3.msra.mxu0 %v4726_v63  ;;  %v4723_v50 = vld [vmem:[%s6166_s20 + $0x50] sm:$0xff]  ;;  %v9518_v7 = vld [vmem:[#allocation45_spill] sm:$0xff]  ;;  %v9519_v20 = vld [vmem:[#allocation124_spill] sm:$0xff] }
 0x678   : > { %v4182_v32 = vpop.permute.xlu1 %4181  ;;  %5131 = vmatprep.subr.mxu0 %v4725_v14 }
 0x679   : > { %v3819_v8 = vsel %vm3170_vm14, %v3816_v42, %v3803_v48  ;;  %v4216_v6 = vmul.f32 %v4182_v32, %v9506_v35  ;;  %5132 = vmatpush3.msra.mxu0 %v4725_v14  ;;  %v4716_v48 = vld [vmem:[%s6166_s20 + $0x18] sm:$0xff]  ;;  %v4714_v14 = vld [vmem:[%s6166_s20 + $0x8] sm:$0xff] }
 0x67a   : > { %3821 = vst [vmem:[#allocation7 + $0x6] sm:$0x3] %v3819_v8  ;;  %v4575_v28 = vpop.permute.xlu0 %4574  ;;  %5133 = vmatprep.subr.mxu0 %v4724_v36  ;;  %v4715_v8 = vld [vmem:[%s6166_s20 + $0x10] sm:$0xff] }
 0x67b   : > { %v4236_v40 = vadd.f32 %v4216_v6, %v4215_v13  ;;  %v4639_v47 = vmul.f32 %v4575_v28, %v9507_v45  ;;  %5134 = vmatpush3.msra.mxu0 %v4724_v36  ;;  %v9520_v6 = vld [vmem:[#allocation41_spill] sm:$0xff]  ;;  %v9521_v45 = vld [vmem:[#allocation79_spill] sm:$0xff]  ;;  %v4713_v36 = vld [vmem:[%s6166_s20] sm:$0xff] }
 0x67c   : > { %v4363_v53 = vpop.permute.xlu1 %4362  ;;  %5135 = vmatprep.subr.mxu0 %v4723_v50 }
 0x67d   : > { %v4424_v46 = vmul.f32 %v4363_v53, %v9509_v25  ;;  %5136 = vmatpush3.msra.mxu0 %v4723_v50 }
 0x67e   : > { %v4610_v49 = vpop.permute.xlu0 %4609  ;;  %5137 = vmatprep.subr.mxu0 %v4722_v12 }
 0x67f   : > { %v8669_v37 = vadd.f32 %v4424_v46, %v4423_v29  ;;  %v4647_v26 = vmul.f32 %v4610_v49, %v9510_v18  ;;  %5138 = vmatpush3.msra.mxu0 %v4722_v12  ;;  %v4718_v29 = vld [vmem:[%s6166_s20 + $0x28] sm:$0xff]  ;;  %v9522_v46 = vld [vmem:[#allocation118_spill] sm:$0xff] }
 0x680   : > { %v4398_v27 = vpop.permute.xlu1 %4397  ;;  %5139 = vmatprep.subr.mxu0 %v4721_v51 }
 0x681   : > { %v4432_v52 = vmul.f32 %v4398_v27, %v9512_v24  ;;  %v4686_v41 = vld [vmem:[#allocation7] sm:$0xff]  ;;  %5140 = vmatpush3.msra.mxu0 %v4721_v51 }
 0x682   : > { %v3970_v43 = vpop.permute.xlu0 %3969  ;;  %v4697_v57 = vadd.f32 %v4695_v15, %v4686_v41  ;;  %5141 = vmatprep.subr.mxu0 %v4720_v22 }
 0x683   : > { %v4452_v13 = vadd.f32 %v4432_v52, %v4431_v38  ;;  %v4001_v61 = vmul.f32 %v3970_v43, %v9514_v23  ;;  %5142 = vmatpush3.msra.mxu0 %v4720_v22  ;;  %v9525_v52 = vld [vmem:[#allocation44_spill] sm:$0xff] }
 0x684   : > { %v4579_v10 = vpop.permute.xlu1 %4578  ;;  %v4711_v17 = vmul.f32 %v4709_v5, %v4697_v57  ;;  %5143 = vmatprep.subr.mxu0 %v4719_v60  ;;  %v9526_v5 = vld [vmem:[#allocation29_spill] sm:$0xff] }
 0x685   : > { %v8680_v58 = vadd.f32 %v4020_v11, %v4001_v61  ;;  %v4640_v0 = vmul.f32 %v4579_v10, %v9515_v34  ;;  %5144 = vmatpush3.msra.mxu0 %v4719_v60 }
 0x686   : > { %5157 = vmatprep.mubr.f32.mxu0 %v4711_v17  ;;  %v4186_v39 = vpop.permute.xlu0 %4185  ;;  %5145 = vmatprep.subr.mxu0 %v4718_v29  ;;  %v9528_v17 = vld [vmem:[#allocation34_spill] sm:$0xff] }
 0x687   : > { %v4655_v54 = vadd.f32 %v4640_v0, %v4639_v47  ;;  %v4217_v9 = vmul.f32 %v4186_v39, %v9516_v3  ;;  %5146 = vmatpush3.msra.mxu0 %v4718_v29  ;;  %v9529_v0 = vld [vmem:[#allocation102_spill] sm:$0xff] }
 0x688   : > { %v4614_v33 = vpop.permute.xlu1 %4613  ;;  %5147 = vmatprep.subr.mxu0 %v4717_v56 }
 0x689   : > { %v4237_v62 = vadd.f32 %v4236_v40, %v4217_v9  ;;  %v4648_v11 = vmul.f32 %v4614_v33, %v9517_v30  ;;  %5148 = vmatpush3.msra.mxu0 %v4717_v56  ;;  %v9530_v9 = vld [vmem:[#allocation54_spill] sm:$0xff]  ;;  %v9531_v30 = vld [vmem:[#allocation72_spill] sm:$0xff] }
 0x68a   : > { %v4402_v2 = vpop.permute.xlu0 %4401  ;;  %5149 = vmatprep.subr.mxu0 %v4716_v48 }
 0x68b   : > { %v4668_v31 = vadd.f32 %v4648_v11, %v4647_v26  ;;  %v4433_v44 = vmul.f32 %v4402_v2, %v9518_v7  ;;  %5150 = vmatpush3.msra.mxu0 %v4716_v48 }
 0x68c   : > { %v3935_v4 = vpop.permute.xlu1 %3934  ;;  %5151 = vmatprep.subr.mxu0 %v4715_v8 }
 0x68d   : > { %v4453_v42 = vadd.f32 %v4452_v13, %v4433_v44  ;;  %v3993_v38 = vmul.f32 %v3935_v4, %v9519_v20  ;;  %5152 = vmatpush3.msra.mxu0 %v4715_v8  ;;  %v9527_v13 = vld [vmem:[#allocation125_spill] sm:$0xff]  ;;  %v9533_v4 = vld [vmem:[#allocation36_spill] sm:$0xff] }
 0x68e   : > { %v4618_v32 = vpop.permute.xlu0 %4617  ;;  %5153 = vmatprep.subr.mxu0 %v4714_v14 }
 0x68f   : > { %v4008_v35 = vadd.f32 %v8639_v16, %v3993_v38  ;;  %v4649_v28 = vmul.f32 %v4618_v32, %v9520_v6  ;;  %5154 = vmatpush3.msra.mxu0 %v4714_v14  ;;  %v9534_v32 = vld [vmem:[#allocation61_spill] sm:$0xff]  ;;  %v9535_v6 = vld [vmem:[#allocation111_spill] sm:$0xff] }
 0x690   : > { %v4151_v63 = vpop.permute.xlu1 %4150  ;;  %5155 = vmatprep.subr.mxu0 %v4713_v36 }
 0x691   : > { %v4669_v40 = vadd.f32 %v4668_v31, %v4649_v28  ;;  %v4209_v47 = vmul.f32 %v4151_v63, %v9521_v45  ;;  %5156 = vmatpush3.msra.mxu0 %v4713_v36  ;;  %v9532_v31 = vld [vmem:[#allocation39_spill] sm:$0xff]  ;;  %v9536_v45 = vld [vmem:[#allocation145_spill] sm:$0xff]  ;;  %v9537_v36 = vld [vmem:[#allocation142_spill] sm:$0xff] }
 0x692   : > { %v3939_v53 = vpop.permute.xlu0 %3938 }
 0x693   : > { %v4224_v25 = vadd.f32 %v8651_v59, %v4209_v47  ;;  %v3994_v49 = vmul.f32 %v3939_v53, %v9522_v46 }
 0x694   : > { %v4367_v50 = vpop.permute.xlu1 %4366 }
 0x695   : > { %v4009_v16 = vadd.f32 %v4008_v35, %v3994_v49  ;;  %v4425_v18 = vmul.f32 %v4367_v50, %v9523_v55  ;;  %v9538_v50 = vld [vmem:[#allocation51_spill] sm:$0xff] }
 0x696   : > { %v4155_v26 = vpop.permute.xlu0 %4154 }
 0x697   : > { %v4440_v27 = vadd.f32 %v8669_v37, %v4425_v18  ;;  %v4210_v15 = vmul.f32 %v4155_v26, %v9524_v21  ;;  %v9539_v18 = vld [vmem:[#allocation110_spill] sm:$0xff] }
 0x698   : > { %v4583_v12 = vpop.permute.xlu1 %4582 }
 0x699   : > { %v4225_v24 = vadd.f32 %v4224_v25, %v4210_v15  ;;  %v4641_v41 = vmul.f32 %v4583_v12, %v9525_v52  ;;  %v9540_v15 = vld [vmem:[#allocation37_spill] sm:$0xff] }
 0x69a   : > { %v4371_v59 = vpop.permute.xlu0 %4370 }
 0x69b   : > { %v4656_v1 = vadd.f32 %v4655_v54, %v4641_v41  ;;  %v4426_v43 = vmul.f32 %v4371_v59, %v9526_v5  ;;  %v9541_v41 = vld [vmem:[#allocation42_spill] sm:$0xff] }
 0x69c   : > { %v3974_v57 = vpop.permute.xlu1 %3973 }
 0x69d   : > { %v4441_v51 = vadd.f32 %v4440_v27, %v4426_v43  ;;  %v4002_v23 = vmul.f32 %v3974_v57, %v9527_v13  ;;  %v9542_v43 = vld [vmem:[#allocation59_spill] sm:$0xff] }
 0x69e   : > { %v4587_v61 = vpop.permute.xlu0 %4586 }
 0x69f   : > { %v4022_v10 = vadd.f32 %v8680_v58, %v4002_v23  ;;  %v4642_v22 = vmul.f32 %v4587_v61, %v9528_v17  ;;  %v9543_v23 = vld [vmem:[#allocation137_spill] sm:$0xff] }
 0x6a0   : > { %v4190_v37 = vpop.permute.xlu1 %4189 }
 0x6a1   : > { %v4657_v34 = vadd.f32 %v4656_v1, %v4642_v22  ;;  %v4218_v39 = vmul.f32 %v4190_v37, %v9529_v0  ;;  %v9544_v22 = vld [vmem:[#allocation144_spill] sm:$0xff] }
 0x6a2   : > { %v3943_v60 = vpop.permute.xlu0 %3942 }
 0x6a3   : > { %v4238_v3 = vadd.f32 %v4237_v62, %v4218_v39  ;;  %v3995_v33 = vmul.f32 %v3943_v60, %v9530_v9  ;;  %v9545_v39 = vld [vmem:[#allocation129_spill] sm:$0xff] }
 0x6a4   : > { %v4406_v54 = vpop.permute.xlu1 %4405 }
 0x6a5   : > { %v4010_v29 = vadd.f32 %v4009_v16, %v3995_v33  ;;  %v4434_v11 = vmul.f32 %v4406_v54, %v9531_v30  ;;  %v9546_v33 = vld [vmem:[#allocation132_spill] sm:$0xff] }
 0x6a6   : > { %v4159_v2 = vpop.permute.xlu0 %4158 }
 0x6a7   : > { %v4454_v56 = vadd.f32 %v4453_v42, %v4434_v11  ;;  %v4211_v7 = vmul.f32 %v4159_v2, %v9532_v31  ;;  %v9547_v11 = vld [vmem:[#allocation46_spill] sm:$0xff] }
 0x6a8   : > { %v4622_v44 = vpop.permute.xlu1 %4621 }
 0x6a9   : > { %v4226_v58 = vadd.f32 %v4225_v24, %v4211_v7  ;;  %v4650_v48 = vmul.f32 %v4622_v44, %v9533_v4  ;;  %v9548_v7 = vld [vmem:[#allocation98_spill] sm:$0xff] }
 0x6aa   : > { %v4375_v20 = vpop.permute.xlu0 %4374 }
 0x6ab   : > { %v4670_v38 = vadd.f32 %v4669_v40, %v4650_v48  ;;  %v4427_v8 = vmul.f32 %v4375_v20, %v9534_v32  ;;  %v9549_v48 = vld [vmem:[#allocation147_spill] sm:$0xff] }
 0x6ac   : > { %v3978_v35 = vpop.permute.xlu1 %3977 }
 0x6ad   : > { %v4442_v62 = vadd.f32 %v4441_v51, %v4427_v8  ;;  %v4003_v28 = vmul.f32 %v3978_v35, %v9535_v6  ;;  %v9550_v8 = vld [vmem:[#allocation97_spill] sm:$0xff] }
 0x6ae   : > { %v4591_v63 = vpop.permute.xlu0 %4590 }
 0x6af   : > { %v4023_v14 = vadd.f32 %v4022_v10, %v4003_v28  ;;  %v4643_v47 = vmul.f32 %v4591_v63, %v9536_v45  ;;  %v9551_v28 = vld [vmem:[#allocation135_spill] sm:$0xff] }
 0x6b0   : > { %v4194_v53 = vpop.permute.xlu1 %4193 }
 0x6b1   : > { %v4658_v42 = vadd.f32 %v4657_v34, %v4643_v47  ;;  %v4219_v25 = vmul.f32 %v4194_v53, %v9537_v36  ;;  %v9552_v47 = vld [vmem:[#allocation146_spill] sm:$0xff] }
 0x6b2   : > { %v3947_v46 = vpop.permute.xlu0 %3946 }
 0x6b3   : > { %v4239_v49 = vadd.f32 %v4238_v3, %v4219_v25  ;;  %v3996_v16 = vmul.f32 %v3947_v46, %v9538_v50  ;;  %v9553_v25 = vld [vmem:[#allocation38_spill] sm:$0xff]  ;;  %v8732_v50 = vpop.f32.mrf.mxu0 }
 0x6b4   : > { %v4410_v55 = vpop.permute.xlu1 %4409 }
 0x6b5   : > { %v4011_v40 = vadd.f32 %v4010_v29, %v3996_v16  ;;  %v4435_v26 = vmul.f32 %v4410_v55, %v9539_v18  ;;  %v9554_v55 = vld [vmem:[#allocation84_spill] sm:$0xff] }
 0x6b6   : > { %v4163_v27 = vpop.permute.xlu0 %4162 }
 0x6b7   : > { %v4455_v21 = vadd.f32 %v4454_v56, %v4435_v26  ;;  %v4212_v12 = vmul.f32 %v4163_v27, %v9540_v15  ;;  %v9555_v27 = vld [vmem:[#allocation143_spill] sm:$0xff]  ;;  %v4700_v15 = vsub.f32 0.0, %v8732_v50 }
 0x6b8   : > { %v4626_v24 = vpop.permute.xlu1 %4625 }
 0x6b9   : > { %v4227_v52 = vadd.f32 %v4226_v58, %v4212_v12  ;;  %v4651_v59 = vmul.f32 %v4626_v24, %v9541_v41  ;;  %v9556_v41 = vld [vmem:[#allocation139_spill] sm:$0xff] }
 0x6ba   : > { %v4379_v1 = vpop.permute.xlu0 %4378 }
 0x6bb   : > { %v4671_v5 = vadd.f32 %v4670_v38, %v4651_v59  ;;  %v4428_v57 = vmul.f32 %v4379_v1, %v9542_v43  ;;  %v9557_v43 = vld [vmem:[#allocation150_spill] sm:$0xff] }
 0x6bc   : > { %v3982_v51 = vpop.permute.xlu1 %3981 }
 0x6bd   : > { %v4443_v13 = vadd.f32 %v4442_v62, %v4428_v57  ;;  %v4004_v61 = vmul.f32 %v3982_v51, %v9543_v23  ;;  %v4703_v51 = vmul.f32 1.442695, %v4700_v15 }
 0x6be   : > { %v4595_v10 = vpop.permute.xlu0 %4594 }
 0x6bf   : > { %v4024_v17 = vadd.f32 %v4023_v14, %v4004_v61  ;;  %v4644_v37 = vmul.f32 %v4595_v10, %v9544_v22  ;;  %v9558_v10 = vld [vmem:[#allocation35_spill] sm:$0xff]  ;;  %5555 = vpow2.f32 %v4703_v51 }
 0x6c0   : > { %v4198_v34 = vpop.permute.xlu1 %4197 }
 0x6c1   : > { %v4659_v0 = vadd.f32 %v4658_v42, %v4644_v37  ;;  %v4220_v60 = vmul.f32 %v4198_v34, %v9545_v39 }
 0x6c2   : > { %v3951_v3 = vpop.permute.xlu0 %3950 }
 0x6c3   : > { %v4240_v9 = vadd.f32 %v4239_v49, %v4220_v60  ;;  %v3997_v54 = vmul.f32 %v3951_v3, %v9546_v33 }
 0x6c4   : > { %v4414_v29 = vpop.permute.xlu1 %4413 }
 0x6c5   : > { %v4012_v30 = vadd.f32 %v4011_v40, %v3997_v54  ;;  %v4436_v2 = vmul.f32 %v4414_v29, %v9547_v11  ;;  %v9560_v29 = vld [vmem:[#allocation149_spill] sm:$0xff] }
 0x6c6   : > { %v4167_v56 = vpop.permute.xlu0 %4166 }
 0x6c7   : > { %v4456_v31 = vadd.f32 %v4455_v21, %v4436_v2  ;;  %v4213_v44 = vmul.f32 %v4167_v56, %v9548_v7 }
 0x6c8   : > { %v4630_v58 = vpop.permute.xlu1 %4629 }
 0x6c9   : > { %v4228_v4 = vadd.f32 %v4227_v52, %v4213_v44  ;;  %v4652_v20 = vmul.f32 %v4630_v58, %v9549_v48  ;;  %v9561_v44 = vld [vmem:[#allocation69_spill] sm:$0xff] }
 0x6ca   : > { %v4383_v38 = vpop.permute.xlu0 %4382 }
 0x6cb   : > { %v4672_v32 = vadd.f32 %v4671_v5, %v4652_v20  ;;  %v4429_v35 = vmul.f32 %v4383_v38, %v9550_v8 }
 0x6cc   : > { %v3986_v62 = vpop.permute.xlu1 %3985 }
 0x6cd   : > { %v4444_v6 = vadd.f32 %v4443_v13, %v4429_v35  ;;  %v4005_v63 = vmul.f32 %v3986_v62, %v9551_v28  ;;  %v9562_v35 = vld [vmem:[#allocation148_spill] sm:$0xff] }
 0x6ce   : > { %v4599_v14 = vpop.permute.xlu0 %4598 }
 0x6cf   : > { %v4025_v45 = vadd.f32 %v4024_v17, %v4005_v63  ;;  %v4645_v53 = vmul.f32 %v4599_v14, %v9552_v47 }
 0x6d0   : > { %v4202_v42 = vpop.permute.xlu1 %4201 }
 0x6d1   : > { %v4660_v36 = vadd.f32 %v4659_v0, %v4645_v53  ;;  %v4221_v46 = vmul.f32 %v4202_v42, %v9553_v25  ;;  %v9559_v0 = vld [vmem:[#allocation138_spill] sm:$0xff] }
 0x6d2   : > { %v3955_v49 = vpop.permute.xlu0 %3954 }
 0x6d3   : > { %v4241_v16 = vadd.f32 %v4240_v9, %v4221_v46  ;;  %v3998_v40 = vmul.f32 %v3955_v49, %v9554_v55  ;;  %v9563_v49 = vld [vmem:[#allocation151_spill] sm:$0xff] }
 0x6d4   : > { %v4418_v18 = vpop.permute.xlu1 %4417 }
 0x6d5   : > { %v4013_v26 = vadd.f32 %v4012_v30, %v3998_v40  ;;  %v4437_v21 = vmul.f32 %v4418_v18, %v9555_v27 }
 0x6d6   : > { %v4171_v12 = vpop.permute.xlu0 %4170 }
 0x6d7   : > { %v4014_v24 = vrot.slane %v4013_v26, 4  ;;  %v4457_v52 = vadd.f32 %v4456_v31, %v4437_v21  ;;  %v4214_v59 = vmul.f32 %v4171_v12, %v9556_v41 }
 0x6d8   : > { %v4634_v1 = vpop.permute.xlu1 %4633 }
 0x6d9   : > { %v4229_v5 = vadd.f32 %v4228_v4, %v4214_v59  ;;  %v4653_v57 = vmul.f32 %v4634_v1, %v9557_v43  ;;  %v4015_v13 = vadd.f32 %v4014_v24, %v4013_v26  ;;  %v5556_v26 = vpop.eup %5555 }
 0x6da   : > { %v4387_v23 = vpop.permute.xlu0 %4386 }
 0x6db   : > { %v4673_v61 = vadd.f32 %v4672_v32, %v4653_v57  ;;  %v4430_v17 = vmul.f32 %v4387_v23, %v9558_v10  ;;  %v4230_v22 = vrot.slane %v4229_v5, 4  ;;  %v4016_v60 = vrot.slane %v4015_v13, 2 }
 0x6dc   : > { %v3990_v37 = vpop.permute.xlu1 %3989 }
 0x6dd   : > { %v4445_v34 = vadd.f32 %v4444_v6, %v4430_v17  ;;  %v4006_v39 = vmul.f32 %v3990_v37, %v9559_v0  ;;  %v4231_v54 = vadd.f32 %v4230_v22, %v4229_v5  ;;  %v4017_v56 = vadd.f32 %v4016_v60, %v4015_v13 }
 0x6de   : > { %v4603_v3 = vpop.permute.xlu0 %4602  ;;  %v4706_v5 = vadd.f32 1.0, %v5556_v26 }
 0x6df   : > { %v4446_v9 = vrot.slane %v4445_v34, 4  ;;  %v4026_v33 = vadd.f32 %v4025_v45, %v4006_v39  ;;  %v4646_v30 = vmul.f32 %v4603_v3, %v9560_v29  ;;  %v4232_v48 = vrot.slane %v4231_v54, 2 }
 0x6e0   : > { %v4206_v11 = vpop.permute.xlu1 %4205  ;;  %v4018_v6 = vrot.slane %v4017_v56, 1  ;;  %5557 = vrcp.f32 %v4706_v5 }
 0x6e1   : > { %v4027_v2 = vrot.slane %v4026_v33, 4  ;;  %v4447_v31 = vadd.f32 %v4446_v9, %v4445_v34  ;;  %v4661_v7 = vadd.f32 %v4660_v36, %v4646_v30  ;;  %v4222_v58 = vmul.f32 %v4206_v11, %v9561_v44  ;;  %v9564_v11 = vld [vmem:[#allocation33_spill] sm:$0xff] }
 0x6e2   : > { %v4233_v53 = vadd.f32 %v4232_v48, %v4231_v54  ;;  %v4019_v40 = vadd.f32 %v4018_v6, %v4017_v56 }
 0x6e3   : > { %v4028_v4 = vadd.f32 %v4027_v2, %v4026_v33  ;;  %v4662_v20 = vrot.slane %v4661_v7, 4  ;;  %v4242_v38 = vadd.f32 %v4241_v16, %v4222_v58  ;;  %v4448_v28 = vrot.slane %v4447_v31, 2 }
 0x6e4   : > { %v4422_v32 = vpop.permute.xlu1 %4421  ;;  %v4234_v24 = vrot.slane %v4233_v53, 1  ;;  %v4696_v2 = vmul.f32 %v8665_v19, %v9564_v11 }
 0x6e5   : > { %v4029_v8 = vrot.slane %v4028_v4, 2  ;;  %v4438_v62 = vmul.f32 %v4422_v32, %v9562_v35  ;;  %v4243_v63 = vrot.slane %v4242_v38, 4  ;;  %v4663_v45 = vadd.f32 %v4662_v20, %v4661_v7 }
 0x6e6   : > { %v4449_v18 = vadd.f32 %v4448_v28, %v4447_v31  ;;  %v4235_v10 = vadd.f32 %v4234_v24, %v4233_v53 }
 0x6e7   : > { %v4030_v14 = vadd.f32 %v4029_v8, %v4028_v4  ;;  %v4458_v47 = vadd.f32 %v4457_v52, %v4438_v62  ;;  %v4244_v42 = vadd.f32 %v4243_v63, %v4242_v38  ;;  %v4664_v21 = vrot.slane %v4663_v45, 2  ;;  %v5565_v4 = vld [vmem:[#allocation2 + $0x8] sm:$0xff]  ;;  %v5566_v38 = vld [vmem:[#allocation2] sm:$0xff] }
 0x6e8   : > { %v4638_v25 = vpop.permute.xlu1 %4637  ;;  %v4450_v57 = vrot.slane %v4449_v18, 1 }
 0x6e9   : > { %v4031_v36 = vrot.slane %v4030_v14, 1  ;;  %v4459_v46 = vrot.slane %v4458_v47, 4  ;;  %v4654_v55 = vmul.f32 %v4638_v25, %v9563_v49  ;;  %v4245_v16 = vrot.slane %v4244_v42, 2 }
 0x6ea   : > { %v4665_v51 = vadd.f32 %v4664_v21, %v4663_v45  ;;  %v4451_v34 = vadd.f32 %v4450_v57, %v4449_v18 }
 0x6eb   : > { %v4032_v27 = vadd.f32 %v4031_v36, %v4030_v14  ;;  %v4460_v15 = vadd.f32 %v4459_v46, %v4458_v47  ;;  %v4674_v12 = vadd.f32 %v4673_v61, %v4654_v55  ;;  %v4246_v41 = vadd.f32 %v4245_v16, %v4244_v42 }
 0x6ec   : > { %v4666_v0 = vrot.slane %v4665_v51, 1 }
 0x6ed   : > { %v4035_v59 = vsel %vm3170_vm14, %v4032_v27, %v4019_v40  ;;  %v4461_v52 = vrot.slane %v4460_v15, 2  ;;  %v4675_v1 = vrot.slane %v4674_v12, 4  ;;  %v4247_v43 = vrot.slane %v4246_v41, 1  ;;  %v5558_v30 = vpop.eup %5557 }
 0x6ee   : > { %4037 = vst [vmem:[#allocation7 + $0x8] sm:$0x3] %v4035_v59  ;;  %v4667_v33 = vadd.f32 %v4666_v0, %v4665_v51  ;;  %v4710_v31 = vmul.f32 %v5558_v30, %v8732_v50 }
 0x6ef   : > { %v4462_v13 = vadd.f32 %v4461_v52, %v4460_v15  ;;  %v4676_v23 = vadd.f32 %v4675_v1, %v4674_v12  ;;  %v4248_v17 = vadd.f32 %v4247_v43, %v4246_v41 }
 0x6f1   : > { %v4463_v22 = vrot.slane %v4462_v13, 1  ;;  %v4677_v37 = vrot.slane %v4676_v23, 2  ;;  %v4251_v61 = vsel %vm3170_vm14, %v4248_v17, %v4235_v10 }
 0x6f2   : > { %4253 = vst [vmem:[#allocation7 + $0xa] sm:$0x3] %v4251_v61 }
 0x6f3   : > { %v4464_v39 = vadd.f32 %v4463_v22, %v4462_v13  ;;  %v4678_v60 = vadd.f32 %v4677_v37, %v4676_v23 }
 0x6f5   : > { %v4467_v3 = vsel %vm3170_vm14, %v4464_v39, %v4451_v34  ;;  %v4679_v9 = vrot.slane %v4678_v60, 1 }
 0x6f6   : > { %4469 = vst [vmem:[#allocation7 + $0xc] sm:$0x3] %v4467_v3 }
 0x6f7   : > { %v4680_v54 = vadd.f32 %v4679_v9, %v4678_v60 }
 0x6f9   : > { %v4683_v29 = vsel %vm3170_vm14, %v4680_v54, %v4667_v33 }
 0x6fa   : > { %4685 = vst [vmem:[#allocation7 + $0xe] sm:$0x3] %v4683_v29 }
 0x701   : > { %v4687_v56 = vld [vmem:[#allocation7 + $0x8] sm:$0xff] }
 0x702   : > { %v4698_v7 = vadd.f32 %v4696_v2, %v4687_v56 }
 0x704   : > { %v4712_v44 = vmul.f32 %v4710_v31, %v4698_v7 }
 0x706   : > { %5158 = vmatmul.mubr.f32.vlgmr.msra.gmra.mxu0 %v4712_v44 }
 0x7c6   : > { %v5159_v58 = vpop.f32.mrf.mxu0 }
 0x7c7   : > { %v4805_v48 = vadd.f32 %v5565_v4, %v5159_v58  ;;  %4811 = sbr.rel (%p5087_p13) target bundleno = 1998 (0x7ce), region = 112 }
 0x7c8   : > { %v4795_v20 = vpop.f32.mrf.mxu0 }
 0x7c9   : > { %4807 = vst.msk [vmem:[#allocation2 + $0x8] sm:$0xff] %vm874_vm5, %v4805_v48  ;;  %v4804_v32 = vadd.f32 %v5566_v38, %v4795_v20 }
 0x7cb   : > { %4806 = vst.msk [vmem:[#allocation2] sm:$0xff] %vm874_vm5, %v4804_v32 }
 0x7cc   : > { %vm4812_vm15 = vcmask 523270  }
 0x7cd   : > { %4813 = vst.msk [vmem:[#allocation20 - $0x6] sm:$0xc0] %vm4812_vm15, %v4805_v48 }
 0x7ce PF: > { %p5214_p1 = scmp.eq.s32.totalorder %s5968_s19, 1  ;;  %s5863_s28 = smov [#allocation20]  }
 0x7cf   : > { %s4823_s24 = sshll.u32 %s5863_s28, 4  ;;  %s4824_s24 = int_to_ptr.vmem [resolvable:$true] %s4823_s24 }
 0x7d0   : > { %s5757_s1 = scalar_lea.vmem %s4824_s24, 32  ;;  %p5764_p10 = scmp.lt.s32.totalorder %s4824_s24, %s4824_s24 }
 0x7d1   : > { %p5758_p6 = scmp.ne.s32.totalorder %s4824_s24, %s5757_s1  ;;  %p5765_p11 = scmp.lt.s32.totalorder %s5757_s1, %s5757_s1 }
 0x7d3   : > { %p5759_p8 = pnand %p5758_p6, %p5214_p1  ;;  %p5766_p12 = por %p5765_p11, %p5764_p10 }
 0x7d5   : > { %p5760_p0 = pneg %p5759_p8 }
 0x7d7   : > { %p5767_p7 = pnand %p5766_p12, %p5760_p0 }
 0x7d9   : > { %5770 = shalt.err (!%p5767_p7)
}
 0x7da   : > { %s9565_s13 = sld [smem:[#allocation178_spill]] }
 0x7e0   : > { %5181 = dma.vmem_to_hbm [thread:$0]  (%p5214_p1), %s4824_s24, 32, %s9565_s13, [#allocation10]  }
 0x7e1   : > { %5822 = dma.done.wait (%p5214_p1), [#allocation10], 32  }
 0x7e2   : > { %5824 = vsyncadd (%p5214_p1), [#allocation10], 4294967264 }
 0x7e3 PF: > { %s33_s18 = sadd.s32 1, %s5847_s18   ;;  %s9566_s11 = sld [smem:[#allocation26_spill]] }
 0x7e4   : > { %p30_p2 = scmp.ge.s32.totalorder %s33_s18, 4   ;;  %s9567_s15 = sld [smem:[#allocation28_spill]] }
 0x7e5   : > { %s9568_s21 = sld [smem:[#allocation27_spill]]  ;;  %s9569_s29 = smov %s5831_s30 }
 0x7e6   : > { %s9571_s16 = smov %s5843_s17 }
 0x7e7   :  { %32 = sbr.rel (!%p30_p2) target bundleno = 24 (0x18), region = 206 }
 0x7e9   : > { %s9570_s30 = smov %s9566_s11 }
 0x7eb   : > { %s9572_s17 = smov %s9568_s21 }
 0x7ec   :  { %4836 = vsyncpa [#allocation9], 1 }
 0x7ed   :  { %4838 = vsyncpa [#allocation9 + $0x1], 1 }
 0x7ee   :  { %4839 = vsyncpa [#allocation12], 1 }
 0x7ef   :  { %4840 = vsyncpa [#allocation15], 1 }
 0x7f0   :  { %4842 = vsyncpa [#allocation15 + $0x1], 1 }
 0x7f1   :  { %4843 = vsyncpa [#allocation18], 1 }
 0x7f2   :  { %4845 = vsyncpa [#allocation18 + $0x1], 1 }
 0x7f3   :  { %4846 = vsyncpa [#allocation10], 1 }
 0x7f4   :  { %4848 = vsyncpa [#allocation10 + $0x1], 1 }

</bundles_post_ra>
